<compile_context>
chip_gen: v7x
topology: tpu7x:2x2x1
jax: 0.10.0
libtpu: 0.0.40
codegen_flags: <defaults>
</compile_context>

<pallas_src>
import jax
import jax.numpy as jnp
from jax import lax
from jax.experimental import pallas as pl
from jax.experimental.pallas import tpu as pltpu


# --------------------------------------------------------------------------
# Bilinear interpolation operator, align_corners=True:  up(x) = A @ x
# --------------------------------------------------------------------------
def _interp_matrix(out_size, in_size):
    if out_size == 1:
        src = jnp.zeros((1,), jnp.float32)
    else:
        src = jnp.arange(out_size, dtype=jnp.float32) * (in_size - 1) / (out_size - 1)
    lo = jnp.clip(jnp.floor(src).astype(jnp.int32), 0, in_size - 1)
    hi = jnp.clip(lo + 1, 0, in_size - 1)
    frac = src - lo.astype(jnp.float32)
    cols = jnp.arange(in_size)
    A = (jnp.where(cols[None, :] == lo[:, None], 1.0 - frac[:, None], 0.0)
         + jnp.where(cols[None, :] == hi[:, None], frac[:, None], 0.0))
    return A.astype(jnp.float32)                      # (out_size, in_size)


# --------------------------------------------------------------------------
# Fused kernel: W-upsample + VMEM concat + (conv3x3 + BN + ReLU) x 2
# --------------------------------------------------------------------------
def _up_fused_kernel(x1h_ref, x2_ref, aw_ref,
                     w1_ref, s1_ref, b1_ref, w2_ref, s2_ref, b2_ref,
                     o_ref, p_ref, pt_ref, acc_ref):
    # x1h_ref: (1, H2, W, C1)   f32  x1 already upsampled along H (wrapper side)
    # x2_ref : (1, H2, W2, C2)  f32  skip connection, NHWC
    # aw_ref : (W2, W)          f32  bilinear operator for the W direction
    # w*_ref : (3, 3*Cp, Cout)  bf16 HWIO conv weights, Cin zero-padded to Cp,
    #                                (dx, c) flattened so each dy tap has K=3*Cp
    # s*/b*  : (1, Cout)        f32  folded eval-mode BatchNorm scale / bias
    # o_ref  : (1, Cout, H2*W2)      lane-dense NC(HW) output (no wrapper transpose)
    # p_ref  : (H2+2, W2+2, Cp) f32  shared padded activation (concat & conv2 input)
    # pt_ref : (H2, W2, 3*Cp)   bf16 per-dy MXU operand (3 dx shifts side by side)
    # acc_ref: (H2*W2, Cout)    f32  conv accumulator
    H2, W2, C2 = x2_ref.shape[1], x2_ref.shape[2], x2_ref.shape[3]
    W, C1 = x1h_ref.shape[2], x1h_ref.shape[3]
    Cout = o_ref.shape[1]
    Cp = p_ref.shape[2]
    Ccat = C1 + C2
    HW2 = H2 * W2

    # ---- halo-only zeroing (interior is fully overwritten every step) ----
    p_ref[0:1, :, :] = jnp.zeros((1, W2 + 2, Cp), jnp.float32)
    p_ref[H2 + 1:H2 + 2, :, :] = jnp.zeros((1, W2 + 2, Cp), jnp.float32)
    p_ref[:, 0:1, :] = jnp.zeros((H2 + 2, 1, Cp), jnp.float32)
    p_ref[:, W2 + 1:W2 + 2, :] = jnp.zeros((H2 + 2, 1, Cp), jnp.float32)

    # ---- finish the separable bilinear upsample (W direction), batched over H2 ----
    aw_b = jnp.broadcast_to(aw_ref[...], (H2, W2, W))
    x1u = lax.dot_general(aw_b, x1h_ref[0],
                          (((2,), (1,)), ((0,), (0,))),
                          preferred_element_type=jnp.float32)        # (H2, W2, C1)

    # ---- concat([x2, up(x1)], channel axis) straight into the padded scratch ----
    p_ref[1:H2 + 1, 1:W2 + 1, 0:C2] = x2_ref[0]
    p_ref[1:H2 + 1, 1:W2 + 1, C2:Ccat] = x1u
    if Cp > Ccat:   # static: keep the (zero-weight) padding channels finite
        p_ref[1:H2 + 1, 1:W2 + 1, Ccat:Cp] = jnp.zeros((H2, W2, Cp - Ccat),
                                                       jnp.float32)

    def conv3x3_bn_relu(w_ref, s_ref, b_ref):
        # 3 MXU matmuls with K = 3*Cp (dx taps folded), bf16 operands, f32 acc.
        for dy in range(3):
            for dx in range(3):
                pt_ref[:, :, dx * Cp:(dx + 1) * Cp] = (
                    p_ref[dy:dy + H2, dx:dx + W2, :].astype(jnp.bfloat16))
            contrib = jnp.dot(pt_ref[...].reshape(HW2, 3 * Cp), w_ref[dy],
                              preferred_element_type=jnp.float32)
            if dy == 0:
                acc_ref[...] = contrib
            else:
                acc_ref[...] += contrib
        return jnp.maximum(acc_ref[...] * s_ref[...] + b_ref[...], 0.0)

    # ---- conv1 + BN + ReLU; intermediate stays in VMEM (same padded scratch) ----
    y1 = conv3x3_bn_relu(w1_ref, s1_ref, b1_ref)
    p_ref[1:H2 + 1, 1:W2 + 1, 0:Cout] = y1.reshape(H2, W2, Cout)
    # (channels [Cout:Cp], if any, still hold finite conv1 inputs; w2 is zero
    #  padded there, so no re-zeroing is required.)

    # ---- conv2 + BN + ReLU -> lane-dense (Cout, H2*W2) store (NCHW flattened) ----
    y2 = conv3x3_bn_relu(w2_ref, s2_ref, b2_ref)
    o_ref[0] = jnp.transpose(y2).astype(o_ref.dtype)


# --------------------------------------------------------------------------
# Up module forward (matches PyTorch Up.forward(x1, x2), eval-mode BN)
# --------------------------------------------------------------------------
def fold_bn(gamma, beta, mean, var, eps=1e-5):
    scale = gamma / jnp.sqrt(var + eps)
    bias = beta - mean * scale
    return scale[None, :], bias[None, :]              # (1, C)


def up_forward(x1_nchw, x2_nchw, params, scale_factor=2):
    N, C1, H, W = x1_nchw.shape
    N2, C2, H2, W2 = x2_nchw.shape
    assert N2 == N and H2 == H * scale_factor and W2 == W * scale_factor
    Cin = C1 + C2
    Cout = params["w1"].shape[-1]
    Cp = max(Cin, Cout)

    ah = _interp_matrix(H2, H)                         # (H2, H)
    aw = _interp_matrix(W2, W)                         # (W2, W)

    # Separable upsample, H half on the small x1 here (XLA); also hands the
    # kernel x1 in the layout it needs with no in-kernel transpose.
    x1h = jnp.einsum("oh,nchw->nowc", ah, x1_nchw)     # (N, H2, W, C1)

    # TODO(synk): drops entirely if the surrounding model runs NHWC.
    x2_nhwc = jnp.transpose(x2_nchw, (0, 2, 3, 1))     # (N, H2, W2, C2)

    def prep_w(w, cin):
        # HWIO (3, 3, cin, Cout) -> (3, 3*Cp, Cout) bf16, Cin zero-padded to Cp.
        if Cp > cin:
            w = jnp.pad(w, ((0, 0), (0, 0), (0, Cp - cin), (0, 0)))
        return w.reshape(3, 3 * Cp, Cout).astype(jnp.bfloat16)

    w1 = prep_w(params["w1"], Cin)
    w2 = prep_w(params["w2"], Cout)

    out = pl.pallas_call(
        _up_fused_kernel,
        out_shape=jax.ShapeDtypeStruct((N, Cout, H2 * W2), x1_nchw.dtype),
        grid=(N,),
        in_specs=[
            pl.BlockSpec((1, H2, W, C1), lambda n: (n, 0, 0, 0)),
            pl.BlockSpec((1, H2, W2, C2), lambda n: (n, 0, 0, 0)),
            pl.BlockSpec((W2, W), lambda n: (0, 0)),
            pl.BlockSpec((3, 3 * Cp, Cout), lambda n: (0, 0, 0)),
            pl.BlockSpec((1, Cout), lambda n: (0, 0)),
            pl.BlockSpec((1, Cout), lambda n: (0, 0)),
            pl.BlockSpec((3, 3 * Cp, Cout), lambda n: (0, 0, 0)),
            pl.BlockSpec((1, Cout), lambda n: (0, 0)),
            pl.BlockSpec((1, Cout), lambda n: (0, 0)),
        ],
        out_specs=pl.BlockSpec((1, Cout, H2 * W2), lambda n: (n, 0, 0)),
        scratch_shapes=[
            pltpu.VMEM((H2 + 2, W2 + 2, Cp), jnp.float32),   # shared padded act
            pltpu.VMEM((H2, W2, 3 * Cp), jnp.bfloat16),      # dy-tap MXU operand
            pltpu.VMEM((H2 * W2, Cout), jnp.float32),        # f32 accumulator
        ],
        compiler_params=pltpu.CompilerParams(
            dimension_semantics=("parallel",),
            vmem_limit_bytes=64 * 1024 * 1024),
    )(x1h, x2_nhwc, aw, w1, params["s1"], params["b1"],
      w2, params["s2"], params["b2"])

    return out.reshape(N, Cout, H2, W2)                # free metadata reshape


# --------------------------------------------------------------------------
# Pure-JAX reference (f32, sanity check)
# --------------------------------------------------------------------------
def _ref_forward(x1, x2, params, scale_factor=2):
    N, C1, H, W = x1.shape
    Ah = _interp_matrix(H * scale_factor, H)
    Aw = _interp_matrix(W * scale_factor, W)
    x1u = jnp.einsum("oh,nchw,pw->ncop", Ah, x1, Aw)
    x = jnp.concatenate([x2, x1u], axis=1)
    x = jnp.transpose(x, (0, 2, 3, 1))
    for wk, sk, bk in (("w1", "s1", "b1"), ("w2", "s2", "b2")):
        x = lax.conv_general_dilated(
            x, params[wk], window_strides=(1, 1), padding="SAME",
            dimension_numbers=("NHWC", "HWIO", "NHWC"))
        x = jnp.maximum(x * params[sk][0] + params[bk][0], 0.0)
    return jnp.transpose(x, (0, 3, 1, 2))


if __name__ == "__main__":
    key = jax.random.PRNGKey(0)
    k = jax.random.split(key, 12)

    # Small U-Net-ish shapes: x1 = low-res feature map, x2 = skip connection.
    N, C1, C2, H, W = 2, 4, 4, 8, 8
    in_channels = C1 + C2           # 8
    out_channels = 8
    scale_factor = 2

    x1 = jax.random.normal(k[0], (N, C1, H, W), jnp.float32)
    x2 = jax.random.normal(k[1], (N, C2, H * scale_factor, W * scale_factor),
                           jnp.float32)

    # Deterministic synthetic parameters (HWIO conv weights, eval-mode BN stats).
    w1 = 0.1 * jax.random.normal(k[2], (3, 3, in_channels, out_channels), jnp.float32)
    w2 = 0.1 * jax.random.normal(k[3], (3, 3, out_channels, out_channels), jnp.float32)
    g1 = 1.0 + 0.1 * jax.random.normal(k[4], (out_channels,), jnp.float32)
    b1 = 0.1 * jax.random.normal(k[5], (out_channels,), jnp.float32)
    m1 = 0.1 * jax.random.normal(k[6], (out_channels,), jnp.float32)
    v1 = jnp.abs(jax.random.normal(k[7], (out_channels,), jnp.float32)) + 0.5
    g2 = 1.0 + 0.1 * jax.random.normal(k[8], (out_channels,), jnp.float32)
    b2 = 0.1 * jax.random.normal(k[9], (out_channels,), jnp.float32)
    m2 = 0.1 * jax.random.normal(k[10], (out_channels,), jnp.float32)
    v2 = jnp.abs(jax.random.normal(k[11], (out_channels,), jnp.float32)) + 0.5

    s1, bb1 = fold_bn(g1, b1, m1, v1)
    s2, bb2 = fold_bn(g2, b2, m2, v2)
    params = {"w1": w1, "s1": s1, "b1": bb1, "w2": w2, "s2": s2, "b2": bb2}

    out = up_forward(x1, x2, params, scale_factor)
    out = jax.block_until_ready(out)

    ref = jax.block_until_ready(_ref_forward(x1, x2, params, scale_factor))
    assert out.shape == (N, out_channels, H * scale_factor, W * scale_factor)
    # bf16 MXU operands (f32 accumulation) -> slightly looser tolerance.
    assert jnp.allclose(out, ref, atol=5e-2, rtol=5e-2), \
        float(jnp.abs(out - ref).max())

    print("KERNEL_OK")
</pallas_src>

<mosaic_0001>
module attributes {stable_mosaic.version = 11 : i64} {
  func.func @_up_fused_kernel(%arg0: i32, %arg1: memref<1x16x8x4xf32, #tpu.memory_space<vmem>>, %arg2: memref<1x16x16x4xf32, #tpu.memory_space<vmem>>, %arg3: memref<16x8xf32, #tpu.memory_space<vmem>>, %arg4: memref<3x24x8xbf16, #tpu.memory_space<vmem>>, %arg5: memref<1x8xf32, #tpu.memory_space<vmem>>, %arg6: memref<1x8xf32, #tpu.memory_space<vmem>>, %arg7: memref<3x24x8xbf16, #tpu.memory_space<vmem>>, %arg8: memref<1x8xf32, #tpu.memory_space<vmem>>, %arg9: memref<1x8xf32, #tpu.memory_space<vmem>>, %arg10: memref<1x8x256xf32, #tpu.memory_space<vmem>>, %arg11: memref<18x18x8xf32, #tpu.memory_space<vmem>>, %arg12: memref<16x16x24xbf16, #tpu.memory_space<vmem>>, %arg13: memref<256x8xf32, #tpu.memory_space<vmem>>) attributes {dimension_semantics = [#tpu.dimension_semantics<parallel>], iteration_bounds = array<i64: 2>, scalar_prefetch = 0 : i64, scratch_operands = 3 : i64, tpu.core_type = #tpu.core_type<tc>, window_params = [{transform_indices = @transform_0, window_bounds = array<i64: 1, 16, 8, 4>}, {transform_indices = @transform_1, window_bounds = array<i64: 1, 16, 16, 4>}, {pipeline_mode = #tpu.pipeline_mode<synchronous>, transform_indices = @transform_2, window_bounds = array<i64: 16, 8>}, {pipeline_mode = #tpu.pipeline_mode<synchronous>, transform_indices = @transform_3, window_bounds = array<i64: 3, 24, 8>}, {pipeline_mode = #tpu.pipeline_mode<synchronous>, transform_indices = @transform_4, window_bounds = array<i64: 1, 8>}, {pipeline_mode = #tpu.pipeline_mode<synchronous>, transform_indices = @transform_5, window_bounds = array<i64: 1, 8>}, {pipeline_mode = #tpu.pipeline_mode<synchronous>, transform_indices = @transform_6, window_bounds = array<i64: 3, 24, 8>}, {pipeline_mode = #tpu.pipeline_mode<synchronous>, transform_indices = @transform_7, window_bounds = array<i64: 1, 8>}, {pipeline_mode = #tpu.pipeline_mode<synchronous>, transform_indices = @transform_8, window_bounds = array<i64: 1, 8>}, {transform_indices = @transform_9, window_bounds = array<i64: 1, 8, 256>}]} {
    %cst = arith.constant 0.000000e+00 : f32
    %0 = vector.broadcast %cst : f32 to vector<1x18x8xf32>
    %c0 = arith.constant 0 : index
    %c0_0 = arith.constant 0 : index
    %c0_1 = arith.constant 0 : index
    %1 = vector.load %arg11[%c0, %c0_0, %c0_1] : memref<18x18x8xf32, #tpu.memory_space<vmem>>, vector<1x18x8xf32>
    tpu.vector_store %arg11[%c0, %c0_0, %c0_1], %0 {strides = array<i32>} : memref<18x18x8xf32, #tpu.memory_space<vmem>>, vector<1x18x8xf32>,
    %cst_2 = arith.constant 0.000000e+00 : f32
    %2 = vector.broadcast %cst_2 : f32 to vector<1x18x8xf32>
    %c17 = arith.constant 17 : index
    %c0_3 = arith.constant 0 : index
    %c0_4 = arith.constant 0 : index
    %3 = vector.load %arg11[%c17, %c0_3, %c0_4] : memref<18x18x8xf32, #tpu.memory_space<vmem>>, vector<1x18x8xf32>
    tpu.vector_store %arg11[%c17, %c0_3, %c0_4], %2 {strides = array<i32>} : memref<18x18x8xf32, #tpu.memory_space<vmem>>, vector<1x18x8xf32>,
    %cst_5 = arith.constant 0.000000e+00 : f32
    %4 = vector.broadcast %cst_5 : f32 to vector<18x1x8xf32>
    %c0_6 = arith.constant 0 : index
    %c0_7 = arith.constant 0 : index
    %c0_8 = arith.constant 0 : index
    %5 = vector.load %arg11[%c0_6, %c0_7, %c0_8] : memref<18x18x8xf32, #tpu.memory_space<vmem>>, vector<18x1x8xf32>
    tpu.vector_store %arg11[%c0_6, %c0_7, %c0_8], %4 {strides = array<i32>} : memref<18x18x8xf32, #tpu.memory_space<vmem>>, vector<18x1x8xf32>,
    %cst_9 = arith.constant 0.000000e+00 : f32
    %6 = vector.broadcast %cst_9 : f32 to vector<18x1x8xf32>
    %c0_10 = arith.constant 0 : index
    %c17_11 = arith.constant 17 : index
    %c0_12 = arith.constant 0 : index
    %7 = vector.load %arg11[%c0_10, %c17_11, %c0_12] : memref<18x18x8xf32, #tpu.memory_space<vmem>>, vector<18x1x8xf32>
    tpu.vector_store %arg11[%c0_10, %c17_11, %c0_12], %6 {strides = array<i32>} : memref<18x18x8xf32, #tpu.memory_space<vmem>>, vector<18x1x8xf32>,
    %c0_13 = arith.constant 0 : index
    %c0_14 = arith.constant 0 : index
    %8 = vector.load %arg3[%c0_13, %c0_14] : memref<16x8xf32, #tpu.memory_space<vmem>>, vector<16x8xf32>
    %9 = vector.shape_cast %8 : vector<16x8xf32> to vector<1x16x8xf32>
    %10 = vector.broadcast %9 : vector<1x16x8xf32> to vector<16x16x8xf32>
    %c0_15 = arith.constant 0 : index
    %c0_16 = arith.constant 0 : index
    %c0_17 = arith.constant 0 : index
    %c0_18 = arith.constant 0 : index
    %11 = vector.load %arg1[%c0_15, %c0_16, %c0_17, %c0_18] : memref<1x16x8x4xf32, #tpu.memory_space<vmem>>, vector<1x16x8x4xf32>
    %12 = vector.shape_cast %11 : vector<1x16x8x4xf32> to vector<16x8x4xf32>
    %cst_19 = arith.constant dense<0.000000e+00> : vector<16x16x4xf32>
    %13 = tpu.matmul %10, %12, %cst_19 {dimension_numbers = #tpu.dot_dimension_numbers<[2], [1], [1], [2], [0, 0, 0, 1, 1, 2], [0], [0]>} : vector<16x16x8xf32>, vector<16x8x4xf32>, vector<16x16x4xf32> -> vector<16x16x4xf32>
    %c0_20 = arith.constant 0 : index
    %c0_21 = arith.constant 0 : index
    %c0_22 = arith.constant 0 : index
    %c0_23 = arith.constant 0 : index
    %14 = vector.load %arg2[%c0_20, %c0_21, %c0_22, %c0_23] : memref<1x16x16x4xf32, #tpu.memory_space<vmem>>, vector<1x16x16x4xf32>
    %15 = vector.shape_cast %14 : vector<1x16x16x4xf32> to vector<16x16x4xf32>
    %c1 = arith.constant 1 : index
    %c1_24 = arith.constant 1 : index
    %c0_25 = arith.constant 0 : index
    %16 = vector.load %arg11[%c1, %c1_24, %c0_25] : memref<18x18x8xf32, #tpu.memory_space<vmem>>, vector<16x16x4xf32>
    tpu.vector_store %arg11[%c1, %c1_24, %c0_25], %15 {strides = array<i32>} : memref<18x18x8xf32, #tpu.memory_space<vmem>>, vector<16x16x4xf32>,
    %c1_26 = arith.constant 1 : index
    %c1_27 = arith.constant 1 : index
    %c4 = arith.constant 4 : index
    %17 = vector.load %arg11[%c1_26, %c1_27, %c4] : memref<18x18x8xf32, #tpu.memory_space<vmem>>, vector<16x16x4xf32>
    tpu.vector_store %arg11[%c1_26, %c1_27, %c4], %13 {strides = array<i32>} : memref<18x18x8xf32, #tpu.memory_space<vmem>>, vector<16x16x4xf32>,
    %c0_28 = arith.constant 0 : index
    %c0_29 = arith.constant 0 : index
    %c0_30 = arith.constant 0 : index
    %18 = vector.load %arg11[%c0_28, %c0_29, %c0_30] : memref<18x18x8xf32, #tpu.memory_space<vmem>>, vector<16x16x8xf32>
    %19 = arith.truncf %18 : vector<16x16x8xf32> to vector<16x16x8xbf16>
    %c0_31 = arith.constant 0 : index
    %c0_32 = arith.constant 0 : index
    %c0_33 = arith.constant 0 : index
    %20 = vector.load %arg12[%c0_31, %c0_32, %c0_33] : memref<16x16x24xbf16, #tpu.memory_space<vmem>>, vector<16x16x8xbf16>
    tpu.vector_store %arg12[%c0_31, %c0_32, %c0_33], %19 {strides = array<i32>} : memref<16x16x24xbf16, #tpu.memory_space<vmem>>, vector<16x16x8xbf16>,
    %c0_34 = arith.constant 0 : index
    %c1_35 = arith.constant 1 : index
    %c0_36 = arith.constant 0 : index
    %21 = vector.load %arg11[%c0_34, %c1_35, %c0_36] : memref<18x18x8xf32, #tpu.memory_space<vmem>>, vector<16x16x8xf32>
    %22 = arith.truncf %21 : vector<16x16x8xf32> to vector<16x16x8xbf16>
    %c0_37 = arith.constant 0 : index
    %c0_38 = arith.constant 0 : index
    %c8 = arith.constant 8 : index
    %23 = vector.load %arg12[%c0_37, %c0_38, %c8] : memref<16x16x24xbf16, #tpu.memory_space<vmem>>, vector<16x16x8xbf16>
    tpu.vector_store %arg12[%c0_37, %c0_38, %c8], %22 {strides = array<i32>} : memref<16x16x24xbf16, #tpu.memory_space<vmem>>, vector<16x16x8xbf16>,
    %c0_39 = arith.constant 0 : index
    %c2 = arith.constant 2 : index
    %c0_40 = arith.constant 0 : index
    %24 = vector.load %arg11[%c0_39, %c2, %c0_40] : memref<18x18x8xf32, #tpu.memory_space<vmem>>, vector<16x16x8xf32>
    %25 = arith.truncf %24 : vector<16x16x8xf32> to vector<16x16x8xbf16>
    %c0_41 = arith.constant 0 : index
    %c0_42 = arith.constant 0 : index
    %c16 = arith.constant 16 : index
    %26 = vector.load %arg12[%c0_41, %c0_42, %c16] : memref<16x16x24xbf16, #tpu.memory_space<vmem>>, vector<16x16x8xbf16>
    tpu.vector_store %arg12[%c0_41, %c0_42, %c16], %25 {strides = array<i32>} : memref<16x16x24xbf16, #tpu.memory_space<vmem>>, vector<16x16x8xbf16>,
    %c0_43 = arith.constant 0 : index
    %c0_44 = arith.constant 0 : index
    %c0_45 = arith.constant 0 : index
    %27 = vector.load %arg12[%c0_43, %c0_44, %c0_45] : memref<16x16x24xbf16, #tpu.memory_space<vmem>>, vector<16x16x24xbf16>
    %28 = vector.shape_cast %27 : vector<16x16x24xbf16> to vector<256x24xbf16>
    %c0_46 = arith.constant 0 : index
    %c0_47 = arith.constant 0 : index
    %c0_48 = arith.constant 0 : index
    %29 = vector.load %arg4[%c0_46, %c0_47, %c0_48] : memref<3x24x8xbf16, #tpu.memory_space<vmem>>, vector<1x24x8xbf16>
    %30 = vector.shape_cast %29 : vector<1x24x8xbf16> to vector<24x8xbf16>
    %cst_49 = arith.constant dense<0.000000e+00> : vector<256x8xf32>
    %31 = tpu.matmul %28, %30, %cst_49 {dimension_numbers = #tpu.dot_dimension_numbers<[1], [0], [0], [1], [0, 0, 1, 1], [], []>} : vector<256x24xbf16>, vector<24x8xbf16>, vector<256x8xf32> -> vector<256x8xf32>
    %c0_50 = arith.constant 0 : index
    %c0_51 = arith.constant 0 : index
    %32 = vector.load %arg13[%c0_50, %c0_51] : memref<256x8xf32, #tpu.memory_space<vmem>>, vector<256x8xf32>
    tpu.vector_store %arg13[%c0_50, %c0_51], %31 {strides = array<i32>} : memref<256x8xf32, #tpu.memory_space<vmem>>, vector<256x8xf32>,
    %c1_52 = arith.constant 1 : index
    %c0_53 = arith.constant 0 : index
    %c0_54 = arith.constant 0 : index
    %33 = vector.load %arg11[%c1_52, %c0_53, %c0_54] : memref<18x18x8xf32, #tpu.memory_space<vmem>>, vector<16x16x8xf32>
    %34 = arith.truncf %33 : vector<16x16x8xf32> to vector<16x16x8xbf16>
    %c0_55 = arith.constant 0 : index
    %c0_56 = arith.constant 0 : index
    %c0_57 = arith.constant 0 : index
    %35 = vector.load %arg12[%c0_55, %c0_56, %c0_57] : memref<16x16x24xbf16, #tpu.memory_space<vmem>>, vector<16x16x8xbf16>
    tpu.vector_store %arg12[%c0_55, %c0_56, %c0_57], %34 {strides = array<i32>} : memref<16x16x24xbf16, #tpu.memory_space<vmem>>, vector<16x16x8xbf16>,
    %c1_58 = arith.constant 1 : index
    %c1_59 = arith.constant 1 : index
    %c0_60 = arith.constant 0 : index
    %36 = vector.load %arg11[%c1_58, %c1_59, %c0_60] : memref<18x18x8xf32, #tpu.memory_space<vmem>>, vector<16x16x8xf32>
    %37 = arith.truncf %36 : vector<16x16x8xf32> to vector<16x16x8xbf16>
    %c0_61 = arith.constant 0 : index
    %c0_62 = arith.constant 0 : index
    %c8_63 = arith.constant 8 : index
    %38 = vector.load %arg12[%c0_61, %c0_62, %c8_63] : memref<16x16x24xbf16, #tpu.memory_space<vmem>>, vector<16x16x8xbf16>
    tpu.vector_store %arg12[%c0_61, %c0_62, %c8_63], %37 {strides = array<i32>} : memref<16x16x24xbf16, #tpu.memory_space<vmem>>, vector<16x16x8xbf16>,
    %c1_64 = arith.constant 1 : index
    %c2_65 = arith.constant 2 : index
    %c0_66 = arith.constant 0 : index
    %39 = vector.load %arg11[%c1_64, %c2_65, %c0_66] : memref<18x18x8xf32, #tpu.memory_space<vmem>>, vector<16x16x8xf32>
    %40 = arith.truncf %39 : vector<16x16x8xf32> to vector<16x16x8xbf16>
    %c0_67 = arith.constant 0 : index
    %c0_68 = arith.constant 0 : index
    %c16_69 = arith.constant 16 : index
    %41 = vector.load %arg12[%c0_67, %c0_68, %c16_69] : memref<16x16x24xbf16, #tpu.memory_space<vmem>>, vector<16x16x8xbf16>
    tpu.vector_store %arg12[%c0_67, %c0_68, %c16_69], %40 {strides = array<i32>} : memref<16x16x24xbf16, #tpu.memory_space<vmem>>, vector<16x16x8xbf16>,
    %c0_70 = arith.constant 0 : index
    %c0_71 = arith.constant 0 : index
    %c0_72 = arith.constant 0 : index
    %42 = vector.load %arg12[%c0_70, %c0_71, %c0_72] : memref<16x16x24xbf16, #tpu.memory_space<vmem>>, vector<16x16x24xbf16>
    %43 = vector.shape_cast %42 : vector<16x16x24xbf16> to vector<256x24xbf16>
    %c1_73 = arith.constant 1 : index
    %c0_74 = arith.constant 0 : index
    %c0_75 = arith.constant 0 : index
    %44 = vector.load %arg4[%c1_73, %c0_74, %c0_75] : memref<3x24x8xbf16, #tpu.memory_space<vmem>>, vector<1x24x8xbf16>
    %45 = vector.shape_cast %44 : vector<1x24x8xbf16> to vector<24x8xbf16>
    %cst_76 = arith.constant dense<0.000000e+00> : vector<256x8xf32>
    %46 = tpu.matmul %43, %45, %cst_76 {dimension_numbers = #tpu.dot_dimension_numbers<[1], [0], [0], [1], [0, 0, 1, 1], [], []>} : vector<256x24xbf16>, vector<24x8xbf16>, vector<256x8xf32> -> vector<256x8xf32>
    %c0_77 = arith.constant 0 : index
    %c0_78 = arith.constant 0 : index
    %47 = vector.load %arg13[%c0_77, %c0_78] : memref<256x8xf32, #tpu.memory_space<vmem>>, vector<256x8xf32>
    %48 = arith.addf %47, %46 : vector<256x8xf32>
    %c0_79 = arith.constant 0 : index
    %c0_80 = arith.constant 0 : index
    %49 = vector.load %arg13[%c0_79, %c0_80] : memref<256x8xf32, #tpu.memory_space<vmem>>, vector<256x8xf32>
    tpu.vector_store %arg13[%c0_79, %c0_80], %48 {strides = array<i32>} : memref<256x8xf32, #tpu.memory_space<vmem>>, vector<256x8xf32>,
    %c2_81 = arith.constant 2 : index
    %c0_82 = arith.constant 0 : index
    %c0_83 = arith.constant 0 : index
    %50 = vector.load %arg11[%c2_81, %c0_82, %c0_83] : memref<18x18x8xf32, #tpu.memory_space<vmem>>, vector<16x16x8xf32>
    %51 = arith.truncf %50 : vector<16x16x8xf32> to vector<16x16x8xbf16>
    %c0_84 = arith.constant 0 : index
    %c0_85 = arith.constant 0 : index
    %c0_86 = arith.constant 0 : index
    %52 = vector.load %arg12[%c0_84, %c0_85, %c0_86] : memref<16x16x24xbf16, #tpu.memory_space<vmem>>, vector<16x16x8xbf16>
    tpu.vector_store %arg12[%c0_84, %c0_85, %c0_86], %51 {strides = array<i32>} : memref<16x16x24xbf16, #tpu.memory_space<vmem>>, vector<16x16x8xbf16>,
    %c2_87 = arith.constant 2 : index
    %c1_88 = arith.constant 1 : index
    %c0_89 = arith.constant 0 : index
    %53 = vector.load %arg11[%c2_87, %c1_88, %c0_89] : memref<18x18x8xf32, #tpu.memory_space<vmem>>, vector<16x16x8xf32>
    %54 = arith.truncf %53 : vector<16x16x8xf32> to vector<16x16x8xbf16>
    %c0_90 = arith.constant 0 : index
    %c0_91 = arith.constant 0 : index
    %c8_92 = arith.constant 8 : index
    %55 = vector.load %arg12[%c0_90, %c0_91, %c8_92] : memref<16x16x24xbf16, #tpu.memory_space<vmem>>, vector<16x16x8xbf16>
    tpu.vector_store %arg12[%c0_90, %c0_91, %c8_92], %54 {strides = array<i32>} : memref<16x16x24xbf16, #tpu.memory_space<vmem>>, vector<16x16x8xbf16>,
    %c2_93 = arith.constant 2 : index
    %c2_94 = arith.constant 2 : index
    %c0_95 = arith.constant 0 : index
    %56 = vector.load %arg11[%c2_93, %c2_94, %c0_95] : memref<18x18x8xf32, #tpu.memory_space<vmem>>, vector<16x16x8xf32>
    %57 = arith.truncf %56 : vector<16x16x8xf32> to vector<16x16x8xbf16>
    %c0_96 = arith.constant 0 : index
    %c0_97 = arith.constant 0 : index
    %c16_98 = arith.constant 16 : index
    %58 = vector.load %arg12[%c0_96, %c0_97, %c16_98] : memref<16x16x24xbf16, #tpu.memory_space<vmem>>, vector<16x16x8xbf16>
    tpu.vector_store %arg12[%c0_96, %c0_97, %c16_98], %57 {strides = array<i32>} : memref<16x16x24xbf16, #tpu.memory_space<vmem>>, vector<16x16x8xbf16>,
    %c0_99 = arith.constant 0 : index
    %c0_100 = arith.constant 0 : index
    %c0_101 = arith.constant 0 : index
    %59 = vector.load %arg12[%c0_99, %c0_100, %c0_101] : memref<16x16x24xbf16, #tpu.memory_space<vmem>>, vector<16x16x24xbf16>
    %60 = vector.shape_cast %59 : vector<16x16x24xbf16> to vector<256x24xbf16>
    %c2_102 = arith.constant 2 : index
    %c0_103 = arith.constant 0 : index
    %c0_104 = arith.constant 0 : index
    %61 = vector.load %arg4[%c2_102, %c0_103, %c0_104] : memref<3x24x8xbf16, #tpu.memory_space<vmem>>, vector<1x24x8xbf16>
    %62 = vector.shape_cast %61 : vector<1x24x8xbf16> to vector<24x8xbf16>
    %cst_105 = arith.constant dense<0.000000e+00> : vector<256x8xf32>
    %63 = tpu.matmul %60, %62, %cst_105 {dimension_numbers = #tpu.dot_dimension_numbers<[1], [0], [0], [1], [0, 0, 1, 1], [], []>} : vector<256x24xbf16>, vector<24x8xbf16>, vector<256x8xf32> -> vector<256x8xf32>
    %c0_106 = arith.constant 0 : index
    %c0_107 = arith.constant 0 : index
    %64 = vector.load %arg13[%c0_106, %c0_107] : memref<256x8xf32, #tpu.memory_space<vmem>>, vector<256x8xf32>
    %65 = arith.addf %64, %63 : vector<256x8xf32>
    %c0_108 = arith.constant 0 : index
    %c0_109 = arith.constant 0 : index
    %66 = vector.load %arg13[%c0_108, %c0_109] : memref<256x8xf32, #tpu.memory_space<vmem>>, vector<256x8xf32>
    tpu.vector_store %arg13[%c0_108, %c0_109], %65 {strides = array<i32>} : memref<256x8xf32, #tpu.memory_space<vmem>>, vector<256x8xf32>,
    %c0_110 = arith.constant 0 : index
    %c0_111 = arith.constant 0 : index
    %67 = vector.load %arg13[%c0_110, %c0_111] : memref<256x8xf32, #tpu.memory_space<vmem>>, vector<256x8xf32>
    %c0_112 = arith.constant 0 : index
    %c0_113 = arith.constant 0 : index
    %68 = vector.load %arg5[%c0_112, %c0_113] : memref<1x8xf32, #tpu.memory_space<vmem>>, vector<1x8xf32>
    %69 = vector.broadcast %68 : vector<1x8xf32> to vector<256x8xf32>
    %70 = arith.mulf %67, %69 : vector<256x8xf32>
    %c0_114 = arith.constant 0 : index
    %c0_115 = arith.constant 0 : index
    %71 = vector.load %arg6[%c0_114, %c0_115] : memref<1x8xf32, #tpu.memory_space<vmem>>, vector<1x8xf32>
    %72 = vector.broadcast %71 : vector<1x8xf32> to vector<256x8xf32>
    %73 = arith.addf %70, %72 : vector<256x8xf32>
    %cst_116 = arith.constant 0.000000e+00 : f32
    %74 = vector.broadcast %cst_116 : f32 to vector<256x8xf32>
    %75 = arith.maximumf %73, %74 : vector<256x8xf32>
    %76 = vector.shape_cast %75 : vector<256x8xf32> to vector<16x16x8xf32>
    %c1_117 = arith.constant 1 : index
    %c1_118 = arith.constant 1 : index
    %c0_119 = arith.constant 0 : index
    %77 = vector.load %arg11[%c1_117, %c1_118, %c0_119] : memref<18x18x8xf32, #tpu.memory_space<vmem>>, vector<16x16x8xf32>
    tpu.vector_store %arg11[%c1_117, %c1_118, %c0_119], %76 {strides = array<i32>} : memref<18x18x8xf32, #tpu.memory_space<vmem>>, vector<16x16x8xf32>,
    %c0_120 = arith.constant 0 : index
    %c0_121 = arith.constant 0 : index
    %c0_122 = arith.constant 0 : index
    %78 = vector.load %arg11[%c0_120, %c0_121, %c0_122] : memref<18x18x8xf32, #tpu.memory_space<vmem>>, vector<16x16x8xf32>
    %79 = arith.truncf %78 : vector<16x16x8xf32> to vector<16x16x8xbf16>
    %c0_123 = arith.constant 0 : index
    %c0_124 = arith.constant 0 : index
    %c0_125 = arith.constant 0 : index
    %80 = vector.load %arg12[%c0_123, %c0_124, %c0_125] : memref<16x16x24xbf16, #tpu.memory_space<vmem>>, vector<16x16x8xbf16>
    tpu.vector_store %arg12[%c0_123, %c0_124, %c0_125], %79 {strides = array<i32>} : memref<16x16x24xbf16, #tpu.memory_space<vmem>>, vector<16x16x8xbf16>,
    %c0_126 = arith.constant 0 : index
    %c1_127 = arith.constant 1 : index
    %c0_128 = arith.constant 0 : index
    %81 = vector.load %arg11[%c0_126, %c1_127, %c0_128] : memref<18x18x8xf32, #tpu.memory_space<vmem>>, vector<16x16x8xf32>
    %82 = arith.truncf %81 : vector<16x16x8xf32> to vector<16x16x8xbf16>
    %c0_129 = arith.constant 0 : index
    %c0_130 = arith.constant 0 : index
    %c8_131 = arith.constant 8 : index
    %83 = vector.load %arg12[%c0_129, %c0_130, %c8_131] : memref<16x16x24xbf16, #tpu.memory_space<vmem>>, vector<16x16x8xbf16>
    tpu.vector_store %arg12[%c0_129, %c0_130, %c8_131], %82 {strides = array<i32>} : memref<16x16x24xbf16, #tpu.memory_space<vmem>>, vector<16x16x8xbf16>,
    %c0_132 = arith.constant 0 : index
    %c2_133 = arith.constant 2 : index
    %c0_134 = arith.constant 0 : index
    %84 = vector.load %arg11[%c0_132, %c2_133, %c0_134] : memref<18x18x8xf32, #tpu.memory_space<vmem>>, vector<16x16x8xf32>
    %85 = arith.truncf %84 : vector<16x16x8xf32> to vector<16x16x8xbf16>
    %c0_135 = arith.constant 0 : index
    %c0_136 = arith.constant 0 : index
    %c16_137 = arith.constant 16 : index
    %86 = vector.load %arg12[%c0_135, %c0_136, %c16_137] : memref<16x16x24xbf16, #tpu.memory_space<vmem>>, vector<16x16x8xbf16>
    tpu.vector_store %arg12[%c0_135, %c0_136, %c16_137], %85 {strides = array<i32>} : memref<16x16x24xbf16, #tpu.memory_space<vmem>>, vector<16x16x8xbf16>,
    %c0_138 = arith.constant 0 : index
    %c0_139 = arith.constant 0 : index
    %c0_140 = arith.constant 0 : index
    %87 = vector.load %arg12[%c0_138, %c0_139, %c0_140] : memref<16x16x24xbf16, #tpu.memory_space<vmem>>, vector<16x16x24xbf16>
    %88 = vector.shape_cast %87 : vector<16x16x24xbf16> to vector<256x24xbf16>
    %c0_141 = arith.constant 0 : index
    %c0_142 = arith.constant 0 : index
    %c0_143 = arith.constant 0 : index
    %89 = vector.load %arg7[%c0_141, %c0_142, %c0_143] : memref<3x24x8xbf16, #tpu.memory_space<vmem>>, vector<1x24x8xbf16>
    %90 = vector.shape_cast %89 : vector<1x24x8xbf16> to vector<24x8xbf16>
    %cst_144 = arith.constant dense<0.000000e+00> : vector<256x8xf32>
    %91 = tpu.matmul %88, %90, %cst_144 {dimension_numbers = #tpu.dot_dimension_numbers<[1], [0], [0], [1], [0, 0, 1, 1], [], []>} : vector<256x24xbf16>, vector<24x8xbf16>, vector<256x8xf32> -> vector<256x8xf32>
    %c0_145 = arith.constant 0 : index
    %c0_146 = arith.constant 0 : index
    %92 = vector.load %arg13[%c0_145, %c0_146] : memref<256x8xf32, #tpu.memory_space<vmem>>, vector<256x8xf32>
    tpu.vector_store %arg13[%c0_145, %c0_146], %91 {strides = array<i32>} : memref<256x8xf32, #tpu.memory_space<vmem>>, vector<256x8xf32>,
    %c1_147 = arith.constant 1 : index
    %c0_148 = arith.constant 0 : index
    %c0_149 = arith.constant 0 : index
    %93 = vector.load %arg11[%c1_147, %c0_148, %c0_149] : memref<18x18x8xf32, #tpu.memory_space<vmem>>, vector<16x16x8xf32>
    %94 = arith.truncf %93 : vector<16x16x8xf32> to vector<16x16x8xbf16>
    %c0_150 = arith.constant 0 : index
    %c0_151 = arith.constant 0 : index
    %c0_152 = arith.constant 0 : index
    %95 = vector.load %arg12[%c0_150, %c0_151, %c0_152] : memref<16x16x24xbf16, #tpu.memory_space<vmem>>, vector<16x16x8xbf16>
    tpu.vector_store %arg12[%c0_150, %c0_151, %c0_152], %94 {strides = array<i32>} : memref<16x16x24xbf16, #tpu.memory_space<vmem>>, vector<16x16x8xbf16>,
    %c1_153 = arith.constant 1 : index
    %c1_154 = arith.constant 1 : index
    %c0_155 = arith.constant 0 : index
    %96 = vector.load %arg11[%c1_153, %c1_154, %c0_155] : memref<18x18x8xf32, #tpu.memory_space<vmem>>, vector<16x16x8xf32>
    %97 = arith.truncf %96 : vector<16x16x8xf32> to vector<16x16x8xbf16>
    %c0_156 = arith.constant 0 : index
    %c0_157 = arith.constant 0 : index
    %c8_158 = arith.constant 8 : index
    %98 = vector.load %arg12[%c0_156, %c0_157, %c8_158] : memref<16x16x24xbf16, #tpu.memory_space<vmem>>, vector<16x16x8xbf16>
    tpu.vector_store %arg12[%c0_156, %c0_157, %c8_158], %97 {strides = array<i32>} : memref<16x16x24xbf16, #tpu.memory_space<vmem>>, vector<16x16x8xbf16>,
    %c1_159 = arith.constant 1 : index
    %c2_160 = arith.constant 2 : index
    %c0_161 = arith.constant 0 : index
    %99 = vector.load %arg11[%c1_159, %c2_160, %c0_161] : memref<18x18x8xf32, #tpu.memory_space<vmem>>, vector<16x16x8xf32>
    %100 = arith.truncf %99 : vector<16x16x8xf32> to vector<16x16x8xbf16>
    %c0_162 = arith.constant 0 : index
    %c0_163 = arith.constant 0 : index
    %c16_164 = arith.constant 16 : index
    %101 = vector.load %arg12[%c0_162, %c0_163, %c16_164] : memref<16x16x24xbf16, #tpu.memory_space<vmem>>, vector<16x16x8xbf16>
    tpu.vector_store %arg12[%c0_162, %c0_163, %c16_164], %100 {strides = array<i32>} : memref<16x16x24xbf16, #tpu.memory_space<vmem>>, vector<16x16x8xbf16>,
    %c0_165 = arith.constant 0 : index
    %c0_166 = arith.constant 0 : index
    %c0_167 = arith.constant 0 : index
    %102 = vector.load %arg12[%c0_165, %c0_166, %c0_167] : memref<16x16x24xbf16, #tpu.memory_space<vmem>>, vector<16x16x24xbf16>
    %103 = vector.shape_cast %102 : vector<16x16x24xbf16> to vector<256x24xbf16>
    %c1_168 = arith.constant 1 : index
    %c0_169 = arith.constant 0 : index
    %c0_170 = arith.constant 0 : index
    %104 = vector.load %arg7[%c1_168, %c0_169, %c0_170] : memref<3x24x8xbf16, #tpu.memory_space<vmem>>, vector<1x24x8xbf16>
    %105 = vector.shape_cast %104 : vector<1x24x8xbf16> to vector<24x8xbf16>
    %cst_171 = arith.constant dense<0.000000e+00> : vector<256x8xf32>
    %106 = tpu.matmul %103, %105, %cst_171 {dimension_numbers = #tpu.dot_dimension_numbers<[1], [0], [0], [1], [0, 0, 1, 1], [], []>} : vector<256x24xbf16>, vector<24x8xbf16>, vector<256x8xf32> -> vector<256x8xf32>
    %c0_172 = arith.constant 0 : index
    %c0_173 = arith.constant 0 : index
    %107 = vector.load %arg13[%c0_172, %c0_173] : memref<256x8xf32, #tpu.memory_space<vmem>>, vector<256x8xf32>
    %108 = arith.addf %107, %106 : vector<256x8xf32>
    %c0_174 = arith.constant 0 : index
    %c0_175 = arith.constant 0 : index
    %109 = vector.load %arg13[%c0_174, %c0_175] : memref<256x8xf32, #tpu.memory_space<vmem>>, vector<256x8xf32>
    tpu.vector_store %arg13[%c0_174, %c0_175], %108 {strides = array<i32>} : memref<256x8xf32, #tpu.memory_space<vmem>>, vector<256x8xf32>,
    %c2_176 = arith.constant 2 : index
    %c0_177 = arith.constant 0 : index
    %c0_178 = arith.constant 0 : index
    %110 = vector.load %arg11[%c2_176, %c0_177, %c0_178] : memref<18x18x8xf32, #tpu.memory_space<vmem>>, vector<16x16x8xf32>
    %111 = arith.truncf %110 : vector<16x16x8xf32> to vector<16x16x8xbf16>
    %c0_179 = arith.constant 0 : index
    %c0_180 = arith.constant 0 : index
    %c0_181 = arith.constant 0 : index
    %112 = vector.load %arg12[%c0_179, %c0_180, %c0_181] : memref<16x16x24xbf16, #tpu.memory_space<vmem>>, vector<16x16x8xbf16>
    tpu.vector_store %arg12[%c0_179, %c0_180, %c0_181], %111 {strides = array<i32>} : memref<16x16x24xbf16, #tpu.memory_space<vmem>>, vector<16x16x8xbf16>,
    %c2_182 = arith.constant 2 : index
    %c1_183 = arith.constant 1 : index
    %c0_184 = arith.constant 0 : index
    %113 = vector.load %arg11[%c2_182, %c1_183, %c0_184] : memref<18x18x8xf32, #tpu.memory_space<vmem>>, vector<16x16x8xf32>
    %114 = arith.truncf %113 : vector<16x16x8xf32> to vector<16x16x8xbf16>
    %c0_185 = arith.constant 0 : index
    %c0_186 = arith.constant 0 : index
    %c8_187 = arith.constant 8 : index
    %115 = vector.load %arg12[%c0_185, %c0_186, %c8_187] : memref<16x16x24xbf16, #tpu.memory_space<vmem>>, vector<16x16x8xbf16>
    tpu.vector_store %arg12[%c0_185, %c0_186, %c8_187], %114 {strides = array<i32>} : memref<16x16x24xbf16, #tpu.memory_space<vmem>>, vector<16x16x8xbf16>,
    %c2_188 = arith.constant 2 : index
    %c2_189 = arith.constant 2 : index
    %c0_190 = arith.constant 0 : index
    %116 = vector.load %arg11[%c2_188, %c2_189, %c0_190] : memref<18x18x8xf32, #tpu.memory_space<vmem>>, vector<16x16x8xf32>
    %117 = arith.truncf %116 : vector<16x16x8xf32> to vector<16x16x8xbf16>
    %c0_191 = arith.constant 0 : index
    %c0_192 = arith.constant 0 : index
    %c16_193 = arith.constant 16 : index
    %118 = vector.load %arg12[%c0_191, %c0_192, %c16_193] : memref<16x16x24xbf16, #tpu.memory_space<vmem>>, vector<16x16x8xbf16>
    tpu.vector_store %arg12[%c0_191, %c0_192, %c16_193], %117 {strides = array<i32>} : memref<16x16x24xbf16, #tpu.memory_space<vmem>>, vector<16x16x8xbf16>,
    %c0_194 = arith.constant 0 : index
    %c0_195 = arith.constant 0 : index
    %c0_196 = arith.constant 0 : index
    %119 = vector.load %arg12[%c0_194, %c0_195, %c0_196] : memref<16x16x24xbf16, #tpu.memory_space<vmem>>, vector<16x16x24xbf16>
    %120 = vector.shape_cast %119 : vector<16x16x24xbf16> to vector<256x24xbf16>
    %c2_197 = arith.constant 2 : index
    %c0_198 = arith.constant 0 : index
    %c0_199 = arith.constant 0 : index
    %121 = vector.load %arg7[%c2_197, %c0_198, %c0_199] : memref<3x24x8xbf16, #tpu.memory_space<vmem>>, vector<1x24x8xbf16>
    %122 = vector.shape_cast %121 : vector<1x24x8xbf16> to vector<24x8xbf16>
    %cst_200 = arith.constant dense<0.000000e+00> : vector<256x8xf32>
    %123 = tpu.matmul %120, %122, %cst_200 {dimension_numbers = #tpu.dot_dimension_numbers<[1], [0], [0], [1], [0, 0, 1, 1], [], []>} : vector<256x24xbf16>, vector<24x8xbf16>, vector<256x8xf32> -> vector<256x8xf32>
    %c0_201 = arith.constant 0 : index
    %c0_202 = arith.constant 0 : index
    %124 = vector.load %arg13[%c0_201, %c0_202] : memref<256x8xf32, #tpu.memory_space<vmem>>, vector<256x8xf32>
    %125 = arith.addf %124, %123 : vector<256x8xf32>
    %c0_203 = arith.constant 0 : index
    %c0_204 = arith.constant 0 : index
    %126 = vector.load %arg13[%c0_203, %c0_204] : memref<256x8xf32, #tpu.memory_space<vmem>>, vector<256x8xf32>
    tpu.vector_store %arg13[%c0_203, %c0_204], %125 {strides = array<i32>} : memref<256x8xf32, #tpu.memory_space<vmem>>, vector<256x8xf32>,
    %c0_205 = arith.constant 0 : index
    %c0_206 = arith.constant 0 : index
    %127 = vector.load %arg13[%c0_205, %c0_206] : memref<256x8xf32, #tpu.memory_space<vmem>>, vector<256x8xf32>
    %c0_207 = arith.constant 0 : index
    %c0_208 = arith.constant 0 : index
    %128 = vector.load %arg8[%c0_207, %c0_208] : memref<1x8xf32, #tpu.memory_space<vmem>>, vector<1x8xf32>
    %129 = vector.broadcast %128 : vector<1x8xf32> to vector<256x8xf32>
    %130 = arith.mulf %127, %129 : vector<256x8xf32>
    %c0_209 = arith.constant 0 : index
    %c0_210 = arith.constant 0 : index
    %131 = vector.load %arg9[%c0_209, %c0_210] : memref<1x8xf32, #tpu.memory_space<vmem>>, vector<1x8xf32>
    %132 = vector.broadcast %131 : vector<1x8xf32> to vector<256x8xf32>
    %133 = arith.addf %130, %132 : vector<256x8xf32>
    %cst_211 = arith.constant 0.000000e+00 : f32
    %134 = vector.broadcast %cst_211 : f32 to vector<256x8xf32>
    %135 = arith.maximumf %133, %134 : vector<256x8xf32>
    %136 = tpu.transpose %135, [1, 0] : vector<256x8xf32> -> vector<8x256xf32>
    %c0_212 = arith.constant 0 : index
    %c0_213 = arith.constant 0 : index
    %c0_214 = arith.constant 0 : index
    %137 = vector.load %arg10[%c0_212, %c0_213, %c0_214] : memref<1x8x256xf32, #tpu.memory_space<vmem>>, vector<1x8x256xf32>
    %138 = vector.shape_cast %137 : vector<1x8x256xf32> to vector<8x256xf32>
    %139 = vector.shape_cast %136 : vector<8x256xf32> to vector<1x8x256xf32>
    tpu.vector_store %arg10[%c0_212, %c0_213, %c0_214], %139 {strides = array<i32>} : memref<1x8x256xf32, #tpu.memory_space<vmem>>, vector<1x8x256xf32>,
    return
  }
  func.func @transform_0(%arg0: i32) -> (i32, i32, i32, i32) {
    %c0_i32 = arith.constant 0 : i32
    %c0_i32_0 = arith.constant 0 : i32
    %c0_i32_1 = arith.constant 0 : i32
    %c0_i32_2 = arith.constant 0 : i32
    return %arg0, %c0_i32, %c0_i32_0, %c0_i32_1 : i32, i32, i32, i32
  }
  func.func @transform_1(%arg0: i32) -> (i32, i32, i32, i32) {
    %c0_i32 = arith.constant 0 : i32
    %c0_i32_0 = arith.constant 0 : i32
    %c0_i32_1 = arith.constant 0 : i32
    %c0_i32_2 = arith.constant 0 : i32
    return %arg0, %c0_i32, %c0_i32_0, %c0_i32_1 : i32, i32, i32, i32
  }
  func.func @transform_2(%arg0: i32) -> (i32, i32) {
    %c0_i32 = arith.constant 0 : i32
    %c0_i32_0 = arith.constant 0 : i32
    %c0_i32_1 = arith.constant 0 : i32
    return %c0_i32, %c0_i32_0 : i32, i32
  }
  func.func @transform_3(%arg0: i32) -> (i32, i32, i32) {
    %c0_i32 = arith.constant 0 : i32
    %c0_i32_0 = arith.constant 0 : i32
    %c0_i32_1 = arith.constant 0 : i32
    %c0_i32_2 = arith.constant 0 : i32
    return %c0_i32, %c0_i32_0, %c0_i32_1 : i32, i32, i32
  }
  func.func @transform_4(%arg0: i32) -> (i32, i32) {
    %c0_i32 = arith.constant 0 : i32
    %c0_i32_0 = arith.constant 0 : i32
    %c0_i32_1 = arith.constant 0 : i32
    return %c0_i32, %c0_i32_0 : i32, i32
  }
  func.func @transform_5(%arg0: i32) -> (i32, i32) {
    %c0_i32 = arith.constant 0 : i32
    %c0_i32_0 = arith.constant 0 : i32
    %c0_i32_1 = arith.constant 0 : i32
    return %c0_i32, %c0_i32_0 : i32, i32
  }
  func.func @transform_6(%arg0: i32) -> (i32, i32, i32) {
    %c0_i32 = arith.constant 0 : i32
    %c0_i32_0 = arith.constant 0 : i32
    %c0_i32_1 = arith.constant 0 : i32
    %c0_i32_2 = arith.constant 0 : i32
    return %c0_i32, %c0_i32_0, %c0_i32_1 : i32, i32, i32
  }
  func.func @transform_7(%arg0: i32) -> (i32, i32) {
    %c0_i32 = arith.constant 0 : i32
    %c0_i32_0 = arith.constant 0 : i32
    %c0_i32_1 = arith.constant 0 : i32
    return %c0_i32, %c0_i32_0 : i32, i32
  }
  func.func @transform_8(%arg0: i32) -> (i32, i32) {
    %c0_i32 = arith.constant 0 : i32
    %c0_i32_0 = arith.constant 0 : i32
    %c0_i32_1 = arith.constant 0 : i32
    return %c0_i32, %c0_i32_0 : i32, i32
  }
  func.func @transform_9(%arg0: i32) -> (i32, i32, i32) {
    %c0_i32 = arith.constant 0 : i32
    %c0_i32_0 = arith.constant 0 : i32
    %c0_i32_1 = arith.constant 0 : i32
    return %arg0, %c0_i32, %c0_i32_0 : i32, i32, i32
  }
}

</mosaic_0001>

<bundles_post_ra>
// kernel: tpu_custom_call.1
= control target key start
LH: loop header
LB: loop body
LE: loop exit
PB: predicated region body
PF: predicated region fallthrough
CT: control target
= control target key end

     0   :  { %s9547_s0 = inlined_call_operand.hbm [shape: f32[2,16,8,4], index: 0, kind: input, shape index: {}]   ;;  %s9548_s1 = inlined_call_operand.hbm [shape: f32[2,16,16,4], index: 1, kind: input, shape index: {}]   ;;  %s9549_s2 = inlined_call_operand.hbm [shape: f32[16,8], index: 2, kind: input, shape index: {}]   ;;  %s9550_s3 = inlined_call_operand.hbm [shape: bf16[3,24,8], index: 3, kind: input, shape index: {}]   ;;  %s9551_s4 = inlined_call_operand.hbm [shape: f32[1,8], index: 4, kind: input, shape index: {}]   ;;  %s9552_s5 = inlined_call_operand.hbm [shape: f32[1,8], index: 5, kind: input, shape index: {}]   ;;  %s9553_s6 = inlined_call_operand.hbm [shape: bf16[3,24,8], index: 6, kind: input, shape index: {}]   ;;  %s9554_s7 = inlined_call_operand.hbm [shape: f32[1,8], index: 7, kind: input, shape index: {}]   ;;  %s9555_s8 = inlined_call_operand.hbm [shape: f32[1,8], index: 8, kind: input, shape index: {}]   ;;  %s9556_s9 = inlined_call_operand.hbm [shape: f32[2,8,256], index: 9, kind: output, shape index: {}]  }
   0x1   :  { %9566 = sst [smem:[#allocation28_spill]] %s9547_s0 }
   0x2   :  { %9567 = sst [smem:[#allocation29_spill]] %s9549_s2 }
   0x3   :  { %9568 = sst [smem:[#allocation30_spill]] %s9550_s3 }
   0x4   :  { %9569 = sst [smem:[#allocation31_spill]] %s9551_s4 }
   0x5   :  { %9570 = sst [smem:[#allocation32_spill]] %s9552_s5 }
   0x6   :  { %9571 = sst [smem:[#allocation33_spill]] %s9553_s6 }
   0x7   :  { %9572 = sst [smem:[#allocation34_spill]] %s9556_s9 }
   0x8   :  { %14 = vsyncpa [#allocation6], 0 }
   0x9   :  { %16 = vsyncpa [#allocation6 + $0x1], 0 }
   0xa   :  { %17 = vsyncpa [#allocation9], 0 }
   0xb   :  { %19 = vsyncpa [#allocation9 + $0x1], 0 }
   0xc   :  { %20 = vsyncpa [#allocation12], 0 }
   0xd   :  { %21 = vsyncpa [#allocation15], 0 }
   0xe   :  { %22 = vsyncpa [#allocation18], 0 }
   0xf   :  { %23 = vsyncpa [#allocation7], 0 }
  0x10   :  { %25 = vsyncpa [#allocation7 + $0x1], 0  ;;  %s7546_s30 = smov 0   ;;  %s7548_s10 = smov 0  }
  0x11   :  { %s7550_s11 = smov 0   ;;  %s7552_s12 = smov 0  }
  0x12 LB: > { %s7478_s13 = smov [#allocation10]   ;;  %s7567_s15 = sadd.s32 4294967295, %s7476_s12   ;;  %s7476_s12 = sphi %s7552_s12, %s9607_s12   ;;  %s7472_s11 = sphi %s7550_s11, %s9606_s11   ;;  %s7468_s10 = sphi %s7548_s10, %s9605_s10   ;;  %s7464_s30 = sphi %s7546_s30, %s9604_s30  }
  0x13   : > { %s273_s14 = sshll.u32 %s7478_s13, 4  ;;  %p6356_p0 = scmp.ge.s32.totalorder %s7476_s12, 1  ;;  %s7572_s14 = int_to_ptr.vmem [resolvable:$true] %s273_s14 }
  0x14   : > { %p9560_p1 = scmp.eq.s32.totalorder %s7567_s15, 0  ;;  %p261_p2 = scmp.lt.s32.totalorder %s7476_s12, 3 }
  0x15   : > { %s7479_s17 = smov [#allocation11]   ;;  %s7480_s20 = smov [#allocation14]  }
  0x16   : > { %p7574_p3 = pnand %p6356_p0, %p261_p2  ;;  %s286_s18 = sshll.u32 %s7479_s17, 4  ;;  %s7587_s18 = int_to_ptr.vmem [resolvable:$true] %s286_s18 }
  0x17   : > { %s7589_s21 = sshll.u32 %s7480_s20, 4  ;;  %s9575_s2 = sld [smem:[#allocation29_spill]]  ;;  %s312_s21 = int_to_ptr.vmem [resolvable:$true] %s7589_s21 }
  0x18   : > { %s9573_s16 = scalar_select %p7574_p3, 1, 0 }
  0x19   : > { %p7026_p5 = pneg %p7574_p3 }
  0x1b   : > { %p7583_p6 = pnand %p7026_p5, %p9560_p1 }
  0x1d   : > { %s7134_s24 = scalar_lea.hbm %s9575_s2, 256  ;;  %p7599_p8 = pneg %p7583_p6 }
  0x1e   : > { %p7135_p7 = scmp.ne.s32.totalorder %s9575_s2, %s7134_s24  ;;  %p7141_p11 = scmp.lt.u32.totalorder %s7134_s24, %s9575_s2 }
  0x20   : > { %p7137_p9 = pnand %p7599_p8, %p7135_p7 }
  0x22   : > { %p7138_p10 = pneg %p7137_p9 }
  0x24   : > { %p7143_p12 = pnand %p7141_p11, %p7138_p10 }
  0x26   : > { %7146 = shalt.err (!%p7143_p12)
}
  0x27   : > { %s7147_s13 = scalar_lea.vmem %s7572_s14, 256  ;;  %p7155_p5 = scmp.lt.s32.totalorder %s7572_s14, %s7572_s14 }
  0x28   : > { %p7148_p13 = scmp.ne.s32.totalorder %s7572_s14, %s7147_s13  ;;  %p7156_p4 = scmp.lt.s32.totalorder %s7147_s13, %s7147_s13 }
  0x2a   : > { %p7150_p0 = pnand %p7148_p13, %p7599_p8  ;;  %p7157_p7 = por %p7156_p4, %p7155_p5 }
  0x2c   : > { %p7151_p2 = pneg %p7150_p0 }
  0x2e   : > { %p7158_p9 = pnand %p7157_p7, %p7151_p2 }
  0x30   : > { %7161 = shalt.err (!%p7158_p9)
}
  0x31   : > { %s9558_s17 = smov 128   ;;  %s9562_s20 = smov 8  }
  0x32   : > { %7029 = dma.hbm_to_vmem [thread:$0]  (!%p7583_p6), %s9575_s2, 256, %s7572_s14, [#allocation9], %s9558_s17, %s9558_s17, %s9562_s20  }
  0x33   : > { %s9577_s3 = sld [smem:[#allocation30_spill]] }
  0x39   : > { %s7162_s26 = scalar_lea.hbm %s9577_s3, 576 }
  0x3a   : > { %p7163_p4 = scmp.ne.s32.totalorder %s9577_s3, %s7162_s26  ;;  %p7169_p12 = scmp.lt.u32.totalorder %s7162_s26, %s9577_s3 }
  0x3c   : > { %p7165_p10 = pnand %p7163_p4, %p7599_p8 }
  0x3e   : > { %p7166_p11 = pneg %p7165_p10 }
  0x40   : > { %p7171_p13 = pnand %p7169_p12, %p7166_p11 }
  0x42   : > { %7174 = shalt.err (!%p7171_p13)
}
  0x43   : > { %s7175_s14 = scalar_lea.vmem %s7587_s18, 576  ;;  %p7183_p7 = scmp.lt.s32.totalorder %s7587_s18, %s7587_s18 }
  0x44   : > { %p7176_p0 = scmp.ne.s32.totalorder %s7587_s18, %s7175_s14  ;;  %p7184_p9 = scmp.lt.s32.totalorder %s7175_s14, %s7175_s14 }
  0x46   : > { %p7178_p2 = pnand %p7176_p0, %p7599_p8  ;;  %p7185_p4 = por %p7184_p9, %p7183_p7 }
  0x48   : > { %p7179_p5 = pneg %p7178_p2 }
  0x4a   : > { %p7186_p10 = pnand %p7185_p4, %p7179_p5 }
  0x4c   : > { %7189 = shalt.err (!%p7186_p10)
}
  0x4d   : > { %s9564_s22 = smov 64   ;;  %s7484_s9 = smov 4  }
  0x4e   : > { %7032 = dma.hbm_to_vmem [thread:$0]  (!%p7583_p6), %s9577_s3, 576, %s7587_s18, [#allocation12], %s9564_s22, %s9564_s22, %s7484_s9  }
  0x4f   : > { %s9578_s5 = sld [smem:[#allocation32_spill]] }
  0x55   : > { %s7190_s28 = scalar_lea.hbm %s9578_s5, 16 }
  0x56   : > { %p7191_p11 = scmp.ne.s32.totalorder %s9578_s5, %s7190_s28  ;;  %p7197_p0 = scmp.lt.u32.totalorder %s7190_s28, %s9578_s5 }
  0x58   : > { %p7193_p12 = pnand %p7191_p11, %p7599_p8 }
  0x5a   : > { %p7194_p13 = pneg %p7193_p12 }
  0x5c   : > { %p7199_p2 = pnand %p7197_p0, %p7194_p13 }
  0x5e   : > { %7202 = shalt.err (!%p7199_p2)
}
  0x5f   : > { %s7203_s23 = scalar_lea.vmem %s312_s21, 16  ;;  %s7210_s18 = scalar_lea.vmem %s312_s21, 32 }
  0x60   : > { %p7204_p5 = scmp.ne.s32.totalorder %s312_s21, %s7203_s23  ;;  %p7211_p4 = scmp.lt.s32.totalorder %s312_s21, %s312_s21 }
  0x61   : > { %p7212_p10 = scmp.lt.s32.totalorder %s7210_s18, %s7203_s23 }
  0x62   : > { %p7206_p7 = pnand %p7204_p5, %p7599_p8 }
  0x63   : > { %p7213_p1 = por %p7212_p10, %p7211_p4 }
  0x64   : > { %p7207_p9 = pneg %p7206_p7 }
  0x66   : > { %p7214_p3 = pnand %p7213_p1, %p7207_p9 }
  0x68   : > { %7217 = shalt.err (!%p7214_p3)
}
  0x69   : > { %7038 = dma.hbm_to_vmem [thread:$0]  (!%p7583_p6), %s9578_s5, 16, %s312_s21, [#allocation15]  }
  0x6a   : > { %s7485_s17 = smov [#allocation17]   ;;  %s7486_s28 = smov [#allocation13]  }
  0x6b   : > { %s335_s26 = sshll.u32 %s7485_s17, 4  ;;  %s300_s29 = sshll.u32 %s7486_s28, 4  ;;  %s336_s26 = int_to_ptr.vmem [resolvable:$true] %s335_s26  ;;  %s301_s29 = int_to_ptr.vmem [resolvable:$true] %s300_s29 }
  0x6c   : > { %s7218_s20 = scalar_lea.hbm %s9554_s7, 16 }
  0x6d   : > { %p7219_p1 = scmp.ne.s32.totalorder %s9554_s7, %s7218_s20  ;;  %p7225_p12 = scmp.lt.u32.totalorder %s7218_s20, %s9554_s7 }
  0x6f   : > { %p7221_p3 = pnand %p7219_p1, %p7599_p8 }
  0x71   : > { %p7222_p11 = pneg %p7221_p3 }
  0x73   : > { %p7227_p13 = pnand %p7225_p12, %p7222_p11 }
  0x75   : > { %7230 = shalt.err (!%p7227_p13)
}
  0x76   : > { %s7231_s21 = scalar_lea.vmem %s336_s26, 16  ;;  %s7238_s25 = scalar_lea.vmem %s336_s26, 32 }
  0x77   : > { %p7232_p0 = scmp.ne.s32.totalorder %s336_s26, %s7231_s21  ;;  %p7239_p7 = scmp.lt.s32.totalorder %s336_s26, %s336_s26 }
  0x78   : > { %p7240_p9 = scmp.lt.s32.totalorder %s7238_s25, %s7231_s21 }
  0x79   : > { %p7234_p2 = pnand %p7232_p0, %p7599_p8 }
  0x7a   : > { %p7241_p4 = por %p7240_p9, %p7239_p7 }
  0x7b   : > { %p7235_p5 = pneg %p7234_p2 }
  0x7d   : > { %p7242_p10 = pnand %p7241_p4, %p7235_p5 }
  0x7f   : > { %7245 = shalt.err (!%p7242_p10)
}
  0x80   : > { %7044 = dma.hbm_to_vmem [thread:$0]  (!%p7583_p6), %s9554_s7, 16, %s336_s26, [#allocation18]  }
  0x81   : > { %s9579_s4 = sld [smem:[#allocation31_spill]] }
  0x87   : > { %s7246_s13 = scalar_lea.hbm %s9579_s4, 16 }
  0x88   : > { %p7247_p1 = scmp.ne.s32.totalorder %s9579_s4, %s7246_s13  ;;  %p7253_p12 = scmp.lt.u32.totalorder %s7246_s13, %s9579_s4 }
  0x8a   : > { %p7249_p3 = pnand %p7247_p1, %p7599_p8 }
  0x8c   : > { %p7250_p11 = pneg %p7249_p3 }
  0x8e   : > { %p7255_p13 = pnand %p7253_p12, %p7250_p11 }
  0x90   : > { %7258 = shalt.err (!%p7255_p13)
}
  0x91   : > { %s7259_s21 = scalar_lea.vmem %s301_s29, 16  ;;  %s7266_s26 = scalar_lea.vmem %s301_s29, 32 }
  0x92   : > { %p7260_p0 = scmp.ne.s32.totalorder %s301_s29, %s7259_s21  ;;  %p7267_p7 = scmp.lt.s32.totalorder %s301_s29, %s301_s29 }
  0x93   : > { %p7268_p9 = scmp.lt.s32.totalorder %s7266_s26, %s7259_s21 }
  0x94   : > { %p7262_p2 = pnand %p7260_p0, %p7599_p8 }
  0x95   : > { %p7269_p4 = por %p7268_p9, %p7267_p7 }
  0x96   : > { %p7263_p5 = pneg %p7262_p2 }
  0x98   : > { %p7270_p10 = pnand %p7269_p4, %p7263_p5 }
  0x9a   : > { %7273 = shalt.err (!%p7270_p10)
}
  0x9b   : > { %7035 = dma.hbm_to_vmem [thread:$0]  (!%p7583_p6), %s9579_s4, 16, %s301_s29, [#allocation12]  }
  0x9c   : > { %s7487_s28 = smov [#allocation16]   ;;  %s7488_s22 = smov [#allocation19]  }
  0x9d   : > { %s321_s20 = sshll.u32 %s7487_s28, 4  ;;  %s346_s13 = sshll.u32 %s7488_s22, 4  ;;  %s322_s20 = int_to_ptr.vmem [resolvable:$true] %s321_s20  ;;  %s347_s13 = int_to_ptr.vmem [resolvable:$true] %s346_s13 }
  0x9e   : > { %s9580_s6 = sld [smem:[#allocation33_spill]] }
  0xa4   : > { %s7274_s18 = scalar_lea.hbm %s9580_s6, 576 }
  0xa5   : > { %p7275_p1 = scmp.ne.s32.totalorder %s9580_s6, %s7274_s18  ;;  %p7281_p12 = scmp.lt.u32.totalorder %s7274_s18, %s9580_s6 }
  0xa7   : > { %p7277_p3 = pnand %p7275_p1, %p7599_p8 }
  0xa9   : > { %p7278_p11 = pneg %p7277_p3 }
  0xab   : > { %p7283_p13 = pnand %p7281_p12, %p7278_p11 }
  0xad   : > { %7286 = shalt.err (!%p7283_p13)
}
  0xae   : > { %s7287_s29 = scalar_lea.vmem %s322_s20, 576  ;;  %p7295_p7 = scmp.lt.s32.totalorder %s322_s20, %s322_s20 }
  0xaf   : > { %p7288_p0 = scmp.ne.s32.totalorder %s322_s20, %s7287_s29  ;;  %p7296_p9 = scmp.lt.s32.totalorder %s7287_s29, %s7287_s29 }
  0xb1   : > { %p7290_p2 = pnand %p7288_p0, %p7599_p8  ;;  %p7297_p4 = por %p7296_p9, %p7295_p7 }
  0xb3   : > { %p7291_p5 = pneg %p7290_p2 }
  0xb5   : > { %p7298_p10 = pnand %p7297_p4, %p7291_p5 }
  0xb7   : > { %7301 = shalt.err (!%p7298_p10)
}
  0xb8   : > { %s9581_s17 = smov 64   ;;  %s7302_s18 = scalar_lea.hbm %s9555_s8, 16 }
  0xb9   : > { %7041 = dma.hbm_to_vmem [thread:$0]  (!%p7583_p6), %s9580_s6, 576, %s322_s20, [#allocation15], %s9581_s17, %s9581_s17, %s7484_s9  }
  0xba   : > { %p7303_p1 = scmp.ne.s32.totalorder %s9555_s8, %s7302_s18  ;;  %p7309_p12 = scmp.lt.u32.totalorder %s7302_s18, %s9555_s8 }
  0xbc   : > { %p7305_p3 = pnand %p7303_p1, %p7599_p8 }
  0xbe   : > { %p7306_p11 = pneg %p7305_p3 }
  0xc0   : > { %p7311_p13 = pnand %p7309_p12, %p7306_p11 }
  0xc2   : > { %7314 = shalt.err (!%p7311_p13)
}
  0xc3   : > { %s7315_s29 = scalar_lea.vmem %s347_s13, 16  ;;  %s7322_s9 = scalar_lea.vmem %s347_s13, 32 }
  0xc4   : > { %p7316_p0 = scmp.ne.s32.totalorder %s347_s13, %s7315_s29  ;;  %p7323_p7 = scmp.lt.s32.totalorder %s347_s13, %s347_s13 }
  0xc5   : > { %p7324_p9 = scmp.lt.s32.totalorder %s7322_s9, %s7315_s29 }
  0xc6   : > { %p7318_p2 = pnand %p7316_p0, %p7599_p8 }
  0xc7   : > { %p7325_p4 = por %p7324_p9, %p7323_p7 }
  0xc8   : > { %p7319_p5 = pneg %p7318_p2 }
  0xca   : > { %p7326_p10 = pnand %p7325_p4, %p7319_p5 }
  0xcc   : > { %7329 = shalt.err (!%p7326_p10)
}
  0xcd   : > { %7047 = dma.hbm_to_vmem [thread:$0]  (!%p7583_p6), %s9555_s8, 16, %s347_s13, [#allocation18]  }
  0xce   : > { %s6355_s27 = sadd.s32 4294967294, %s7476_s12   ;;  %s7745_s19 = sadd.s32 1, %s7476_s12  }
  0xcf   : > { %s38_s28 = sadd.s32 1, %s7472_s11  ;;  %s35_s22 = ssub.s32 %s7476_s12, %s7745_s19 }
  0xd0   : > { %p45_p8 = scmp.ne.s32.totalorder %s7472_s11, %s7468_s10  ;;  %p36_p1 = scmp.eq.s32.totalorder %s35_s22, 0 }
  0xd1   : > { %p46_p3 = scmp.eq.s32.totalorder %s7476_s12, 0  ;;  %p51_p11 = scmp.ne.s32.totalorder %s7468_s10, %s7464_s30 }
  0xd2   : > { %p248_p12 = scmp.eq.s32.totalorder %s7567_s15, 1  ;;  %p9582_p0 = scmp.eq.s32.totalorder %s7567_s15, 0 }
  0xd3   : > { %s7757_s14 = scalar_select %p36_p1, %s7472_s11, %s38_s28  }
  0xd4   : > { %p47_p13 = por %p46_p3, %p45_p8  ;;  %p7761_p2 = por %p9582_p0, %p51_p11 }
  0xd5   : > { %p7765_p6 = por %p248_p12, %p45_p8  ;;  %p254_p5 = scmp.eq.s32.totalorder %s6355_s27, 1 }
  0xd6   : > { %p7066_p7 = scmp.lt.s32.totalorder %s7476_s12, 2  ;;  %s7771_s18 = sand.u32 1, %s7472_s11  }
  0xd7   : > { %s9584_s23 = scalar_select %p7765_p6, 1, 0 }
  0xd8   : > { %p7773_p9 = por %p254_p5, %p51_p11  ;;  %s6365_s21 = sshll.u32 %s7771_s18, 7 }
  0xd9   : > { %s6531_s26 = sshll.u32 %s7476_s12, 11  ;;  %s9586_s0 = sld [smem:[#allocation28_spill]] }
  0xda   : > { %s9585_s24 = scalar_select %p7773_p9, 1, 0 }
  0xdb   : > { %s361_s20 = scalar_lea.vmem [#allocation5], %s6365_s21  ;;  %p7784_p4 = pnand %p7066_p7, %p47_p13 }
  0xdc   : > { %s368_s17 = sshll.u32 %s361_s20, 4  ;;  %s358_s22 = scalar_lea.sflag [#allocation6], %s7771_s18  ;;  %s7788_s17 = int_to_ptr.vmem [resolvable:$true] %s368_s17 }
  0xdd   : > { %p7332_p8 = pneg %p7784_p4 }
  0xdf   : > { %s7782_s9 = scalar_lea.hbm %s9586_s0, %s6531_s26  ;;  %s7335_s25 = scalar_lea.hbm %s9586_s0, 4096 }
  0xe0   : > { %s7330_s2 = scalar_lea.hbm %s7782_s9, 2048  ;;  %p7336_p11 = scmp.lt.u32.totalorder %s7782_s9, %s9586_s0 }
  0xe1   : > { %p7331_p10 = scmp.ne.s32.totalorder %s7782_s9, %s7330_s2  ;;  %p7337_p12 = scmp.lt.u32.totalorder %s7335_s25, %s7330_s2 }
  0xe2   : > { %p7339_p0 = scmp.lt.u32.totalorder %s7330_s2, %s7782_s9 }
  0xe3   : > { %p7333_p1 = pnand %p7332_p8, %p7331_p10  ;;  %p7338_p13 = por %p7337_p12, %p7336_p11 }
  0xe5   : > { %p7334_p3 = pneg %p7333_p1  ;;  %p7340_p5 = por %p7339_p0, %p7338_p13 }
  0xe7   : > { %p7341_p7 = pnand %p7340_p5, %p7334_p3 }
  0xe9   : > { %7344 = shalt.err (!%p7341_p7)
}
  0xea   : > { %s7345_s28 = scalar_lea.vmem %s7788_s17, 2048  ;;  %s7489_s21 = smov [#allocation5]  }
  0xeb   : > { %p7346_p10 = scmp.ne.s32.totalorder %s7788_s17, %s7345_s28  ;;  %s7350_s26 = sshll.u32 %s7489_s21, 4  ;;  %s7351_s26 = int_to_ptr.vmem [resolvable:$false] %s7350_s26 }
  0xec   : > { %s7352_s29 = scalar_lea.vmem %s7351_s26, 4096  ;;  %p7353_p6 = scmp.lt.s32.totalorder %s7788_s17, %s7351_s26 }
  0xed   : > { %p7348_p1 = pnand %p7346_p10, %p7332_p8  ;;  %p7354_p11 = scmp.lt.s32.totalorder %s7352_s29, %s7345_s28 }
  0xef   : > { %p7349_p9 = pneg %p7348_p1  ;;  %p7355_p12 = por %p7354_p11, %p7353_p6 }
  0xf1   : > { %p7356_p13 = pnand %p7355_p12, %p7349_p9 }
  0xf3   : > { %7359 = shalt.err (!%p7356_p13)
}
  0xf4   : > { %s9588_s2 = smov 8   ;;  %s9589_s25 = smov 128  }
  0xf5   : > { %7051 = dma.hbm_to_vmem [thread:$0]  (!%p7784_p4), %s7782_s9, 2048, %s7788_s17, %s358_s22, %s9589_s25, %s9589_s25, %s9588_s2  }
  0xf6   : > { %s6368_s20 = sshll.u32 %s7771_s18, 8  ;;  %s6532_s21 = sshll.u32 %s7476_s12, 12 }
  0xf7   : > { %s7827_s29 = scalar_lea.hbm %s9548_s1, %s6532_s21  ;;  %s382_s0 = scalar_lea.vmem [#allocation8], %s6368_s20 }
  0xf8   : > { %s389_s3 = sshll.u32 %s382_s0, 4  ;;  %s9590_s4 = sand.u32 1, %s7476_s12   ;;  %s7829_s3 = int_to_ptr.vmem [resolvable:$true] %s389_s3 }
  0xf9   : > { %s7833_s5 = scalar_lea.sflag [#allocation9], %s9590_s4  ;;  %s7360_s6 = scalar_lea.hbm %s7827_s29, 4096 }
  0xfa   : > { %p7361_p6 = scmp.ne.s32.totalorder %s7827_s29, %s7360_s6  ;;  %s7365_s17 = scalar_lea.hbm %s9548_s1, 8192 }
  0xfb   : > { %p7366_p0 = scmp.lt.u32.totalorder %s7827_s29, %s9548_s1  ;;  %p7367_p5 = scmp.lt.u32.totalorder %s7365_s17, %s7360_s6 }
  0xfc   : > { %p7363_p9 = pnand %p7361_p6, %p7332_p8  ;;  %p7369_p10 = scmp.lt.u32.totalorder %s7360_s6, %s7827_s29 }
  0xfd   : > { %p7368_p7 = por %p7367_p5, %p7366_p0 }
  0xfe   : > { %p7364_p3 = pneg %p7363_p9 }
  0xff   : > { %p7370_p1 = por %p7369_p10, %p7368_p7 }
 0x101   : > { %p7371_p11 = pnand %p7370_p1, %p7364_p3 }
 0x103   : > { %7374 = shalt.err (!%p7371_p11)
}
 0x104   : > { %s7375_s0 = scalar_lea.vmem %s7829_s3, 4096  ;;  %s7490_s4 = smov [#allocation8]  }
 0x105   : > { %p7376_p12 = scmp.ne.s32.totalorder %s7829_s3, %s7375_s0  ;;  %s7380_s20 = sshll.u32 %s7490_s4, 4  ;;  %s7381_s20 = int_to_ptr.vmem [resolvable:$false] %s7380_s20 }
 0x106   : > { %s7382_s28 = scalar_lea.vmem %s7381_s20, 8192  ;;  %p7383_p9 = scmp.lt.s32.totalorder %s7829_s3, %s7381_s20 }
 0x107   : > { %p7378_p13 = pnand %p7376_p12, %p7332_p8  ;;  %p7384_p0 = scmp.lt.s32.totalorder %s7382_s28, %s7375_s0 }
 0x109   : > { %p7379_p6 = pneg %p7378_p13  ;;  %p7385_p5 = por %p7384_p0, %p7383_p9 }
 0x10b   : > { %p7386_p7 = pnand %p7385_p5, %p7379_p6 }
 0x10d   : > { %7389 = shalt.err (!%p7386_p7)
}
 0x10e   : > { %7054 = dma.hbm_to_vmem [thread:$0]  (!%p7784_p4), %s7827_s29, 4096, %s7829_s3, %s7833_s5, %s9589_s25, %s9589_s25, %s9588_s2  }
 0x10f   : > { %p9591_p8 = scmp.ne.s32.totalorder %s9573_s16, 0 }
 0x110   : > { %s7865_s6 = sand.u32 (!%p9591_p8), 1, %s7468_s10  }
 0x111   : > { %401 = sbr.rel (%p9591_p8) target bundleno = 1799 (0x707), region = 56  ;;  %s6372_s26 = sshll.u32 (!%p9591_p8), %s7865_s6, 7 }
 0x112   : > { %s404_s18 = scalar_lea.sflag (!%p9591_p8), [#allocation6], %s7865_s6  ;;  %s7869_s9 = scalar_lea.vmem (!%p9591_p8), [#allocation5], %s6372_s26 }
 0x118   : > { %7435 = dma.done.wait (%p7761_p2), %s404_s18, 2048  }
 0x119   : > { %7437 = vsyncadd (%p7761_p2), %s404_s18, 4294965248  ;;  %s412_s3 = sand.u32 1, %s7567_s15   ;;  %s6373_s5 = sshll.u32 %s7865_s6, 8 }
 0x11a   : > { %s413_s16 = scalar_lea.sflag [#allocation9], %s412_s3  ;;  %s7877_s27 = scalar_lea.vmem [#allocation8], %s6373_s5 }
 0x11b   : > { %7439 = dma.done.wait (%p7761_p2), %s413_s16, 4096  }
 0x11c   : > { %7441 = vsyncadd (%p7761_p2), %s413_s16, 4294963200  ;;  %p9592_p4 = scmp.eq.s32.totalorder %s7567_s15, 0 }
 0x11e   : > { %7443 = dma.done.wait (%p9592_p4), [#allocation9], 256   ;;  %p9593_p3 = pmov %p9592_p4 }
 0x120   : > { %7445 = vsyncadd (%p9593_p3), [#allocation9], 4294967040  ;;  %p9594_p10 = pmov %p9593_p3 }
 0x121   : > { %p9595_p1 = pmov %p9593_p3 }
 0x122   : > { %7447 = dma.done.wait (%p9594_p10), [#allocation12], 592  }
 0x123   : > { %7449 = vsyncadd (%p9595_p1), [#allocation12], 4294966704  ;;  %p9596_p11 = pmov %p9595_p1 }
 0x124   : > { %p9597_p12 = pmov %p9595_p1 }
 0x125   : > { %7451 = dma.done.wait (%p9596_p11), [#allocation15], 592  }
 0x126   : > { %7453 = vsyncadd (%p9597_p12), [#allocation15], 4294966704  ;;  %p9598_p2 = pmov %p9595_p1 }
 0x127   : > { %p9599_p13 = pmov %p9595_p1 }
 0x128   : > { %7455 = dma.done.wait (%p9598_p2), [#allocation18], 32  }
 0x129   : > { %7457 = vsyncadd (%p9599_p13), [#allocation18], 4294967264  ;;  %vm485_vm0 = vcmask 64512   ;;  %vm488_vm1 = vcmask 58368   ;;  %v7491_v0 = vmov 0.0   ;;  %vm494_vm2 = vcmask 57344  }
 0x12a   : > { %486 = vst.msk [vmem:[#allocation2] sm:$0xff] %vm485_vm0, %v7491_v0  ;;  %487 = vst.msk [vmem:[#allocation2 + $0x8] sm:$0xff] %vm485_vm0, %v7491_v0  ;;  %v533_v1 = vld [vmem:[%s7869_s9] sm:$0xff]  ;;  %v534_v2 = vld [vmem:[%s7869_s9 + $0x8] sm:$0xff]  ;;  %s7492_s13 = smov 8   ;;  %s7493_s2 = smov 16  }
 0x12b   : > { %489 = vst.msk [vmem:[#allocation2 + $0x10] sm:$0x3] %vm488_vm1, %v7491_v0  ;;  %493 = vst.msk [vmem:[#allocation2 + $0x1a8] sm:$0x3] %vm488_vm1, %v7491_v0  ;;  %v7941_v3 = vld [vmem:[#allocation10] sm:$0xff]  ;;  %6690 = vmatprep.subr.mxu0 %v533_v1  ;;  %6695 = vmatprep.subr.mxu1 %v534_v2  ;;  %v7943_v4 = vld [vmem:[#allocation10 + $0x8] sm:$0xff] }
 0x12c   : > { %491 = vst.msk [vmem:[#allocation2 + $0x198] sm:$0xff] %vm485_vm0, %v7491_v0  ;;  %492 = vst.msk [vmem:[#allocation2 + $0x1a0] sm:$0xff] %vm485_vm0, %v7491_v0  ;;  %6691 = vmatpush3.msra.mxu0 %v533_v1  ;;  %6692 = vmatprep.mubr.msk.f32.mxu0 %vm485_vm0, %v7941_v3  ;;  %v535_v5 = vld [vmem:[%s7869_s9 + $0x10] sm:$0xff]  ;;  %v536_v6 = vld [vmem:[%s7869_s9 + $0x18] sm:$0xff]  ;;  %vm1788_vm3 = vcmask 31744   ;;  %vm2158_vm4 = vcmask 130112  }
 0x12d   : > { %513 = vst.msk [vmem:[#allocation2 + $0x11] sm:$0x1] %vm494_vm2, %v7491_v0  ;;  %495 = vst.msk [vmem:[#allocation2] sm:$0x1] %vm494_vm2, %v7491_v0  ;;  %6696 = vmatpush3.msra.mxu1 %v534_v2  ;;  %6697 = vmatprep.mubr.msk.f32.mxu1 %vm485_vm0, %v7941_v3  ;;  %v537_v7 = vld [vmem:[%s7869_s9 + $0x20] sm:$0xff]  ;;  %v538_v8 = vld [vmem:[%s7869_s9 + $0x28] sm:$0xff] }
 0x12e   : > { %496 = vst.msk [vmem:[#allocation2 + $0x18] sm:$0x1] %vm494_vm2, %v7491_v0  ;;  %497 = vst.msk [vmem:[#allocation2 + $0x30] sm:$0x1] %vm494_vm2, %v7491_v0  ;;  %6693 = vmatmul.mubr.msk.f32.vlgmr.msra.gmra.mrb[0].mxu0 %vm485_vm0, %v7943_v4  ;;  %6698 = vmatmul.mubr.msk.f32.vlgmr.msra.gmra.mrb[0].mxu1 %vm485_vm0, %v7943_v4  ;;  %v539_v9 = vld [vmem:[%s7869_s9 + $0x30] sm:$0xff]  ;;  %v540_v10 = vld [vmem:[%s7869_s9 + $0x38] sm:$0xff] }
 0x12f   : > { %498 = vst.msk [vmem:[#allocation2 + $0x48] sm:$0x1] %vm494_vm2, %v7491_v0  ;;  %499 = vst.msk [vmem:[#allocation2 + $0x60] sm:$0x1] %vm494_vm2, %v7491_v0  ;;  %6700 = vmatprep.subr.mxu0 %v535_v5  ;;  %6702 = vmatprep.mubr.msk.f32.mxu0 %vm485_vm0, %v7941_v3  ;;  %v541_v11 = vld [vmem:[%s7869_s9 + $0x40] sm:$0xff]  ;;  %v542_v12 = vld [vmem:[%s7869_s9 + $0x48] sm:$0xff] }
 0x130   : > { %500 = vst.msk [vmem:[#allocation2 + $0x78] sm:$0x1] %vm494_vm2, %v7491_v0  ;;  %501 = vst.msk [vmem:[#allocation2 + $0x90] sm:$0x1] %vm494_vm2, %v7491_v0  ;;  %6701 = vmatpush3.msra.mxu0 %v535_v5  ;;  %6705 = vmatprep.subr.mxu1 %v536_v6  ;;  %v543_v13 = vld [vmem:[%s7869_s9 + $0x50] sm:$0xff]  ;;  %v544_v14 = vld [vmem:[%s7869_s9 + $0x58] sm:$0xff] }
 0x131   : > { %502 = vst.msk [vmem:[#allocation2 + $0xa8] sm:$0x1] %vm494_vm2, %v7491_v0  ;;  %503 = vst.msk [vmem:[#allocation2 + $0xc0] sm:$0x1] %vm494_vm2, %v7491_v0  ;;  %6706 = vmatpush3.msra.mxu1 %v536_v6  ;;  %6707 = vmatprep.mubr.msk.f32.mxu1 %vm485_vm0, %v7941_v3  ;;  %v545_v15 = vld [vmem:[%s7869_s9 + $0x60] sm:$0xff]  ;;  %v546_v16 = vld [vmem:[%s7869_s9 + $0x68] sm:$0xff] }
 0x132   : > { %504 = vst.msk [vmem:[#allocation2 + $0xd8] sm:$0x1] %vm494_vm2, %v7491_v0  ;;  %505 = vst.msk [vmem:[#allocation2 + $0xf0] sm:$0x1] %vm494_vm2, %v7491_v0  ;;  %6703 = vmatmul.mubr.msk.f32.vlgmr.msra.gmra.mrb[2].mxu0 %vm485_vm0, %v7943_v4  ;;  %6708 = vmatmul.mubr.msk.f32.vlgmr.msra.gmra.mrb[2].mxu1 %vm485_vm0, %v7943_v4  ;;  %v547_v17 = vld [vmem:[%s7869_s9 + $0x70] sm:$0xff]  ;;  %v2047_v19 = vld [vmem:[#allocation2 + $0x9] sm:$0xff] }
 0x133   : > { %506 = vst.msk [vmem:[#allocation2 + $0x108] sm:$0x1] %vm494_vm2, %v7491_v0  ;;  %507 = vst.msk [vmem:[#allocation2 + $0x120] sm:$0x1] %vm494_vm2, %v7491_v0  ;;  %6710 = vmatprep.subr.mxu0 %v537_v7  ;;  %6712 = vmatprep.mubr.msk.f32.mxu0 %vm485_vm0, %v7941_v3  ;;  %v2046_v18 = vld [vmem:[#allocation2 + $0x1] sm:$0xff]  ;;  %vm2287_vm5 = vcmask 195712  }
 0x134   : > { %508 = vst.msk [vmem:[#allocation2 + $0x138] sm:$0x1] %vm494_vm2, %v7491_v0  ;;  %509 = vst.msk [vmem:[#allocation2 + $0x150] sm:$0x1] %vm494_vm2, %v7491_v0  ;;  %6711 = vmatpush3.msra.mxu0 %v537_v7  ;;  %6715 = vmatprep.subr.mxu1 %v538_v8  ;;  %v548_v20 = vld [vmem:[%s7869_s9 + $0x78] sm:$0xff]  ;;  %v2078_v21 = vpack.c.bf16 %v2047_v19, %v2046_v18  ;;  %v1982_v26 = vld [vmem:[#allocation2] sm:$0xff] }
 0x135   : > { %510 = vst.msk [vmem:[#allocation2 + $0x168] sm:$0x1] %vm494_vm2, %v7491_v0  ;;  %511 = vst.msk [vmem:[#allocation2 + $0x180] sm:$0x1] %vm494_vm2, %v7491_v0  ;;  %6716 = vmatpush3.msra.mxu1 %v538_v8  ;;  %6717 = vmatprep.mubr.msk.f32.mxu1 %vm485_vm0, %v7941_v3  ;;  %v2175_v22 = vld [vmem:[#allocation2 + $0x2] sm:$0xff]  ;;  %v2176_v23 = vld [vmem:[#allocation2 + $0xa] sm:$0xff] }
 0x136   : > { %512 = vst.msk [vmem:[#allocation2 + $0x198] sm:$0x1] %vm494_vm2, %v7491_v0  ;;  %514 = vst.msk [vmem:[#allocation2 + $0x29] sm:$0x1] %vm494_vm2, %v7491_v0  ;;  %6713 = vmatmul.mubr.msk.f32.vlgmr.msra.gmra.mrb[4].mxu0 %vm485_vm0, %v7943_v4  ;;  %6718 = vmatmul.mubr.msk.f32.vlgmr.msra.gmra.mrb[4].mxu1 %vm485_vm0, %v7943_v4  ;;  %v2207_v24 = vpack.c.bf16 %v2176_v23, %v2175_v22  ;;  %v1983_v25 = vld [vmem:[#allocation2 + $0x8] sm:$0xff]  ;;  %v1756_v31 = vld [vmem:[%s7877_s27 + $0x8] sm:$0xff] }
 0x137   : > { %515 = vst.msk [vmem:[#allocation2 + $0x41] sm:$0x1] %vm494_vm2, %v7491_v0  ;;  %516 = vst.msk [vmem:[#allocation2 + $0x59] sm:$0x1] %vm494_vm2, %v7491_v0  ;;  %6720 = vmatprep.subr.mxu0 %v539_v9  ;;  %6722 = vmatprep.mubr.msk.f32.mxu0 %vm485_vm0, %v7941_v3  ;;  %v2014_v27 = vpack.c.bf16 %v1983_v25, %v1982_v26  ;;  %v1758_v28 = vld [vmem:[%s7877_s27 + $0x18] sm:$0xff]  ;;  %v1757_v32 = vld [vmem:[%s7877_s27 + $0x10] sm:$0xff] }
 0x138   : > { %517 = vst.msk [vmem:[#allocation2 + $0x71] sm:$0x1] %vm494_vm2, %v7491_v0  ;;  %518 = vst.msk [vmem:[#allocation2 + $0x89] sm:$0x1] %vm494_vm2, %v7491_v0  ;;  %6721 = vmatpush3.msra.mxu0 %v539_v9  ;;  %6725 = vmatprep.subr.mxu1 %v540_v10  ;;  %v1755_v33 = vld [vmem:[%s7877_s27] sm:$0xff]  ;;  %vm2332_vm6 = vcmask 195584  }
 0x139   : > { %519 = vst.msk [vmem:[#allocation2 + $0xa1] sm:$0x1] %vm494_vm2, %v7491_v0  ;;  %520 = vst.msk [vmem:[#allocation2 + $0xb9] sm:$0x1] %vm494_vm2, %v7491_v0  ;;  %6726 = vmatpush3.msra.mxu1 %v540_v10  ;;  %6727 = vmatprep.mubr.msk.f32.mxu1 %vm485_vm0, %v7941_v3  ;;  %v1760_v35 = vld [vmem:[%s7877_s27 + $0x28] sm:$0xff]  ;;  %s7494_s25 = smov 4  }
 0x13a   : > { %521 = vst.msk [vmem:[#allocation2 + $0xd1] sm:$0x1] %vm494_vm2, %v7491_v0  ;;  %522 = vst.msk [vmem:[#allocation2 + $0xe9] sm:$0x1] %vm494_vm2, %v7491_v0  ;;  %6723 = vmatmul.mubr.msk.f32.vlgmr.msra.gmra.mrb[6].mxu0 %vm485_vm0, %v7943_v4  ;;  %6728 = vmatmul.mubr.msk.f32.vlgmr.msra.gmra.mrb[6].mxu1 %vm485_vm0, %v7943_v4  ;;  %v1759_v40 = vld [vmem:[%s7877_s27 + $0x20] sm:$0xff]  ;;  %v1762_v45 = vld [vmem:[%s7877_s27 + $0x38] sm:$0xff] }
 0x13b   : > { %523 = vst.msk [vmem:[#allocation2 + $0x101] sm:$0x1] %vm494_vm2, %v7491_v0  ;;  %524 = vst.msk [vmem:[#allocation2 + $0x119] sm:$0x1] %vm494_vm2, %v7491_v0  ;;  %6730 = vmatprep.subr.mxu0 %v541_v11  ;;  %6732 = vmatprep.mubr.msk.f32.mxu0 %vm485_vm0, %v7941_v3  ;;  %v1761_v50 = vld [vmem:[%s7877_s27 + $0x30] sm:$0xff]  ;;  %v1764_v63 = vld [vmem:[%s7877_s27 + $0x48] sm:$0xff] }
 0x13c   : > { %525 = vst.msk [vmem:[#allocation2 + $0x131] sm:$0x1] %vm494_vm2, %v7491_v0  ;;  %526 = vst.msk [vmem:[#allocation2 + $0x149] sm:$0x1] %vm494_vm2, %v7491_v0  ;;  %6731 = vmatpush3.msra.mxu0 %v541_v11  ;;  %6735 = vmatprep.subr.mxu1 %v542_v12  ;;  %v1766_v9 = vld [vmem:[%s7877_s27 + $0x58] sm:$0xff]  ;;  %v1765_v10 = vld [vmem:[%s7877_s27 + $0x50] sm:$0xff] }
 0x13d   : > { %527 = vst.msk [vmem:[#allocation2 + $0x161] sm:$0x1] %vm494_vm2, %v7491_v0  ;;  %528 = vst.msk [vmem:[#allocation2 + $0x179] sm:$0x1] %vm494_vm2, %v7491_v0  ;;  %6736 = vmatpush3.msra.mxu1 %v542_v12  ;;  %6737 = vmatprep.mubr.msk.f32.mxu1 %vm485_vm0, %v7941_v3  ;;  %v1768_v11 = vld [vmem:[%s7877_s27 + $0x68] sm:$0xff]  ;;  %v1767_v12 = vld [vmem:[%s7877_s27 + $0x60] sm:$0xff] }
 0x13e   : > { %529 = vst.msk [vmem:[#allocation2 + $0x191] sm:$0x1] %vm494_vm2, %v7491_v0  ;;  %530 = vst.msk [vmem:[#allocation2 + $0x1a9] sm:$0x1] %vm494_vm2, %v7491_v0  ;;  %6733 = vmatmul.mubr.msk.f32.vlgmr.msra.gmra.mrb[8].mxu0 %vm485_vm0, %v7943_v4  ;;  %6738 = vmatmul.mubr.msk.f32.vlgmr.msra.gmra.mrb[8].mxu1 %vm485_vm0, %v7943_v4  ;;  %v1773_v18 = vld [vmem:[%s7877_s27 + $0x90] sm:$0xff]  ;;  %v1776_v19 = vld [vmem:[%s7877_s27 + $0xa8] sm:$0xff] }
 0x13f   : > { %6740 = vmatprep.subr.mxu0 %v543_v13  ;;  %6742 = vmatprep.mubr.msk.f32.mxu0 %vm485_vm0, %v7941_v3  ;;  %2030 = vst.msk [vmem:[#allocation3] sm:$0xff] %vm485_vm0, %v2014_v27  ;;  %v1777_v22 = vld [vmem:[%s7877_s27 + $0xb0] sm:$0xff]  ;;  %v1780_v23 = vld [vmem:[%s7877_s27 + $0xc8] sm:$0xff]  ;;  %v1782_v25 = vld [vmem:[%s7877_s27 + $0xd8] sm:$0xff]  ;;  %vm1949_vm7 = vcmask 64544   ;;  %vm2381_vm8 = vcmask 1043456  }
 0x140   : > { %6741 = vmatpush3.msra.mxu0 %v543_v13  ;;  %6745 = vmatprep.subr.mxu1 %v544_v14  ;;  %1792 = vst.msk [vmem:[#allocation2 + $0x39] sm:$0xff] %vm1788_vm3, %v1758_v28  ;;  %1790 = vst.msk [vmem:[#allocation2 + $0x21] sm:$0xff] %vm1788_vm3, %v1756_v31  ;;  %v1770_v13 = vld [vmem:[%s7877_s27 + $0x78] sm:$0xff]  ;;  %v1781_v26 = vld [vmem:[%s7877_s27 + $0xd0] sm:$0xff]  ;;  %s6381_s29 = sshll.u32 %s7865_s6, 4  ;;  %s6533_s21 = sshll.u32 %s7567_s15, 8 }
 0x141   : > { %6746 = vmatpush3.msra.mxu1 %v544_v14  ;;  %6747 = vmatprep.mubr.msk.f32.mxu1 %vm485_vm0, %v7941_v3  ;;  %1791 = vst.msk [vmem:[#allocation2 + $0x31] sm:$0xff] %vm1788_vm3, %v1757_v32  ;;  %1789 = vst.msk [vmem:[#allocation2 + $0x19] sm:$0xff] %vm1788_vm3, %v1755_v33  ;;  %v1769_v14 = vld [vmem:[%s7877_s27 + $0x70] sm:$0xff]  ;;  %v1784_v27 = vld [vmem:[%s7877_s27 + $0xe8] sm:$0xff]  ;;  %s483_s17 = scalar_lea.vmem [#allocation20], %s6381_s29  ;;  %s9600_s20 = sld [smem:[#allocation34_spill]] }
 0x142   : > { %6743 = vmatmul.mubr.msk.f32.vlgmr.msra.gmra.mrb[10].mxu0 %vm485_vm0, %v7943_v4  ;;  %6748 = vmatmul.mubr.msk.f32.vlgmr.msra.gmra.mrb[10].mxu1 %vm485_vm0, %v7943_v4  ;;  %1794 = vst.msk [vmem:[#allocation2 + $0x51] sm:$0xff] %vm1788_vm3, %v1760_v35  ;;  %1793 = vst.msk [vmem:[#allocation2 + $0x49] sm:$0xff] %vm1788_vm3, %v1759_v40  ;;  %v1783_v28 = vld [vmem:[%s7877_s27 + $0xe0] sm:$0xff]  ;;  %v7122_v35 = vld [vmem:[#allocation11] sm:$0xff]   ;;  %s6196_s22 = sshll.u32 %s483_s17, 4  ;;  %s6182_s26 = scalar_lea.sflag [#allocation7], %s7865_s6  ;;  %s9500_s22 = int_to_ptr.vmem [resolvable:$true] %s6196_s22 }
 0x143   : > { %6750 = vmatprep.subr.mxu0 %v545_v15  ;;  %6752 = vmatprep.mubr.msk.f32.mxu0 %vm485_vm0, %v7941_v3  ;;  %1796 = vst.msk [vmem:[#allocation2 + $0x69] sm:$0xff] %vm1788_vm3, %v1762_v45  ;;  %1795 = vst.msk [vmem:[#allocation2 + $0x61] sm:$0xff] %vm1788_vm3, %v1761_v50  ;;  %s7390_s18 = scalar_lea.vmem %s9500_s22, 256  ;;  %p9601_p9 = scmp.ne.s32.totalorder %s9584_s23, 0 }
 0x144   : > { %6751 = vmatpush3.msra.mxu0 %v545_v15  ;;  %6755 = vmatprep.subr.mxu1 %v546_v16  ;;  %1798 = vst.msk [vmem:[#allocation2 + $0x81] sm:$0xff] %vm1788_vm3, %v1764_v63  ;;  %1800 = vst.msk [vmem:[#allocation2 + $0x99] sm:$0xff] %vm1788_vm3, %v1766_v9  ;;  %v1772_v15 = vld [vmem:[%s7877_s27 + $0x88] sm:$0xff]  ;;  %v7125_v9 = vld [vmem:[#allocation11 + $0x14] ss:$0 sps:$4 sm:$0xff]   ;;  %p7391_p6 = scmp.ne.s32.totalorder %s9500_s22, %s7390_s18  ;;  %s7495_s9 = smov [#allocation20]  }
 0x145   : > { %6756 = vmatpush3.msra.mxu1 %v546_v16  ;;  %6757 = vmatprep.mubr.msk.f32.mxu1 %vm485_vm0, %v7941_v3  ;;  %1799 = vst.msk [vmem:[#allocation2 + $0x91] sm:$0xff] %vm1788_vm3, %v1765_v10  ;;  %1802 = vst.msk [vmem:[#allocation2 + $0xb1] sm:$0xff] %vm1788_vm3, %v1768_v11  ;;  %v1771_v16 = vld [vmem:[%s7877_s27 + $0x80] sm:$0xff]  ;;  %s7394_s15 = sshll.u32 %s7495_s9, 4  ;;  %s7395_s15 = int_to_ptr.vmem [resolvable:$false] %s7394_s15 }
 0x146   : > { %6753 = vmatmul.mubr.msk.f32.vlgmr.msra.gmra.mrb[12].mxu0 %vm485_vm0, %v7943_v4  ;;  %6758 = vmatmul.mubr.msk.f32.vlgmr.msra.gmra.mrb[12].mxu1 %vm485_vm0, %v7943_v4  ;;  %1801 = vst.msk [vmem:[#allocation2 + $0xa9] sm:$0xff] %vm1788_vm3, %v1767_v12  ;;  %1804 = vst.msk [vmem:[#allocation2 + $0xc9] sm:$0xff] %vm1788_vm3, %v1770_v13  ;;  %v2976_v13 = vsel %vm2381_vm8, %v7125_v9, 0  ;;  %p7392_p0 = pnand %p7391_p6, %p9601_p9  ;;  %s7396_s3 = scalar_lea.vmem %s7395_s15, 512 }
 0x147   : > { %6760 = vmatprep.subr.mxu0 %v547_v17  ;;  %6762 = vmatprep.mubr.msk.f32.mxu0 %vm485_vm0, %v7941_v3  ;;  %1803 = vst.msk [vmem:[#allocation2 + $0xc1] sm:$0xff] %vm1788_vm3, %v1769_v14  ;;  %1806 = vst.msk [vmem:[#allocation2 + $0xe1] sm:$0xff] %vm1788_vm3, %v1772_v15  ;;  %s9505_s28 = scalar_lea.hbm %s9600_s20, %s6533_s21  ;;  %p7397_p7 = scmp.lt.s32.totalorder %s9500_s22, %s7395_s15 }
 0x148   : > { %6761 = vmatpush3.msra.mxu0 %v547_v17  ;;  %6765 = vmatprep.subr.mxu1 %v548_v20  ;;  %1805 = vst.msk [vmem:[#allocation2 + $0xd9] sm:$0xff] %vm1788_vm3, %v1771_v16  ;;  %v1774_v17 = vld [vmem:[%s7877_s27 + $0x98] sm:$0xff]  ;;  %1807 = vst.msk [vmem:[#allocation2 + $0xf1] sm:$0xff] %vm1788_vm3, %v1773_v18  ;;  %p7393_p5 = pneg %p7392_p0  ;;  %p7398_p8 = scmp.lt.s32.totalorder %s7396_s3, %s7390_s18 }
 0x149   : > { %6766 = vmatpush3.msra.mxu1 %v548_v20  ;;  %6767 = vmatprep.mubr.msk.f32.mxu1 %vm485_vm0, %v7941_v3  ;;  %1808 = vst.msk [vmem:[#allocation2 + $0xf9] sm:$0xff] %vm1788_vm3, %v1774_v17  ;;  %1810 = vst.msk [vmem:[#allocation2 + $0x111] sm:$0xff] %vm1788_vm3, %v1776_v19  ;;  %v1775_v20 = vld [vmem:[%s7877_s27 + $0xa0] sm:$0xff] }
 0x14a   : > { %6763 = vmatmul.mubr.msk.f32.vlgmr.msra.gmra.mrb[14].mxu0 %vm485_vm0, %v7943_v4  ;;  %6768 = vmatmul.mubr.msk.f32.vlgmr.msra.gmra.mrb[14].mxu1 %vm485_vm0, %v7943_v4  ;;  %v1763_v4 = vld [vmem:[%s7877_s27 + $0x40] sm:$0xff]  ;;  %1809 = vst.msk [vmem:[#allocation2 + $0x109] sm:$0xff] %vm1788_vm3, %v1775_v20  ;;  %1811 = vst.msk [vmem:[#allocation2 + $0x121] sm:$0xff] %vm1788_vm3, %v1777_v22  ;;  %p7399_p4 = por %p7398_p8, %p7397_p7 }
 0x14b   : > { %2110 = vrot.lane.b32.xlu0 %v2078_v21, %s7492_s13  ;;  %1797 = vst.msk [vmem:[#allocation2 + $0x79] sm:$0xff] %vm1788_vm3, %v1763_v4  ;;  %v1778_v21 = vld [vmem:[%s7877_s27 + $0xb8] sm:$0xff]  ;;  %1814 = vst.msk [vmem:[#allocation2 + $0x141] sm:$0xff] %vm1788_vm3, %v1780_v23  ;;  %6770 = vmatprep.subr.bf16.mxu0 %v7122_v35 }
 0x14c   : > { %1812 = vst.msk [vmem:[#allocation2 + $0x129] sm:$0xff] %vm1788_vm3, %v1778_v21  ;;  %1816 = vst.msk [vmem:[#allocation2 + $0x159] sm:$0xff] %vm1788_vm3, %v1782_v25  ;;  %6771 = vmatpush3.bf16.msra.mxu0 %v7122_v35  ;;  %p7400_p3 = pnand %p7399_p4, %p7393_p5 }
 0x14d   : > { %1815 = vst.msk [vmem:[#allocation2 + $0x151] sm:$0xff] %vm1788_vm3, %v1781_v26  ;;  %1818 = vst.msk [vmem:[#allocation2 + $0x171] sm:$0xff] %vm1788_vm3, %v1784_v27 }
 0x14e   : > { %1817 = vst.msk [vmem:[#allocation2 + $0x169] sm:$0xff] %vm1788_vm3, %v1783_v28 }
 0x14f   : > { %2239 = vrot.lane.b32.xlu0 %v2207_v24, %s7493_s2  ;;  %v1779_v24 = vld [vmem:[%s7877_s27 + $0xc0] sm:$0xff] }
 0x150   : > { %1813 = vst.msk [vmem:[#allocation2 + $0x139] sm:$0xff] %vm1788_vm3, %v1779_v24 }
 0x1bd   : > { %v2111_v29 = vpop.permute.xlu0 %2110 }
 0x1be   : > { %2159 = vst.msk [vmem:[#allocation3] sm:$0xff] %vm2158_vm4, %v2111_v29  ;;  %v1786_v29 = vld [vmem:[%s7877_s27 + $0xf8] sm:$0xff] }
 0x1bf   : > { %1820 = vst.msk [vmem:[#allocation2 + $0x189] sm:$0xff] %vm1788_vm3, %v1786_v29 }
 0x1c1   : > { %v2240_v30 = vpop.permute.xlu0 %2239 }
 0x1c2   : > { %2288 = vst.msk [vmem:[#allocation3] sm:$0xff] %vm2287_vm5, %v2240_v30  ;;  %v1785_v30 = vld [vmem:[%s7877_s27 + $0xf0] sm:$0xff] }
 0x1c3   : > { %1819 = vst.msk [vmem:[#allocation2 + $0x181] sm:$0xff] %vm1788_vm3, %v1785_v30 }
 0x1c9   : > { %v2304_v34 = vld [vmem:[#allocation3] sm:$0xff] }
 0x1ca   : > { %6774 = vmatprep.mubr.msk.bf16.mxu0 %vm2332_vm6, %v2304_v34 }
 0x201   : > { %v6694_v36 = vpop.f32.mrb[0].mxu0  ;;  %v6699_v37 = vpop.f32.mrb[0].mxu1 }
 0x202   : > { %1859 = vrot.lane.b32.xlu1 %v6699_v37, %s7494_s25  ;;  %v621_v38 = vpop.f32.mrb[1].mxu0  ;;  %1855 = vrot.lane.b32.xlu0 %v6694_v36, %s7494_s25  ;;  %v696_v39 = vpop.f32.mrb[1].mxu1 }
 0x205   : > { %v6704_v41 = vpop.f32.mrb[2].mxu0  ;;  %v6709_v42 = vpop.f32.mrb[2].mxu1 }
 0x206   : > { %1857 = vrot.lane.b32.xlu1 %v696_v39, %s7494_s25  ;;  %1853 = vrot.lane.b32.xlu0 %v621_v38, %s7494_s25  ;;  %v771_v43 = vpop.f32.mrb[3].mxu0  ;;  %v846_v44 = vpop.f32.mrb[3].mxu1  ;;  %v7123_v38 = vld [vmem:[#allocation11 + $0x8] ss:$0 sps:$4 sm:$0xff]  }
 0x207   : > { %6986 = vmatprep.subr.msk.bf16.mxu0 %vm2381_vm8, %v7123_v38 }
 0x209   : > { %v6714_v46 = vpop.f32.mrb[4].mxu0  ;;  %v6719_v47 = vpop.f32.mrb[4].mxu1 }
 0x20a   : > { %1863 = vrot.lane.b32.xlu1 %v6704_v41, %s7494_s25  ;;  %1861 = vrot.lane.b32.xlu0 %v771_v43, %s7494_s25  ;;  %v921_v48 = vpop.f32.mrb[5].mxu0  ;;  %v996_v49 = vpop.f32.mrb[5].mxu1 }
 0x20d   : > { %v6724_v51 = vpop.f32.mrb[6].mxu0  ;;  %v6729_v52 = vpop.f32.mrb[6].mxu1 }
 0x20e   : > { %1867 = vrot.lane.b32.xlu1 %v6709_v42, %s7494_s25  ;;  %1865 = vrot.lane.b32.xlu0 %v846_v44, %s7494_s25  ;;  %v1071_v53 = vpop.f32.mrb[7].mxu0  ;;  %v1146_v54 = vpop.f32.mrb[7].mxu1  ;;  %v2383_v42 = vsel %vm2381_vm8, %v7123_v38, 0 }
 0x20f   : > { %6773 = vmatpush3.bf16.msra.mxu0 %v2383_v42 }
 0x211   : > { %v6734_v55 = vpop.f32.mrb[8].mxu0  ;;  %v6739_v56 = vpop.f32.mrb[8].mxu1 }
 0x212   : > { %1871 = vrot.lane.b32.xlu1 %v6714_v46, %s7494_s25  ;;  %1869 = vrot.lane.b32.xlu0 %v921_v48, %s7494_s25  ;;  %v1221_v57 = vpop.f32.mrb[9].mxu0  ;;  %v1296_v58 = vpop.f32.mrb[9].mxu1 }
 0x215   : > { %v6744_v59 = vpop.f32.mrb[10].mxu0  ;;  %v6749_v60 = vpop.f32.mrb[10].mxu1 }
 0x216   : > { %1875 = vrot.lane.b32.xlu1 %v6719_v47, %s7494_s25  ;;  %1873 = vrot.lane.b32.xlu0 %v996_v49, %s7494_s25  ;;  %v1371_v61 = vpop.f32.mrb[11].mxu0  ;;  %v1446_v62 = vpop.f32.mrb[11].mxu1 }
 0x219   : > { %v6754_v0 = vpop.f32.mrb[12].mxu0  ;;  %v6759_v1 = vpop.f32.mrb[12].mxu1 }
 0x21a   : > { %1879 = vrot.lane.b32.xlu1 %v6724_v51, %s7494_s25  ;;  %1877 = vrot.lane.b32.xlu0 %v1071_v53, %s7494_s25  ;;  %v1521_v2 = vpop.f32.mrb[13].mxu0  ;;  %v1596_v3 = vpop.f32.mrb[13].mxu1 }
 0x21d   : > { %v6764_v5 = vpop.f32.mrb[14].mxu0  ;;  %v6769_v6 = vpop.f32.mrb[14].mxu1 }
 0x21e   : > { %1883 = vrot.lane.b32.xlu1 %v6729_v52, %s7494_s25  ;;  %1881 = vrot.lane.b32.xlu0 %v1146_v54, %s7494_s25  ;;  %v1671_v7 = vpop.f32.mrb[15].mxu0  ;;  %v1746_v8 = vpop.f32.mrb[15].mxu1 }
 0x222   : > { %1887 = vrot.lane.b32.xlu1 %v6734_v55, %s7494_s25  ;;  %1885 = vrot.lane.b32.xlu0 %v1221_v57, %s7494_s25 }
 0x226   : > { %1891 = vrot.lane.b32.xlu1 %v6739_v56, %s7494_s25  ;;  %1889 = vrot.lane.b32.xlu0 %v1296_v58, %s7494_s25 }
 0x22a   : > { %1895 = vrot.lane.b32.xlu1 %v6744_v59, %s7494_s25  ;;  %1893 = vrot.lane.b32.xlu0 %v1371_v61, %s7494_s25 }
 0x22e   : > { %1899 = vrot.lane.b32.xlu1 %v6749_v60, %s7494_s25  ;;  %1897 = vrot.lane.b32.xlu0 %v1446_v62, %s7494_s25 }
 0x232   : > { %1903 = vrot.lane.b32.xlu1 %v6754_v0, %s7494_s25  ;;  %1901 = vrot.lane.b32.xlu0 %v1521_v2, %s7494_s25 }
 0x236   : > { %1907 = vrot.lane.b32.xlu1 %v6759_v1, %s7494_s25  ;;  %1905 = vrot.lane.b32.xlu0 %v1596_v3, %s7494_s25  ;;  %v7124_v1 = vld [vmem:[#allocation11 + $0xc] sm:$0xff]  }
 0x237   : > { %6806 = vmatprep.subr.bf16.mxu1 %v7124_v1 }
 0x238   : > { %6807 = vmatpush3.bf16.msra.mxu1 %v7124_v1 }
 0x239   : > { %6987 = vmatprep.subr.msk.bf16.mxu1 %vm2381_vm8, %v7125_v9 }
 0x23a   : > { %1911 = vrot.lane.b32.xlu1 %v6764_v5, %s7494_s25  ;;  %1909 = vrot.lane.b32.xlu0 %v1671_v7, %s7494_s25 }
 0x23c   : > { %6809 = vmatpush3.bf16.msra.mxu1 %v2976_v13 }
 0x23e   : > { %1915 = vrot.lane.b32.xlu1 %v6769_v6, %s7494_s25  ;;  %1913 = vrot.lane.b32.xlu0 %v1746_v8, %s7494_s25 }
 0x274   : > { %v1860_v31 = vpop.permute.xlu1 %1859  ;;  %v1856_v32 = vpop.permute.xlu0 %1855 }
 0x275   : > { %1953 = vst.msk [vmem:[#allocation2 + $0x39] sm:$0xff] %vm1949_vm7, %v1860_v31  ;;  %1951 = vst.msk [vmem:[#allocation2 + $0x21] sm:$0xff] %vm1949_vm7, %v1856_v32 }
 0x278   : > { %v1858_v33 = vpop.permute.xlu1 %1857  ;;  %v1854_v34 = vpop.permute.xlu0 %1853 }
 0x279   : > { %1952 = vst.msk [vmem:[#allocation2 + $0x31] sm:$0xff] %vm1949_vm7, %v1858_v33  ;;  %1950 = vst.msk [vmem:[#allocation2 + $0x19] sm:$0xff] %vm1949_vm7, %v1854_v34 }
 0x27c   : > { %v1864_v36 = vpop.permute.xlu1 %1863  ;;  %v1862_v37 = vpop.permute.xlu0 %1861  ;;  %v2051_v39 = vld [vmem:[#allocation2 + $0x39] sm:$0xff]  ;;  %v2049_v40 = vld [vmem:[#allocation2 + $0x21] sm:$0xff] }
 0x27d   : > { %1955 = vst.msk [vmem:[#allocation2 + $0x51] sm:$0xff] %vm1949_vm7, %v1864_v36  ;;  %1954 = vst.msk [vmem:[#allocation2 + $0x49] sm:$0xff] %vm1949_vm7, %v1862_v37  ;;  %v2180_v41 = vld [vmem:[#allocation2 + $0x3a] sm:$0xff]  ;;  %v2178_v58 = vld [vmem:[#allocation2 + $0x22] sm:$0xff] }
 0x280   : > { %v2050_v43 = vld [vmem:[#allocation2 + $0x31] sm:$0xff]  ;;  %v2048_v44 = vld [vmem:[#allocation2 + $0x19] sm:$0xff]  ;;  %v1868_v46 = vpop.permute.xlu1 %1867  ;;  %v1866_v47 = vpop.permute.xlu0 %1865 }
 0x281   : > { %v2179_v45 = vld [vmem:[#allocation2 + $0x32] sm:$0xff]  ;;  %v8133_v48 = vpack.c.bf16 %v2051_v39, %v2050_v43  ;;  %v2079_v49 = vpack.c.bf16 %v2049_v40, %v2048_v44  ;;  %1957 = vst.msk [vmem:[#allocation2 + $0x69] sm:$0xff] %vm1949_vm7, %v1868_v46  ;;  %1956 = vst.msk [vmem:[#allocation2 + $0x61] sm:$0xff] %vm1949_vm7, %v1866_v47  ;;  %v1985_v51 = vld [vmem:[#allocation2 + $0x20] sm:$0xff] }
 0x282   : > { %v1984_v50 = vld [vmem:[#allocation2 + $0x18] sm:$0xff]  ;;  %v1986_v54 = vld [vmem:[#allocation2 + $0x30] sm:$0xff]  ;;  %v8140_v56 = vpack.c.bf16 %v2180_v41, %v2179_v45 }
 0x283   : > { %v2177_v52 = vld [vmem:[#allocation2 + $0x1a] sm:$0xff]  ;;  %v2015_v53 = vpack.c.bf16 %v1985_v51, %v1984_v50  ;;  %2114 = vrot.lane.b32.xlu0 %v8133_v48, %s7492_s13  ;;  %2112 = vrot.lane.b32.xlu1 %v2079_v49, %s7492_s13 }
 0x284   : > { %v1987_v55 = vld [vmem:[#allocation2 + $0x38] sm:$0xff]  ;;  %v1872_v59 = vpop.permute.xlu1 %1871  ;;  %v1870_v60 = vpop.permute.xlu0 %1869  ;;  %v2208_v61 = vpack.c.bf16 %v2178_v58, %v2177_v52  ;;  %v1988_v62 = vld [vmem:[#allocation2 + $0x48] sm:$0xff]  ;;  %v1989_v63 = vld [vmem:[#allocation2 + $0x50] sm:$0xff] }
 0x285   : > { %v8142_v57 = vpack.c.bf16 %v1987_v55, %v1986_v54  ;;  %2031 = vst.msk [vmem:[#allocation3 + $0x8] sm:$0xff] %vm485_vm0, %v2015_v53  ;;  %2626 = vst.msk [vmem:[#allocation3] sm:$0xff] %vm485_vm0, %v2015_v53  ;;  %v8150_v0 = vpack.c.bf16 %v1989_v63, %v1988_v62  ;;  %v2052_v2 = vld [vmem:[#allocation2 + $0x49] sm:$0xff]  ;;  %v2053_v3 = vld [vmem:[#allocation2 + $0x51] sm:$0xff] }
 0x286   : > { %1959 = vst.msk [vmem:[#allocation2 + $0x81] sm:$0xff] %vm1949_vm7, %v1872_v59  ;;  %1958 = vst.msk [vmem:[#allocation2 + $0x79] sm:$0xff] %vm1949_vm7, %v1870_v60  ;;  %v8164_v10 = vpack.c.bf16 %v2053_v3, %v2052_v2  ;;  %v2181_v16 = vld [vmem:[#allocation2 + $0x4a] sm:$0xff]  ;;  %v2182_v17 = vld [vmem:[#allocation2 + $0x52] sm:$0xff] }
 0x287   : > { %2032 = vst.msk [vmem:[#allocation3 + $0x10] sm:$0xff] %vm485_vm0, %v8142_v57  ;;  %2243 = vrot.lane.b32.xlu0 %v8140_v56, %s7493_s2  ;;  %2241 = vrot.lane.b32.xlu1 %v2208_v61, %s7493_s2  ;;  %2033 = vst.msk [vmem:[#allocation3 + $0x18] sm:$0xff] %vm485_vm0, %v8150_v0  ;;  %v8179_v23 = vpack.c.bf16 %v2182_v17, %v2181_v16 }
 0x288   : > { %v1876_v4 = vpop.permute.xlu1 %1875  ;;  %v1874_v5 = vpop.permute.xlu0 %1873  ;;  %v2584_v6 = vld [vmem:[#allocation2 + $0x60] sm:$0xff]  ;;  %v2585_v7 = vld [vmem:[#allocation2 + $0x68] sm:$0xff] }
 0x289   : > { %1961 = vst.msk [vmem:[#allocation2 + $0x99] sm:$0xff] %vm1949_vm7, %v1876_v4  ;;  %1960 = vst.msk [vmem:[#allocation2 + $0x91] sm:$0xff] %vm1949_vm7, %v1874_v5  ;;  %v8159_v8 = vpack.c.bf16 %v2585_v7, %v2584_v6  ;;  %v2648_v19 = vld [vmem:[#allocation2 + $0x61] sm:$0xff]  ;;  %v2649_v20 = vld [vmem:[#allocation2 + $0x69] sm:$0xff] }
 0x28a   : > { %v8189_v27 = vpack.c.bf16 %v2649_v20, %v2648_v19  ;;  %v2776_v32 = vld [vmem:[#allocation2 + $0x62] sm:$0xff]  ;;  %v2777_v33 = vld [vmem:[#allocation2 + $0x6a] sm:$0xff] }
 0x28b   : > { %2706 = vrot.lane.b32.xlu0 %v2079_v49, %s7492_s13  ;;  %2708 = vrot.lane.b32.xlu1 %v8133_v48, %s7492_s13  ;;  %2034 = vst.msk [vmem:[#allocation3 + $0x20] sm:$0xff] %vm485_vm0, %v8159_v8  ;;  %v8203_v37 = vpack.c.bf16 %v2777_v33, %v2776_v32 }
 0x28c   : > { %v1880_v11 = vpop.permute.xlu1 %1879  ;;  %v1878_v12 = vpop.permute.xlu0 %1877 }
 0x28d   : > { %1963 = vst.msk [vmem:[#allocation2 + $0xb1] sm:$0xff] %vm1949_vm7, %v1880_v11  ;;  %1962 = vst.msk [vmem:[#allocation2 + $0xa9] sm:$0xff] %vm1949_vm7, %v1878_v12  ;;  %v1992_v14 = vld [vmem:[#allocation2 + $0x78] sm:$0xff]  ;;  %v1993_v15 = vld [vmem:[#allocation2 + $0x80] sm:$0xff] }
 0x28e   : > { %v8172_v18 = vpack.c.bf16 %v1993_v15, %v1992_v14  ;;  %v2056_v46 = vld [vmem:[#allocation2 + $0x79] sm:$0xff]  ;;  %v2057_v47 = vld [vmem:[#allocation2 + $0x81] sm:$0xff] }
 0x28f   : > { %2834 = vrot.lane.b32.xlu0 %v2208_v61, %s7493_s2  ;;  %2116 = vrot.lane.b32.xlu1 %v8164_v10, %s7492_s13  ;;  %v8233_v53 = vpack.c.bf16 %v2057_v47, %v2056_v46  ;;  %v2185_v59 = vld [vmem:[#allocation2 + $0x7a] sm:$0xff]  ;;  %v2186_v60 = vld [vmem:[#allocation2 + $0x82] sm:$0xff] }
 0x290   : > { %v1884_v21 = vpop.permute.xlu1 %1883  ;;  %v1882_v22 = vpop.permute.xlu0 %1881  ;;  %2035 = vst.msk [vmem:[#allocation3 + $0x28] sm:$0xff] %vm485_vm0, %v8172_v18  ;;  %v2588_v24 = vld [vmem:[#allocation2 + $0x90] sm:$0xff]  ;;  %v2589_v25 = vld [vmem:[#allocation2 + $0x98] sm:$0xff]  ;;  %v2212_v3 = vpack.c.bf16 %v2186_v60, %v2185_v59 }
 0x291   : > { %1965 = vst.msk [vmem:[#allocation2 + $0xc9] sm:$0xff] %vm1949_vm7, %v1884_v21  ;;  %1964 = vst.msk [vmem:[#allocation2 + $0xc1] sm:$0xff] %vm1949_vm7, %v1882_v22  ;;  %v8183_v26 = vpack.c.bf16 %v2589_v25, %v2588_v24  ;;  %v2652_v62 = vld [vmem:[#allocation2 + $0x91] sm:$0xff]  ;;  %v2653_v63 = vld [vmem:[#allocation2 + $0x99] sm:$0xff] }
 0x292   : > { %v2679_v7 = vpack.c.bf16 %v2653_v63, %v2652_v62  ;;  %v2780_v13 = vld [vmem:[#allocation2 + $0x92] sm:$0xff]  ;;  %v2781_v14 = vld [vmem:[#allocation2 + $0x9a] sm:$0xff] }
 0x293   : > { %2836 = vrot.lane.b32.xlu0 %v8140_v56, %s7493_s2  ;;  %2245 = vrot.lane.b32.xlu1 %v8179_v23, %s7493_s2  ;;  %2036 = vst.msk [vmem:[#allocation3 + $0x30] sm:$0xff] %vm485_vm0, %v8183_v26  ;;  %v2807_v19 = vpack.c.bf16 %v2781_v14, %v2780_v13 }
 0x294   : > { %v1888_v28 = vpop.permute.xlu1 %1887  ;;  %v1886_v29 = vpop.permute.xlu0 %1885  ;;  %v1996_v30 = vld [vmem:[#allocation2 + $0xa8] sm:$0xff]  ;;  %v1997_v31 = vld [vmem:[#allocation2 + $0xb0] sm:$0xff] }
 0x295   : > { %1967 = vst.msk [vmem:[#allocation2 + $0xe1] sm:$0xff] %vm1949_vm7, %v1888_v28  ;;  %1966 = vst.msk [vmem:[#allocation2 + $0xd9] sm:$0xff] %vm1949_vm7, %v1886_v29  ;;  %v8195_v34 = vpack.c.bf16 %v1997_v31, %v1996_v30  ;;  %v2061_v28 = vld [vmem:[#allocation2 + $0xb1] sm:$0xff] }
 0x296   : > { %v2189_v30 = vld [vmem:[#allocation2 + $0xaa] sm:$0xff]  ;;  %v2190_v31 = vld [vmem:[#allocation2 + $0xb2] sm:$0xff] }
 0x297   : > { %3364 = vrot.lane.b32.xlu0 %v8133_v48, %s7492_s13  ;;  %2712 = vrot.lane.b32.xlu1 %v8189_v27, %s7492_s13  ;;  %2037 = vst.msk [vmem:[#allocation3 + $0x38] sm:$0xff] %vm485_vm0, %v8195_v34 }
 0x298   : > { %v1892_v35 = vpop.permute.xlu1 %1891  ;;  %v1890_v36 = vpop.permute.xlu0 %1889  ;;  %v2592_v38 = vld [vmem:[#allocation2 + $0xc0] sm:$0xff]  ;;  %v2593_v39 = vld [vmem:[#allocation2 + $0xc8] sm:$0xff] }
 0x299   : > { %1969 = vst.msk [vmem:[#allocation2 + $0xf9] sm:$0xff] %vm1949_vm7, %v1892_v35  ;;  %1968 = vst.msk [vmem:[#allocation2 + $0xf1] sm:$0xff] %vm1949_vm7, %v1890_v36  ;;  %v8207_v40 = vpack.c.bf16 %v2593_v39, %v2592_v38  ;;  %v2656_v32 = vld [vmem:[#allocation2 + $0xc1] sm:$0xff]  ;;  %v2657_v33 = vld [vmem:[#allocation2 + $0xc9] sm:$0xff]  ;;  %v2214_v36 = vpack.c.bf16 %v2190_v31, %v2189_v30 }
 0x29a   : > { %v8286_v35 = vld [vmem:[#allocation11 + $0x18] sm:$0xff]   ;;  %v2784_v38 = vld [vmem:[#allocation2 + $0xc2] sm:$0xff]  ;;  %v2785_v39 = vld [vmem:[#allocation2 + $0xca] sm:$0xff] }
 0x29b   : > { %3492 = vrot.lane.b32.xlu0 %v8140_v56, %s7493_s2  ;;  %2840 = vrot.lane.b32.xlu1 %v8203_v37, %s7493_s2  ;;  %2038 = vst.msk [vmem:[#allocation3 + $0x40] sm:$0xff] %vm485_vm0, %v8207_v40 }
 0x29c   : > { %v1896_v41 = vpop.permute.xlu1 %1895  ;;  %v1894_v42 = vpop.permute.xlu0 %1893  ;;  %v2000_v43 = vld [vmem:[#allocation2 + $0xd8] sm:$0xff]  ;;  %v2001_v44 = vld [vmem:[#allocation2 + $0xe0] sm:$0xff]  ;;  %6842 = vmatprep.subr.bf16.mxu0 %v8286_v35 }
 0x29d   : > { %1971 = vst.msk [vmem:[#allocation2 + $0x111] sm:$0xff] %vm1949_vm7, %v1896_v41  ;;  %1970 = vst.msk [vmem:[#allocation2 + $0x109] sm:$0xff] %vm1949_vm7, %v1894_v42  ;;  %v8217_v45 = vpack.c.bf16 %v2001_v44, %v2000_v43  ;;  %v8296_v41 = vpack.c.bf16 %v2785_v39, %v2784_v38  ;;  %v2064_v42 = vld [vmem:[#allocation2 + $0xd9] sm:$0xff]  ;;  %v2065_v43 = vld [vmem:[#allocation2 + $0xe1] sm:$0xff] }
 0x29e   : > { %v8307_v44 = vpack.c.bf16 %v2065_v43, %v2064_v42  ;;  %v2193_v46 = vld [vmem:[#allocation2 + $0xda] sm:$0xff]  ;;  %v2194_v47 = vld [vmem:[#allocation2 + $0xe2] sm:$0xff] }
 0x29f   : > { %3366 = vrot.lane.b32.xlu1 %v8164_v10, %s7492_s13  ;;  %2118 = vrot.lane.b32.xlu0 %v8189_v27, %s7492_s13  ;;  %2039 = vst.msk [vmem:[#allocation3 + $0x48] sm:$0xff] %vm485_vm0, %v8217_v45 }
 0x2a0   : > { %v1900_v48 = vpop.permute.xlu1 %1899  ;;  %v1898_v49 = vpop.permute.xlu0 %1897  ;;  %v2596_v50 = vld [vmem:[#allocation2 + $0xf0] sm:$0xff]  ;;  %v2597_v51 = vld [vmem:[#allocation2 + $0xf8] sm:$0xff] }
 0x2a1   : > { %1973 = vst.msk [vmem:[#allocation2 + $0x129] sm:$0xff] %vm1949_vm7, %v1900_v48  ;;  %1972 = vst.msk [vmem:[#allocation2 + $0x121] sm:$0xff] %vm1949_vm7, %v1898_v49  ;;  %v8227_v52 = vpack.c.bf16 %v2597_v51, %v2596_v50  ;;  %v2660_v48 = vld [vmem:[#allocation2 + $0xf1] sm:$0xff]  ;;  %v2661_v49 = vld [vmem:[#allocation2 + $0xf9] sm:$0xff]  ;;  %v8312_v50 = vpack.c.bf16 %v2194_v47, %v2193_v46 }
 0x2a2   : > { %v8317_v51 = vpack.c.bf16 %v2661_v49, %v2660_v48 }
 0x2a3   : > { %3494 = vrot.lane.b32.xlu1 %v8179_v23, %s7493_s2  ;;  %2247 = vrot.lane.b32.xlu0 %v8203_v37, %s7493_s2  ;;  %2040 = vst.msk [vmem:[#allocation3 + $0x50] sm:$0xff] %vm485_vm0, %v8227_v52 }
 0x2a4   : > { %v1904_v54 = vpop.permute.xlu1 %1903  ;;  %v1902_v55 = vpop.permute.xlu0 %1901  ;;  %v2004_v56 = vld [vmem:[#allocation2 + $0x108] sm:$0xff]  ;;  %v2005_v58 = vld [vmem:[#allocation2 + $0x110] sm:$0xff] }
 0x2a5   : > { %1975 = vst.msk [vmem:[#allocation2 + $0x141] sm:$0xff] %vm1949_vm7, %v1904_v54  ;;  %1974 = vst.msk [vmem:[#allocation2 + $0x139] sm:$0xff] %vm1949_vm7, %v1902_v55  ;;  %v8239_v61 = vpack.c.bf16 %v2005_v58, %v2004_v56  ;;  %v2069_v54 = vld [vmem:[#allocation2 + $0x111] sm:$0xff]  ;;  %v2196_v56 = vld [vmem:[#allocation2 + $0xfa] sm:$0xff] }
 0x2a6   : > { %v2195_v55 = vld [vmem:[#allocation2 + $0xf2] sm:$0xff]  ;;  %v2197_v60 = vld [vmem:[#allocation2 + $0x10a] sm:$0xff] }
 0x2a7   : > { %2710 = vrot.lane.b32.xlu0 %v8164_v10, %s7492_s13  ;;  %2120 = vrot.lane.b32.xlu1 %v8233_v53, %s7492_s13  ;;  %2041 = vst.msk [vmem:[#allocation3 + $0x58] sm:$0xff] %vm485_vm0, %v8239_v61  ;;  %v8325_v59 = vpack.c.bf16 %v2196_v56, %v2195_v55  ;;  %v2198_v62 = vld [vmem:[#allocation2 + $0x112] sm:$0xff] }
 0x2a8   : > { %v1908_v1 = vpop.permute.xlu1 %1907  ;;  %v1906_v2 = vpop.permute.xlu0 %1905  ;;  %v2006_v4 = vld [vmem:[#allocation2 + $0x120] sm:$0xff]  ;;  %v2007_v5 = vld [vmem:[#allocation2 + $0x128] sm:$0xff] }
 0x2a9   : > { %1977 = vst.msk [vmem:[#allocation2 + $0x159] sm:$0xff] %vm1949_vm7, %v1908_v1  ;;  %1976 = vst.msk [vmem:[#allocation2 + $0x151] sm:$0xff] %vm1949_vm7, %v1906_v2  ;;  %v8249_v6 = vpack.c.bf16 %v2007_v5, %v2006_v4  ;;  %v2070_v63 = vld [vmem:[#allocation2 + $0x121] sm:$0xff]  ;;  %v2071_v1 = vld [vmem:[#allocation2 + $0x129] sm:$0xff]  ;;  %v8331_v2 = vpack.c.bf16 %v2198_v62, %v2197_v60 }
 0x2ab   : > { %2838 = vrot.lane.b32.xlu0 %v8179_v23, %s7493_s2  ;;  %2249 = vrot.lane.b32.xlu1 %v2212_v3, %s7493_s2  ;;  %2042 = vst.msk [vmem:[#allocation3 + $0x60] sm:$0xff] %vm485_vm0, %v8249_v6 }
 0x2ac   : > { %v1912_v9 = vpop.permute.xlu1 %1911  ;;  %v1910_v10 = vpop.permute.xlu0 %1909  ;;  %v2008_v11 = vld [vmem:[#allocation2 + $0x138] sm:$0xff]  ;;  %v2009_v12 = vld [vmem:[#allocation2 + $0x140] sm:$0xff] }
 0x2ad   : > { %1979 = vst.msk [vmem:[#allocation2 + $0x171] sm:$0xff] %vm1949_vm7, %v1912_v9  ;;  %1978 = vst.msk [vmem:[#allocation2 + $0x169] sm:$0xff] %vm1949_vm7, %v1910_v10  ;;  %v8258_v15 = vpack.c.bf16 %v2009_v12, %v2008_v11  ;;  %v2072_v4 = vld [vmem:[#allocation2 + $0x139] sm:$0xff]  ;;  %v2073_v5 = vld [vmem:[#allocation2 + $0x141] sm:$0xff] }
 0x2ae   : > { %v2200_v9 = vld [vmem:[#allocation2 + $0x12a] sm:$0xff]  ;;  %v8343_v10 = vpack.c.bf16 %v2073_v5, %v2072_v4  ;;  %v2201_v12 = vld [vmem:[#allocation2 + $0x13a] sm:$0xff]  ;;  %v2202_v13 = vld [vmem:[#allocation2 + $0x142] sm:$0xff] }
 0x2af   : > { %3368 = vrot.lane.b32.xlu0 %v8189_v27, %s7492_s13  ;;  %2716 = vrot.lane.b32.xlu1 %v2679_v7, %s7492_s13  ;;  %2043 = vst.msk [vmem:[#allocation3 + $0x68] sm:$0xff] %vm485_vm0, %v8258_v15  ;;  %v2060_v27 = vld [vmem:[#allocation2 + $0xa9] sm:$0xff]  ;;  %v8351_v14 = vpack.c.bf16 %v2202_v13, %v2201_v12 }
 0x2b0   : > { %v1916_v16 = vpop.permute.xlu1 %1915  ;;  %v1914_v17 = vpop.permute.xlu0 %1913  ;;  %v2010_v20 = vld [vmem:[#allocation2 + $0x150] sm:$0xff]  ;;  %v2011_v21 = vld [vmem:[#allocation2 + $0x158] sm:$0xff]  ;;  %v2085_v29 = vpack.c.bf16 %v2061_v28, %v2060_v27 }
 0x2b1   : > { %1981 = vst.msk [vmem:[#allocation2 + $0x189] sm:$0xff] %vm1949_vm7, %v1916_v16  ;;  %1980 = vst.msk [vmem:[#allocation2 + $0x181] sm:$0xff] %vm1949_vm7, %v1914_v17  ;;  %v8267_v22 = vpack.c.bf16 %v2011_v21, %v2010_v20  ;;  %v2203_v16 = vld [vmem:[#allocation2 + $0x152] sm:$0xff]  ;;  %v2204_v17 = vld [vmem:[#allocation2 + $0x15a] sm:$0xff] }
 0x2b2   : > { %v2075_v20 = vld [vmem:[#allocation2 + $0x159] sm:$0xff] }
 0x2b3   : > { %3496 = vrot.lane.b32.xlu0 %v8203_v37, %s7493_s2  ;;  %2844 = vrot.lane.b32.xlu1 %v2807_v19, %s7493_s2  ;;  %2044 = vst.msk [vmem:[#allocation3 + $0x70] sm:$0xff] %vm485_vm0, %v8267_v22  ;;  %v8291_v37 = vpack.c.bf16 %v2657_v33, %v2656_v32 }
 0x2b4   : > { %v2012_v23 = vld [vmem:[#allocation2 + $0x168] sm:$0xff]  ;;  %v2013_v24 = vld [vmem:[#allocation2 + $0x170] sm:$0xff] }
 0x2b5   : > { %v8274_v25 = vpack.c.bf16 %v2013_v24, %v2012_v23  ;;  %v8357_v24 = vpack.c.bf16 %v2204_v17, %v2203_v16  ;;  %v2076_v28 = vld [vmem:[#allocation2 + $0x169] sm:$0xff] }
 0x2b6   : > { %v2205_v33 = vld [vmem:[#allocation2 + $0x16a] sm:$0xff] }
 0x2b7   : > { %3370 = vrot.lane.b32.xlu1 %v8233_v53, %s7492_s13  ;;  %2122 = vrot.lane.b32.xlu0 %v2679_v7, %s7492_s13  ;;  %2045 = vst.msk [vmem:[#allocation3 + $0x78] sm:$0xff] %vm485_vm0, %v8274_v25 }
 0x2b8   : > { %v2800_v17 = vld [vmem:[#allocation2 + $0x182] sm:$0xff] }
 0x2bb   : > { %3498 = vrot.lane.b32.xlu1 %v2212_v3, %s7493_s2  ;;  %2251 = vrot.lane.b32.xlu0 %v2807_v19, %s7493_s2 }
 0x2bf   : > { %2714 = vrot.lane.b32.xlu0 %v8233_v53, %s7492_s13  ;;  %2124 = vrot.lane.b32.xlu1 %v2085_v29, %s7492_s13  ;;  %v2068_v53 = vld [vmem:[#allocation2 + $0x109] sm:$0xff] }
 0x2c0   : > { %v8323_v58 = vpack.c.bf16 %v2069_v54, %v2068_v53 }
 0x2c3   : > { %2842 = vrot.lane.b32.xlu0 %v2212_v3, %s7493_s2  ;;  %2253 = vrot.lane.b32.xlu1 %v2214_v36, %s7493_s2  ;;  %v8337_v3 = vpack.c.bf16 %v2071_v1, %v2070_v63 }
 0x2c7   : > { %3372 = vrot.lane.b32.xlu0 %v2679_v7, %s7492_s13  ;;  %2720 = vrot.lane.b32.xlu1 %v8291_v37, %s7492_s13  ;;  %v2199_v7 = vld [vmem:[#allocation2 + $0x122] sm:$0xff] }
 0x2c8   : > { %v8345_v11 = vpack.c.bf16 %v2200_v9, %v2199_v7 }
 0x2cb   : > { %3500 = vrot.lane.b32.xlu0 %v2807_v19, %s7493_s2  ;;  %2848 = vrot.lane.b32.xlu1 %v8296_v41, %s7493_s2  ;;  %v2074_v19 = vld [vmem:[#allocation2 + $0x151] sm:$0xff] }
 0x2cc   : > { %v8359_v27 = vpack.c.bf16 %v2075_v20, %v2074_v19  ;;  %v2801_v19 = vld [vmem:[#allocation2 + $0x18a] sm:$0xff] }
 0x2cf   : > { %3374 = vrot.lane.b32.xlu1 %v2085_v29, %s7492_s13  ;;  %2126 = vrot.lane.b32.xlu0 %v8291_v37, %s7492_s13 }
 0x2d3   : > { %3502 = vrot.lane.b32.xlu1 %v2214_v36, %s7493_s2  ;;  %2255 = vrot.lane.b32.xlu0 %v8296_v41, %s7493_s2 }
 0x2d7   : > { %2718 = vrot.lane.b32.xlu0 %v2085_v29, %s7492_s13  ;;  %2128 = vrot.lane.b32.xlu1 %v8307_v44, %s7492_s13  ;;  %v2077_v29 = vld [vmem:[#allocation2 + $0x171] sm:$0xff] }
 0x2d8   : > { %v8367_v32 = vpack.c.bf16 %v2077_v29, %v2076_v28  ;;  %v3330_v29 = vld [vmem:[#allocation2 + $0x199] sm:$0xff] }
 0x2db   : > { %2846 = vrot.lane.b32.xlu0 %v2214_v36, %s7493_s2  ;;  %2257 = vrot.lane.b32.xlu1 %v8312_v50, %s7493_s2  ;;  %v2206_v36 = vld [vmem:[#allocation2 + $0x172] sm:$0xff] }
 0x2dc   : > { %v8375_v42 = vpack.c.bf16 %v2206_v36, %v2205_v33  ;;  %v3458_v36 = vld [vmem:[#allocation2 + $0x19a] sm:$0xff] }
 0x2df   : > { %2724 = vrot.lane.b32.xlu1 %v8317_v51, %s7492_s13  ;;  %2130 = vrot.lane.b32.xlu0 %v8317_v51, %s7492_s13 }
 0x2e3   : > { %2259 = vrot.lane.b32.xlu0 %v8325_v59, %s7493_s2  ;;  %2132 = vrot.lane.b32.xlu1 %v8323_v58, %s7492_s13 }
 0x2e7   : > { %2722 = vrot.lane.b32.xlu0 %v8307_v44, %s7492_s13  ;;  %2261 = vrot.lane.b32.xlu1 %v8331_v2, %s7493_s2 }
 0x2eb   : > { %2852 = vrot.lane.b32.xlu1 %v8325_v59, %s7493_s2  ;;  %2134 = vrot.lane.b32.xlu0 %v8337_v3, %s7492_s13 }
 0x2ef   : > { %2263 = vrot.lane.b32.xlu0 %v8345_v11, %s7493_s2  ;;  %2136 = vrot.lane.b32.xlu1 %v8343_v10, %s7492_s13 }
 0x2f3   : > { %2850 = vrot.lane.b32.xlu0 %v8312_v50, %s7493_s2  ;;  %2265 = vrot.lane.b32.xlu1 %v8351_v14, %s7493_s2 }
 0x2f5   : > { %v2113_v21 = vpop.permute.xlu1 %2112  ;;  %v2115_v23 = vpop.permute.xlu0 %2114 }
 0x2f6   : > { %2160 = vst.msk [vmem:[#allocation3 + $0x8] sm:$0xff] %vm2158_vm4, %v2113_v21  ;;  %2161 = vst.msk [vmem:[#allocation3 + $0x10] sm:$0xff] %vm2158_vm4, %v2115_v23  ;;  %v2817_v21 = vpack.c.bf16 %v2801_v19, %v2800_v17 }
 0x2f7   : > { %2267 = vrot.lane.b32.xlu0 %v8357_v24, %s7493_s2  ;;  %2138 = vrot.lane.b32.xlu1 %v8359_v27, %s7492_s13 }
 0x2f9   : > { %v2242_v30 = vpop.permute.xlu1 %2241  ;;  %v2244_v31 = vpop.permute.xlu0 %2243 }
 0x2fa   : > { %2289 = vst.msk [vmem:[#allocation3 + $0x8] sm:$0xff] %vm2287_vm5, %v2242_v30  ;;  %2290 = vst.msk [vmem:[#allocation3 + $0x10] sm:$0xff] %vm2287_vm5, %v2244_v31  ;;  %v3331_v30 = vld [vmem:[#allocation2 + $0x1a1] sm:$0xff] }
 0x2fb   : > { %3376 = vrot.lane.b32.xlu0 %v8291_v37, %s7492_s13  ;;  %2140 = vrot.lane.b32.xlu1 %v8367_v32, %s7492_s13  ;;  %v7127_v37 = vld [vmem:[#allocation11 + $0x20] ss:$0 sps:$4 sm:$0xff]  }
 0x2fc   : > { %v3634_v53 = vsel %vm2381_vm8, %v7127_v37, 0 }
 0x2fd   : > { %v2709_v38 = vpop.permute.xlu1 %2708  ;;  %v2707_v39 = vpop.permute.xlu0 %2706 }
 0x2fe   : > { %2754 = vst.msk [vmem:[#allocation3] sm:$0xff] %vm2158_vm4, %v2707_v39 }
 0x2ff   : > { %3504 = vrot.lane.b32.xlu0 %v8296_v41, %s7493_s2  ;;  %2269 = vrot.lane.b32.xlu1 %v8375_v42, %s7493_s2 }
 0x301   : > { %v2305_v43 = vld [vmem:[#allocation3 + $0x8] sm:$0xff]  ;;  %v2117_v46 = vpop.permute.xlu1 %2116  ;;  %v2835_v47 = vpop.permute.xlu0 %2834  ;;  %v2306_v48 = vld [vmem:[#allocation3 + $0x10] sm:$0xff] }
 0x302   : > { %2627 = vst.msk [vmem:[#allocation3 + $0x8] sm:$0xff] %vm485_vm0, %v8142_v57  ;;  %6775 = vmatmul.mubr.msk.bf16.vlgmr.msra.gmra.mrb[16].mxu0 %vm2332_vm6, %v2305_v43  ;;  %2628 = vst.msk [vmem:[#allocation3 + $0x10] sm:$0xff] %vm485_vm0, %v8150_v0 }
 0x303   : > { %2162 = vst.msk [vmem:[#allocation3 + $0x18] sm:$0xff] %vm2158_vm4, %v2117_v46  ;;  %2755 = vst.msk [vmem:[#allocation3 + $0x8] sm:$0xff] %vm2158_vm4, %v2709_v38  ;;  %2726 = vrot.lane.b32.xlu0 %v8323_v58, %s7492_s13  ;;  %3378 = vrot.lane.b32.xlu1 %v8307_v44, %s7492_s13  ;;  %v3459_v38 = vld [vmem:[#allocation2 + $0x1a2] sm:$0xff] }
 0x304   : > { %2882 = vst.msk [vmem:[#allocation3] sm:$0xff] %vm2287_vm5, %v2835_v47  ;;  %6778 = vmatprep.mubr.msk.bf16.mxu0 %vm2332_vm6, %v2306_v48  ;;  %6843 = vmatpush3.bf16.msra.mxu0 %v8286_v35  ;;  %v3475_v46 = vpack.c.bf16 %v3459_v38, %v3458_v36 }
 0x305   : > { %v2246_v41 = vpop.permute.xlu1 %2245  ;;  %v2837_v49 = vpop.permute.xlu0 %2836  ;;  %6988 = vmatprep.subr.msk.bf16.mxu0 %vm2381_vm8, %v7127_v37 }
 0x306   : > { %2291 = vst.msk [vmem:[#allocation3 + $0x18] sm:$0xff] %vm2287_vm5, %v2246_v41  ;;  %2883 = vst.msk [vmem:[#allocation3 + $0x8] sm:$0xff] %vm2287_vm5, %v2837_v49 }
 0x307   : > { %2854 = vrot.lane.b32.xlu0 %v8331_v2, %s7493_s2  ;;  %3506 = vrot.lane.b32.xlu1 %v8312_v50, %s7493_s2 }
 0x308   : > { %6845 = vmatpush3.bf16.msra.mxu0 %v3634_v53 }
 0x309   : > { %v2713_v44 = vpop.permute.xlu1 %2712  ;;  %v3365_v54 = vpop.permute.xlu0 %3364 }
 0x30b   : > { %v2898_v35 = vld [vmem:[#allocation3] sm:$0xff]  ;;  %3380 = vrot.lane.b32.xlu0 %v8317_v51, %s7492_s13  ;;  %2728 = vrot.lane.b32.xlu1 %v8337_v3, %s7492_s13 }
 0x30c   : > { %3284 = vst.msk [vmem:[#allocation3] sm:$0xff] %vm485_vm0, %v8142_v57  ;;  %6810 = vmatprep.mubr.msk.bf16.mxu1 %vm2332_vm6, %v2898_v35 }
 0x30d   : > { %3412 = vst.msk [vmem:[#allocation3] sm:$0xff] %vm2158_vm4, %v3365_v54  ;;  %v2307_v55 = vld [vmem:[#allocation3 + $0x18] sm:$0xff]  ;;  %v2841_v56 = vpop.permute.xlu1 %2840  ;;  %v3493_v50 = vpop.permute.xlu0 %3492  ;;  %v2899_v60 = vld [vmem:[#allocation3 + $0x8] sm:$0xff] }
 0x30e   : > { %2629 = vst.msk [vmem:[#allocation3 + $0x18] sm:$0xff] %vm485_vm0, %v8159_v8  ;;  %6779 = vmatmul.mubr.msk.bf16.gmra.mrb[20].mxu0 %vm2332_vm6, %v2307_v55  ;;  %6811 = vmatmul.mubr.msk.bf16.vlgmr.msra.gmra.mrb[16].mxu1 %vm2332_vm6, %v2899_v60  ;;  %3285 = vst.msk [vmem:[#allocation3 + $0x8] sm:$0xff] %vm485_vm0, %v8150_v0 }
 0x30f   : > { %3540 = vst.msk [vmem:[#allocation3] sm:$0xff] %vm2287_vm5, %v3493_v50  ;;  %3508 = vrot.lane.b32.xlu0 %v8325_v59, %s7493_s2  ;;  %2856 = vrot.lane.b32.xlu1 %v8345_v11, %s7493_s2 }
 0x310   : > { %2757 = vst.msk [vmem:[#allocation3 + $0x18] sm:$0xff] %vm2158_vm4, %v2713_v44 }
 0x311   : > { %2885 = vst.msk [vmem:[#allocation3 + $0x18] sm:$0xff] %vm2287_vm5, %v2841_v56  ;;  %v3367_v57 = vpop.permute.xlu1 %3366  ;;  %v2119_v51 = vpop.permute.xlu0 %2118 }
 0x312   : > { %3413 = vst.msk [vmem:[#allocation3 + $0x8] sm:$0xff] %vm2158_vm4, %v3367_v57  ;;  %2163 = vst.msk [vmem:[#allocation3 + $0x20] sm:$0xff] %vm2158_vm4, %v2119_v51 }
 0x313   : > { %2730 = vrot.lane.b32.xlu0 %v8343_v10, %s7492_s13  ;;  %3382 = vrot.lane.b32.xlu1 %v8323_v58, %s7492_s13 }
 0x315   : > { %v3495_v0 = vpop.permute.xlu1 %3494  ;;  %v2248_v62 = vpop.permute.xlu0 %2247 }
 0x316   : > { %3541 = vst.msk [vmem:[#allocation3 + $0x8] sm:$0xff] %vm2287_vm5, %v3495_v0  ;;  %2292 = vst.msk [vmem:[#allocation3 + $0x20] sm:$0xff] %vm2287_vm5, %v2248_v62  ;;  %v3556_v36 = vld [vmem:[#allocation3] sm:$0xff] }
 0x317   : > { %2858 = vrot.lane.b32.xlu0 %v8351_v14, %s7493_s2  ;;  %3510 = vrot.lane.b32.xlu1 %v8331_v2, %s7493_s2 }
 0x318   : > { %v2901_v59 = vld [vmem:[#allocation3 + $0x18] sm:$0xff] }
 0x319   : > { %3287 = vst.msk [vmem:[#allocation3 + $0x18] sm:$0xff] %vm485_vm0, %v8172_v18  ;;  %v2121_v63 = vpop.permute.xlu1 %2120  ;;  %v2711_v1 = vpop.permute.xlu0 %2710 }
 0x31a   : > { %2164 = vst.msk [vmem:[#allocation3 + $0x28] sm:$0xff] %vm2158_vm4, %v2121_v63  ;;  %2756 = vst.msk [vmem:[#allocation3 + $0x10] sm:$0xff] %vm2158_vm4, %v2711_v1 }
 0x31b   : > { %3384 = vrot.lane.b32.xlu0 %v8337_v3, %s7492_s13  ;;  %2732 = vrot.lane.b32.xlu1 %v8359_v27, %s7492_s13 }
 0x31d   : > { %v2250_v58 = vpop.permute.xlu1 %2249  ;;  %v2839_v4 = vpop.permute.xlu0 %2838  ;;  %v2308_v5 = vld [vmem:[#allocation3 + $0x20] sm:$0xff] }
 0x31e   : > { %2293 = vst.msk [vmem:[#allocation3 + $0x28] sm:$0xff] %vm2287_vm5, %v2250_v58  ;;  %2884 = vst.msk [vmem:[#allocation3 + $0x10] sm:$0xff] %vm2287_vm5, %v2839_v4  ;;  %6782 = vmatprep.mubr.msk.bf16.mxu0 %vm2332_vm6, %v2308_v5 }
 0x31f   : > { %2630 = vst.msk [vmem:[#allocation3 + $0x20] sm:$0xff] %vm485_vm0, %v8172_v18  ;;  %3512 = vrot.lane.b32.xlu0 %v8345_v11, %s7493_s2  ;;  %2860 = vrot.lane.b32.xlu1 %v8357_v24, %s7493_s2  ;;  %v2672_v18 = vld [vmem:[#allocation2 + $0x181] sm:$0xff]  ;;  %v2673_v11 = vld [vmem:[#allocation2 + $0x189] sm:$0xff] }
 0x320   : > { %v2689_v16 = vpack.c.bf16 %v2673_v11, %v2672_v18  ;;  %v4259_v18 = vld [vmem:[#allocation2 + $0x2] sm:$0xff]  ;;  %v4260_v11 = vld [vmem:[#allocation2 + $0xa] sm:$0xff] }
 0x321   : > { %v2717_v2 = vpop.permute.xlu1 %2716  ;;  %v3369_v3 = vpop.permute.xlu0 %3368 }
 0x323   : > { %3388 = vrot.lane.b32.xlu0 %v8359_v27, %s7492_s13  ;;  %3386 = vrot.lane.b32.xlu1 %v8343_v10, %s7492_s13 }
 0x325   : > { %v2309_v7 = vld [vmem:[#allocation3 + $0x28] sm:$0xff]  ;;  %v2900_v9 = vld [vmem:[#allocation3 + $0x10] sm:$0xff]  ;;  %v2845_v12 = vpop.permute.xlu1 %2844  ;;  %v3497_v13 = vpop.permute.xlu0 %3496 }
 0x326   : > { %2631 = vst.msk [vmem:[#allocation3 + $0x28] sm:$0xff] %vm485_vm0, %v8183_v26  ;;  %3286 = vst.msk [vmem:[#allocation3 + $0x10] sm:$0xff] %vm485_vm0, %v8159_v8  ;;  %6783 = vmatmul.mubr.msk.bf16.gmra.mrb[24].mxu0 %vm2332_vm6, %v2309_v7  ;;  %6814 = vmatprep.mubr.msk.bf16.mxu1 %vm2332_vm6, %v2900_v9  ;;  %v4131_v9 = vld [vmem:[#allocation2 + $0x1] sm:$0xff] }
 0x327   : > { %2759 = vst.msk [vmem:[#allocation3 + $0x28] sm:$0xff] %vm2158_vm4, %v2717_v2  ;;  %3414 = vst.msk [vmem:[#allocation3 + $0x10] sm:$0xff] %vm2158_vm4, %v3369_v3  ;;  %2734 = vrot.lane.b32.xlu0 %v8367_v32, %s7492_s13  ;;  %3514 = vrot.lane.b32.xlu1 %v8351_v14, %s7493_s2 }
 0x328   : > { %2887 = vst.msk [vmem:[#allocation3 + $0x28] sm:$0xff] %vm2287_vm5, %v2845_v12  ;;  %3542 = vst.msk [vmem:[#allocation3 + $0x10] sm:$0xff] %vm2287_vm5, %v3497_v13  ;;  %6815 = vmatmul.mubr.msk.bf16.gmra.mrb[20].mxu1 %vm2332_vm6, %v2901_v59  ;;  %v4132_v12 = vld [vmem:[#allocation2 + $0x9] sm:$0xff] }
 0x329   : > { %v3371_v8 = vpop.permute.xlu1 %3370  ;;  %v2123_v10 = vpop.permute.xlu0 %2122  ;;  %v4163_v13 = vpack.c.bf16 %v4132_v12, %v4131_v9 }
 0x32a   : > { %3415 = vst.msk [vmem:[#allocation3 + $0x18] sm:$0xff] %vm2158_vm4, %v3371_v8  ;;  %2165 = vst.msk [vmem:[#allocation3 + $0x30] sm:$0xff] %vm2158_vm4, %v2123_v10 }
 0x32b   : > { %2862 = vrot.lane.b32.xlu0 %v8375_v42, %s7493_s2  ;;  %2736 = vrot.lane.b32.xlu1 %v2689_v16, %s7492_s13 }
 0x32d   : > { %v3499_v14 = vpop.permute.xlu1 %3498  ;;  %v2252_v20 = vpop.permute.xlu0 %2251 }
 0x32e   : > { %3543 = vst.msk [vmem:[#allocation3 + $0x18] sm:$0xff] %vm2287_vm5, %v3499_v14  ;;  %2294 = vst.msk [vmem:[#allocation3 + $0x30] sm:$0xff] %vm2287_vm5, %v2252_v20 }
 0x32f   : > { %3516 = vrot.lane.b32.xlu0 %v8357_v24, %s7493_s2  ;;  %2864 = vrot.lane.b32.xlu1 %v2817_v21, %s7493_s2  ;;  %v2903_v23 = vld [vmem:[#allocation3 + $0x28] sm:$0xff] }
 0x330   : > { %3289 = vst.msk [vmem:[#allocation3 + $0x28] sm:$0xff] %vm485_vm0, %v8195_v34 }
 0x331   : > { %v2125_v27 = vpop.permute.xlu1 %2124  ;;  %v2715_v28 = vpop.permute.xlu0 %2714 }
 0x332   : > { %2166 = vst.msk [vmem:[#allocation3 + $0x38] sm:$0xff] %vm2158_vm4, %v2125_v27  ;;  %2758 = vst.msk [vmem:[#allocation3 + $0x20] sm:$0xff] %vm2158_vm4, %v2715_v28 }
 0x333   : > { %3392 = vrot.lane.b32.xlu0 %v2689_v16, %s7492_s13  ;;  %3390 = vrot.lane.b32.xlu1 %v8367_v32, %s7492_s13  ;;  %v3347_v32 = vpack.c.bf16 %v3331_v30, %v3330_v29  ;;  %v2608_v29 = vld [vmem:[#allocation2 + $0x180] sm:$0xff]  ;;  %v2609_v30 = vld [vmem:[#allocation2 + $0x188] sm:$0xff] }
 0x335   : > { %v2254_v24 = vpop.permute.xlu1 %2253  ;;  %v2843_v31 = vpop.permute.xlu0 %2842  ;;  %v2310_v33 = vld [vmem:[#allocation3 + $0x30] sm:$0xff] }
 0x336   : > { %2295 = vst.msk [vmem:[#allocation3 + $0x38] sm:$0xff] %vm2287_vm5, %v2254_v24  ;;  %2886 = vst.msk [vmem:[#allocation3 + $0x20] sm:$0xff] %vm2287_vm5, %v2843_v31  ;;  %6786 = vmatprep.mubr.msk.bf16.mxu0 %vm2332_vm6, %v2310_v33  ;;  %v8574_v24 = vpack.c.bf16 %v2609_v30, %v2608_v29 }
 0x337   : > { %2632 = vst.msk [vmem:[#allocation3 + $0x30] sm:$0xff] %vm485_vm0, %v8195_v34  ;;  %3520 = vrot.lane.b32.xlu0 %v2817_v21, %s7493_s2  ;;  %3518 = vrot.lane.b32.xlu1 %v8375_v42, %s7493_s2 }
 0x339   : > { %v2721_v39 = vpop.permute.xlu1 %2720  ;;  %v3373_v43 = vpop.permute.xlu0 %3372 }
 0x33b   : > { %3394 = vrot.lane.b32.xlu1 %v3347_v32, %s7492_s13  ;;  %4195 = vrot.lane.b32.xlu0 %v4163_v13, %s7492_s13 }
 0x33d   : > { %v2311_v47 = vld [vmem:[#allocation3 + $0x38] sm:$0xff]  ;;  %v2902_v48 = vld [vmem:[#allocation3 + $0x20] sm:$0xff]  ;;  %v2849_v37 = vpop.permute.xlu1 %2848  ;;  %v3501_v41 = vpop.permute.xlu0 %3500 }
 0x33e   : > { %2633 = vst.msk [vmem:[#allocation3 + $0x38] sm:$0xff] %vm485_vm0, %v8207_v40  ;;  %3288 = vst.msk [vmem:[#allocation3 + $0x20] sm:$0xff] %vm485_vm0, %v8183_v26  ;;  %6787 = vmatmul.mubr.msk.bf16.gmra.mrb[28].mxu0 %vm2332_vm6, %v2311_v47  ;;  %6818 = vmatprep.mubr.msk.bf16.mxu1 %vm2332_vm6, %v2902_v48  ;;  %v3557_v48 = vld [vmem:[#allocation3 + $0x8] sm:$0xff] }
 0x33f   : > { %2761 = vst.msk [vmem:[#allocation3 + $0x38] sm:$0xff] %vm2158_vm4, %v2721_v39  ;;  %3416 = vst.msk [vmem:[#allocation3 + $0x20] sm:$0xff] %vm2158_vm4, %v3373_v43  ;;  %3522 = vrot.lane.b32.xlu1 %v3475_v46, %s7493_s2  ;;  %6819 = vmatmul.mubr.msk.bf16.gmra.mrb[24].mxu1 %vm2332_vm6, %v2903_v23 }
 0x340   : > { %2889 = vst.msk [vmem:[#allocation3 + $0x38] sm:$0xff] %vm2287_vm5, %v2849_v37  ;;  %3544 = vst.msk [vmem:[#allocation3 + $0x20] sm:$0xff] %vm2287_vm5, %v3501_v41  ;;  %v3558_v37 = vld [vmem:[#allocation3 + $0x10] sm:$0xff] }
 0x341   : > { %v3375_v34 = vpop.permute.xlu1 %3374  ;;  %v2127_v42 = vpop.permute.xlu0 %2126 }
 0x342   : > { %3417 = vst.msk [vmem:[#allocation3 + $0x28] sm:$0xff] %vm2158_vm4, %v3375_v34  ;;  %2167 = vst.msk [vmem:[#allocation3 + $0x40] sm:$0xff] %vm2158_vm4, %v2127_v42 }
 0x345   : > { %v3503_v26 = vpop.permute.xlu1 %3502  ;;  %v2256_v49 = vpop.permute.xlu0 %2255 }
 0x346   : > { %3545 = vst.msk [vmem:[#allocation3 + $0x28] sm:$0xff] %vm2287_vm5, %v3503_v26  ;;  %2296 = vst.msk [vmem:[#allocation3 + $0x40] sm:$0xff] %vm2287_vm5, %v2256_v49 }
 0x347   : > { %v2905_v53 = vld [vmem:[#allocation3 + $0x38] sm:$0xff] }
 0x348   : > { %3291 = vst.msk [vmem:[#allocation3 + $0x38] sm:$0xff] %vm485_vm0, %v8217_v45 }
 0x349   : > { %v2129_v44 = vpop.permute.xlu1 %2128  ;;  %v2719_v54 = vpop.permute.xlu0 %2718 }
 0x34a   : > { %2168 = vst.msk [vmem:[#allocation3 + $0x48] sm:$0xff] %vm2158_vm4, %v2129_v44  ;;  %2760 = vst.msk [vmem:[#allocation3 + $0x30] sm:$0xff] %vm2158_vm4, %v2719_v54 }
 0x34d   : > { %v2258_v35 = vpop.permute.xlu1 %2257  ;;  %v2847_v55 = vpop.permute.xlu0 %2846  ;;  %v2312_v56 = vld [vmem:[#allocation3 + $0x40] sm:$0xff] }
 0x34e   : > { %2297 = vst.msk [vmem:[#allocation3 + $0x48] sm:$0xff] %vm2287_vm5, %v2258_v35  ;;  %2888 = vst.msk [vmem:[#allocation3 + $0x30] sm:$0xff] %vm2287_vm5, %v2847_v55  ;;  %6790 = vmatprep.mubr.msk.bf16.mxu0 %vm2332_vm6, %v2312_v56 }
 0x34f   : > { %2634 = vst.msk [vmem:[#allocation3 + $0x40] sm:$0xff] %vm485_vm0, %v8217_v45 }
 0x351   : > { %v2725_v50 = vpop.permute.xlu1 %2724  ;;  %v2131_v60 = vpop.permute.xlu0 %2130 }
 0x352   : > { %2169 = vst.msk [vmem:[#allocation3 + $0x50] sm:$0xff] %vm2158_vm4, %v2131_v60 }
 0x355   : > { %v2313_v57 = vld [vmem:[#allocation3 + $0x48] sm:$0xff]  ;;  %v2133_v51 = vpop.permute.xlu1 %2132  ;;  %v2260_v0 = vpop.permute.xlu0 %2259  ;;  %v2904_v62 = vld [vmem:[#allocation3 + $0x30] sm:$0xff] }
 0x356   : > { %2635 = vst.msk [vmem:[#allocation3 + $0x48] sm:$0xff] %vm485_vm0, %v8227_v52  ;;  %6791 = vmatmul.mubr.msk.bf16.gmra.mrb[32].mxu0 %vm2332_vm6, %v2313_v57  ;;  %6822 = vmatprep.mubr.msk.bf16.mxu1 %vm2332_vm6, %v2904_v62  ;;  %3290 = vst.msk [vmem:[#allocation3 + $0x30] sm:$0xff] %vm485_vm0, %v8207_v40 }
 0x357   : > { %2170 = vst.msk [vmem:[#allocation3 + $0x58] sm:$0xff] %vm2158_vm4, %v2133_v51  ;;  %2763 = vst.msk [vmem:[#allocation3 + $0x48] sm:$0xff] %vm2158_vm4, %v2725_v50  ;;  %6823 = vmatmul.mubr.msk.bf16.gmra.mrb[28].mxu1 %vm2332_vm6, %v2905_v53  ;;  %v3559_v53 = vld [vmem:[#allocation3 + $0x18] sm:$0xff]  ;;  %v3561_v50 = vld [vmem:[#allocation3 + $0x28] sm:$0xff] }
 0x358   : > { %2298 = vst.msk [vmem:[#allocation3 + $0x50] sm:$0xff] %vm2287_vm5, %v2260_v0 }
 0x359   : > { %v2262_v45 = vpop.permute.xlu1 %2261  ;;  %v2723_v59 = vpop.permute.xlu0 %2722 }
 0x35a   : > { %2299 = vst.msk [vmem:[#allocation3 + $0x58] sm:$0xff] %vm2287_vm5, %v2262_v45 }
 0x35b   : > { %2762 = vst.msk [vmem:[#allocation3 + $0x40] sm:$0xff] %vm2158_vm4, %v2723_v59 }
 0x35d   : > { %v2853_v63 = vpop.permute.xlu1 %2852  ;;  %v2135_v1 = vpop.permute.xlu0 %2134 }
 0x35e   : > { %2891 = vst.msk [vmem:[#allocation3 + $0x48] sm:$0xff] %vm2287_vm5, %v2853_v63 }
 0x35f   : > { %v2314_v58 = vld [vmem:[#allocation3 + $0x50] sm:$0xff]  ;;  %2171 = vst.msk [vmem:[#allocation3 + $0x60] sm:$0xff] %vm2158_vm4, %v2135_v1 }
 0x360   : > { %6794 = vmatprep.mubr.msk.bf16.mxu0 %vm2332_vm6, %v2314_v58  ;;  %2636 = vst.msk [vmem:[#allocation3 + $0x50] sm:$0xff] %vm485_vm0, %v8239_v61 }
 0x361   : > { %v2137_v40 = vpop.permute.xlu1 %2136  ;;  %v2264_v4 = vpop.permute.xlu0 %2263  ;;  %v2315_v5 = vld [vmem:[#allocation3 + $0x58] sm:$0xff] }
 0x362   : > { %2172 = vst.msk [vmem:[#allocation3 + $0x68] sm:$0xff] %vm2158_vm4, %v2137_v40  ;;  %6795 = vmatmul.mubr.msk.bf16.gmra.mrb[36].mxu0 %vm2332_vm6, %v2315_v5  ;;  %v3267_v5 = vld [vmem:[#allocation2 + $0x1a0] sm:$0xff] }
 0x363   : > { %2300 = vst.msk [vmem:[#allocation3 + $0x60] sm:$0xff] %vm2287_vm5, %v2264_v4 }
 0x364   : > { %2637 = vst.msk [vmem:[#allocation3 + $0x58] sm:$0xff] %vm485_vm0, %v8249_v6 }
 0x365   : > { %v2266_v2 = vpop.permute.xlu1 %2265  ;;  %v2851_v3 = vpop.permute.xlu0 %2850  ;;  %v2907_v7 = vld [vmem:[#allocation3 + $0x48] sm:$0xff] }
 0x366   : > { %2301 = vst.msk [vmem:[#allocation3 + $0x68] sm:$0xff] %vm2287_vm5, %v2266_v2  ;;  %2890 = vst.msk [vmem:[#allocation3 + $0x40] sm:$0xff] %vm2287_vm5, %v2851_v3 }
 0x367   : > { %3293 = vst.msk [vmem:[#allocation3 + $0x48] sm:$0xff] %vm485_vm0, %v8239_v61  ;;  %v4291_v61 = vpack.c.bf16 %v4260_v11, %v4259_v18 }
 0x369   : > { %v2139_v8 = vpop.permute.xlu1 %2138  ;;  %v2268_v10 = vpop.permute.xlu0 %2267  ;;  %4323 = vrot.lane.b32.xlu0 %v4291_v61, %s7493_s2 }
 0x36a   : > { %v2316_v16 = vld [vmem:[#allocation3 + $0x60] sm:$0xff]  ;;  %2173 = vst.msk [vmem:[#allocation3 + $0x70] sm:$0xff] %vm2158_vm4, %v2139_v8 }
 0x36b   : > { %6798 = vmatprep.mubr.msk.bf16.mxu0 %vm2332_vm6, %v2316_v16  ;;  %2638 = vst.msk [vmem:[#allocation3 + $0x60] sm:$0xff] %vm485_vm0, %v8258_v15 }
 0x36c   : > { %2302 = vst.msk [vmem:[#allocation3 + $0x70] sm:$0xff] %vm2287_vm5, %v2268_v10 }
 0x36d   : > { %v2141_v17 = vpop.permute.xlu1 %2140  ;;  %v3377_v19 = vpop.permute.xlu0 %3376  ;;  %v2317_v14 = vld [vmem:[#allocation3 + $0x68] sm:$0xff]  ;;  %v2906_v20 = vld [vmem:[#allocation3 + $0x40] sm:$0xff] }
 0x36e   : > { %2174 = vst.msk [vmem:[#allocation3 + $0x78] sm:$0xff] %vm2158_vm4, %v2141_v17  ;;  %3418 = vst.msk [vmem:[#allocation3 + $0x30] sm:$0xff] %vm2158_vm4, %v3377_v19  ;;  %6799 = vmatmul.mubr.msk.bf16.gmra.mrb[40].mxu0 %vm2332_vm6, %v2317_v14  ;;  %6826 = vmatprep.mubr.msk.bf16.mxu1 %vm2332_vm6, %v2906_v20 }
 0x36f   : > { %3292 = vst.msk [vmem:[#allocation3 + $0x40] sm:$0xff] %vm485_vm0, %v8227_v52  ;;  %2639 = vst.msk [vmem:[#allocation3 + $0x68] sm:$0xff] %vm485_vm0, %v8267_v22  ;;  %6827 = vmatmul.mubr.msk.bf16.gmra.mrb[32].mxu1 %vm2332_vm6, %v2907_v7 }
 0x371   : > { %v2270_v21 = vpop.permute.xlu1 %2269  ;;  %v3505_v23 = vpop.permute.xlu0 %3504 }
 0x372   : > { %2303 = vst.msk [vmem:[#allocation3 + $0x78] sm:$0xff] %vm2287_vm5, %v2270_v21  ;;  %3546 = vst.msk [vmem:[#allocation3 + $0x30] sm:$0xff] %vm2287_vm5, %v3505_v23 }
 0x373   : > { %v2318_v27 = vld [vmem:[#allocation3 + $0x70] sm:$0xff] }
 0x374   : > { %6802 = vmatprep.mubr.msk.bf16.mxu0 %vm2332_vm6, %v2318_v27  ;;  %2640 = vst.msk [vmem:[#allocation3 + $0x70] sm:$0xff] %vm485_vm0, %v8274_v25 }
 0x375   : > { %v3379_v52 = vpop.permute.xlu1 %3378  ;;  %v2727_v28 = vpop.permute.xlu0 %2726 }
 0x376   : > { %3419 = vst.msk [vmem:[#allocation3 + $0x38] sm:$0xff] %vm2158_vm4, %v3379_v52  ;;  %2764 = vst.msk [vmem:[#allocation3 + $0x50] sm:$0xff] %vm2158_vm4, %v2727_v28 }
 0x379   : > { %v3507_v31 = vpop.permute.xlu1 %3506  ;;  %v2855_v33 = vpop.permute.xlu0 %2854  ;;  %v2319_v32 = vld [vmem:[#allocation3 + $0x78] sm:$0xff] }
 0x37a   : > { %3547 = vst.msk [vmem:[#allocation3 + $0x38] sm:$0xff] %vm2287_vm5, %v3507_v31  ;;  %2892 = vst.msk [vmem:[#allocation3 + $0x50] sm:$0xff] %vm2287_vm5, %v2855_v33  ;;  %6803 = vmatmul.mubr.msk.bf16.gmra.mrb[44].mxu0 %vm2332_vm6, %v2319_v32 }
 0x37b   : > { %2641 = vst.msk [vmem:[#allocation3 + $0x78] sm:$0xff] %vm485_vm0, %v8574_v24  ;;  %6846 = vmatprep.mubr.msk.bf16.mxu0 %vm2332_vm6, %v3556_v36 }
 0x37d   : > { %v2729_v38 = vpop.permute.xlu1 %2728  ;;  %v3381_v39 = vpop.permute.xlu0 %3380 }
 0x37e   : > { %2765 = vst.msk [vmem:[#allocation3 + $0x58] sm:$0xff] %vm2158_vm4, %v2729_v38  ;;  %3420 = vst.msk [vmem:[#allocation3 + $0x40] sm:$0xff] %vm2158_vm4, %v3381_v39 }
 0x381   : > { %v2857_v43 = vpop.permute.xlu1 %2856  ;;  %v3509_v46 = vpop.permute.xlu0 %3508  ;;  %v2908_v47 = vld [vmem:[#allocation3 + $0x50] sm:$0xff]  ;;  %v3563_v45 = vld [vmem:[#allocation3 + $0x38] sm:$0xff] }
 0x382   : > { %2893 = vst.msk [vmem:[#allocation3 + $0x58] sm:$0xff] %vm2287_vm5, %v2857_v43  ;;  %3548 = vst.msk [vmem:[#allocation3 + $0x40] sm:$0xff] %vm2287_vm5, %v3509_v46  ;;  %6830 = vmatprep.mubr.msk.bf16.mxu1 %vm2332_vm6, %v2908_v47  ;;  %6847 = vmatmul.mubr.msk.bf16.vlgmr.msra.gmra.mrb[48].mxu0 %vm2332_vm6, %v3557_v48 }
 0x383   : > { %3294 = vst.msk [vmem:[#allocation3 + $0x50] sm:$0xff] %vm485_vm0, %v8249_v6  ;;  %6850 = vmatprep.mubr.msk.bf16.mxu0 %vm2332_vm6, %v3558_v37  ;;  %v3560_v6 = vld [vmem:[#allocation3 + $0x20] sm:$0xff]  ;;  %v4068_v37 = vld [vmem:[#allocation2 + $0x8] sm:$0xff] }
 0x385   : > { %v3383_v41 = vpop.permute.xlu1 %3382  ;;  %v2731_v34 = vpop.permute.xlu0 %2730 }
 0x386   : > { %3421 = vst.msk [vmem:[#allocation3 + $0x48] sm:$0xff] %vm2158_vm4, %v3383_v41  ;;  %2766 = vst.msk [vmem:[#allocation3 + $0x60] sm:$0xff] %vm2158_vm4, %v2731_v34  ;;  %v4067_v34 = vld [vmem:[#allocation2] sm:$0xff] }
 0x389   : > { %v3511_v42 = vpop.permute.xlu1 %3510  ;;  %v2859_v26 = vpop.permute.xlu0 %2858  ;;  %v2909_v49 = vld [vmem:[#allocation3 + $0x58] sm:$0xff] }
 0x38a   : > { %3549 = vst.msk [vmem:[#allocation3 + $0x48] sm:$0xff] %vm2287_vm5, %v3511_v42  ;;  %2894 = vst.msk [vmem:[#allocation3 + $0x60] sm:$0xff] %vm2287_vm5, %v2859_v26  ;;  %6831 = vmatmul.mubr.msk.bf16.gmra.mrb[36].mxu1 %vm2332_vm6, %v2909_v49  ;;  %6851 = vmatmul.mubr.msk.bf16.gmra.mrb[52].mxu0 %vm2332_vm6, %v3559_v53  ;;  %v4099_v42 = vpack.c.bf16 %v4068_v37, %v4067_v34 }
 0x38b   : > { %3295 = vst.msk [vmem:[#allocation3 + $0x58] sm:$0xff] %vm485_vm0, %v8258_v15  ;;  %6854 = vmatprep.mubr.msk.bf16.mxu0 %vm2332_vm6, %v3560_v6  ;;  %v3562_v15 = vld [vmem:[#allocation3 + $0x30] sm:$0xff] }
 0x38c   : > { %4115 = vst.msk [vmem:[#allocation3] sm:$0xff] %vm485_vm0, %v4099_v42 }
 0x38d   : > { %v2733_v44 = vpop.permute.xlu1 %2732  ;;  %v3385_v54 = vpop.permute.xlu0 %3384 }
 0x38e   : > { %2767 = vst.msk [vmem:[#allocation3 + $0x68] sm:$0xff] %vm2158_vm4, %v2733_v44  ;;  %3422 = vst.msk [vmem:[#allocation3 + $0x50] sm:$0xff] %vm2158_vm4, %v3385_v54 }
 0x391   : > { %v2861_v35 = vpop.permute.xlu1 %2860  ;;  %v3513_v55 = vpop.permute.xlu0 %3512  ;;  %v2910_v56 = vld [vmem:[#allocation3 + $0x60] sm:$0xff]  ;;  %v3565_v40 = vld [vmem:[#allocation3 + $0x48] sm:$0xff] }
 0x392   : > { %2895 = vst.msk [vmem:[#allocation3 + $0x68] sm:$0xff] %vm2287_vm5, %v2861_v35  ;;  %3550 = vst.msk [vmem:[#allocation3 + $0x50] sm:$0xff] %vm2287_vm5, %v3513_v55  ;;  %6834 = vmatprep.mubr.msk.bf16.mxu1 %vm2332_vm6, %v2910_v56  ;;  %6855 = vmatmul.mubr.msk.bf16.gmra.mrb[56].mxu0 %vm2332_vm6, %v3561_v50 }
 0x393   : > { %3296 = vst.msk [vmem:[#allocation3 + $0x60] sm:$0xff] %vm485_vm0, %v8267_v22  ;;  %6858 = vmatprep.mubr.msk.bf16.mxu0 %vm2332_vm6, %v3562_v15  ;;  %v3564_v22 = vld [vmem:[#allocation3 + $0x40] sm:$0xff] }
 0x395   : > { %v3387_v60 = vpop.permute.xlu1 %3386  ;;  %v3389_v57 = vpop.permute.xlu0 %3388 }
 0x396   : > { %3423 = vst.msk [vmem:[#allocation3 + $0x58] sm:$0xff] %vm2158_vm4, %v3387_v60  ;;  %3424 = vst.msk [vmem:[#allocation3 + $0x60] sm:$0xff] %vm2158_vm4, %v3389_v57 }
 0x399   : > { %v3515_v51 = vpop.permute.xlu1 %3514  ;;  %v2735_v0 = vpop.permute.xlu0 %2734  ;;  %v2911_v62 = vld [vmem:[#allocation3 + $0x68] sm:$0xff]  ;;  %v3566_v4 = vld [vmem:[#allocation3 + $0x50] sm:$0xff] }
 0x39a   : > { %3551 = vst.msk [vmem:[#allocation3 + $0x58] sm:$0xff] %vm2287_vm5, %v3515_v51  ;;  %6835 = vmatmul.mubr.msk.bf16.gmra.mrb[40].mxu1 %vm2332_vm6, %v2911_v62  ;;  %6859 = vmatmul.mubr.msk.bf16.gmra.mrb[60].mxu0 %vm2332_vm6, %v3563_v45 }
 0x39b   : > { %2768 = vst.msk [vmem:[#allocation3 + $0x70] sm:$0xff] %vm2158_vm4, %v2735_v0  ;;  %6862 = vmatprep.mubr.msk.bf16.mxu0 %vm2332_vm6, %v3564_v22 }
 0x39c   : > { %3297 = vst.msk [vmem:[#allocation3 + $0x68] sm:$0xff] %vm485_vm0, %v8274_v25  ;;  %v3266_v25 = vld [vmem:[#allocation2 + $0x198] sm:$0xff] }
 0x39d   : > { %v2737_v59 = vpop.permute.xlu1 %2736  ;;  %v2863_v63 = vpop.permute.xlu0 %2862  ;;  %v3283_v9 = vpack.c.bf16 %v3267_v5, %v3266_v25 }
 0x39e   : > { %2769 = vst.msk [vmem:[#allocation3 + $0x78] sm:$0xff] %vm2158_vm4, %v2737_v59 }
 0x39f   : > { %2896 = vst.msk [vmem:[#allocation3 + $0x70] sm:$0xff] %vm2287_vm5, %v2863_v63 }
 0x3a1   : > { %v2865_v1 = vpop.permute.xlu1 %2864  ;;  %v3517_v58 = vpop.permute.xlu0 %3516  ;;  %v3567_v11 = vld [vmem:[#allocation3 + $0x58] sm:$0xff] }
 0x3a2   : > { %2897 = vst.msk [vmem:[#allocation3 + $0x78] sm:$0xff] %vm2287_vm5, %v2865_v1  ;;  %3552 = vst.msk [vmem:[#allocation3 + $0x60] sm:$0xff] %vm2287_vm5, %v3517_v58  ;;  %6863 = vmatmul.mubr.msk.bf16.gmra.mrb[64].mxu0 %vm2332_vm6, %v3565_v40 }
 0x3a3   : > { %6866 = vmatprep.mubr.msk.bf16.mxu0 %vm2332_vm6, %v3566_v4 }
 0x3a5   : > { %v3391_v2 = vpop.permute.xlu1 %3390  ;;  %v3393_v7 = vpop.permute.xlu0 %3392 }
 0x3a6   : > { %v2912_v3 = vld [vmem:[#allocation3 + $0x70] sm:$0xff]  ;;  %3425 = vst.msk [vmem:[#allocation3 + $0x68] sm:$0xff] %vm2158_vm4, %v3391_v2 }
 0x3a7   : > { %3298 = vst.msk [vmem:[#allocation3 + $0x70] sm:$0xff] %vm485_vm0, %v8574_v24  ;;  %6838 = vmatprep.mubr.msk.bf16.mxu1 %vm2332_vm6, %v2912_v3 }
 0x3a8   : > { %3426 = vst.msk [vmem:[#allocation3 + $0x70] sm:$0xff] %vm2158_vm4, %v3393_v7 }
 0x3a9   : > { %v3519_v12 = vpop.permute.xlu1 %3518  ;;  %v3521_v13 = vpop.permute.xlu0 %3520  ;;  %v2913_v18 = vld [vmem:[#allocation3 + $0x78] sm:$0xff]  ;;  %v3568_v8 = vld [vmem:[#allocation3 + $0x60] sm:$0xff] }
 0x3aa   : > { %3553 = vst.msk [vmem:[#allocation3 + $0x68] sm:$0xff] %vm2287_vm5, %v3519_v12  ;;  %3554 = vst.msk [vmem:[#allocation3 + $0x70] sm:$0xff] %vm2287_vm5, %v3521_v13  ;;  %6839 = vmatmul.mubr.msk.bf16.gmra.mrb[44].mxu1 %vm2332_vm6, %v2913_v18  ;;  %6867 = vmatmul.mubr.msk.bf16.gmra.mrb[68].mxu0 %vm2332_vm6, %v3567_v11 }
 0x3ab   : > { %3299 = vst.msk [vmem:[#allocation3 + $0x78] sm:$0xff] %vm485_vm0, %v3283_v9  ;;  %6870 = vmatprep.mubr.msk.bf16.mxu0 %vm2332_vm6, %v3568_v8 }
 0x3ad   : > { %v3395_v10 = vpop.permute.xlu1 %3394  ;;  %v4196_v41 = vpop.permute.xlu0 %4195 }
 0x3ae   : > { %3427 = vst.msk [vmem:[#allocation3 + $0x78] sm:$0xff] %vm2158_vm4, %v3395_v10  ;;  %4243 = vst.msk [vmem:[#allocation3] sm:$0xff] %vm2158_vm4, %v4196_v41 }
 0x3b1   : > { %v3523_v16 = vpop.permute.xlu1 %3522  ;;  %v3569_v61 = vld [vmem:[#allocation3 + $0x68] sm:$0xff]  ;;  %v3570_v17 = vld [vmem:[#allocation3 + $0x70] sm:$0xff] }
 0x3b2   : > { %3555 = vst.msk [vmem:[#allocation3 + $0x78] sm:$0xff] %vm2287_vm5, %v3523_v16  ;;  %6871 = vmatmul.mubr.msk.bf16.gmra.mrb[72].mxu0 %vm2332_vm6, %v3569_v61 }
 0x3b3   : > { %6874 = vmatprep.mubr.msk.bf16.mxu0 %vm2332_vm6, %v3570_v17 }
 0x3b9   : > { %v3571_v19 = vld [vmem:[#allocation3 + $0x78] sm:$0xff] }
 0x3ba   : > { %6875 = vmatmul.mubr.msk.bf16.gmra.mrb[76].mxu0 %vm2332_vm6, %v3571_v19 }
 0x3d5   : > { %v6776_v14 = vpop.f32.mrb[16].mxu0 }
 0x3d6   : > { %2548 = vst.msk [vmem:[#allocation4 + $0x10] sm:$0xff] %vm485_vm0, %v6776_v14  ;;  %v2419_v20 = vpop.f32.mrb[17].mxu0 }
 0x3d7   : > { %2546 = vst.msk [vmem:[#allocation4] sm:$0xff] %vm485_vm0, %v2419_v20  ;;  %v6777_v21 = vpop.f32.mrb[18].mxu0 }
 0x3d8   : > { %2549 = vst.msk [vmem:[#allocation4 + $0x18] sm:$0xff] %vm485_vm0, %v6777_v21  ;;  %v2422_v23 = vpop.f32.mrb[19].mxu0 }
 0x3d9   : > { %2547 = vst.msk [vmem:[#allocation4 + $0x8] sm:$0xff] %vm485_vm0, %v2422_v23 }
 0x3db   : > { %v4324_v26 = vpop.permute.xlu0 %4323 }
 0x3dc   : > { %4371 = vst.msk [vmem:[#allocation3] sm:$0xff] %vm2287_vm5, %v4324_v26 }
 0x3dd   : > { %v3141_v28 = vld [vmem:[#allocation4 + $0x10] sm:$0xff] }
 0x3de   : > { %v3139_v31 = vld [vmem:[#allocation4] sm:$0xff] }
 0x3df   : > { %v3142_v38 = vld [vmem:[#allocation4 + $0x18] sm:$0xff] }
 0x3e0   : > { %v3140_v47 = vld [vmem:[#allocation4 + $0x8] sm:$0xff] }
 0x3e1   : > { %v6780_v27 = vpop.f32.mrb[20].mxu0  ;;  %v6812_v52 = vpop.f32.mrb[16].mxu1 }
 0x3e2   : > { %2552 = vst.msk [vmem:[#allocation4 + $0x30] sm:$0xff] %vm485_vm0, %v6780_v27  ;;  %v3173_v29 = vadd.f32 %v6812_v52, %v3141_v28  ;;  %v2435_v30 = vpop.f32.mrb[21].mxu0  ;;  %v3012_v24 = vpop.f32.mrb[17].mxu1 }
 0x3e3   : > { %2550 = vst.msk [vmem:[#allocation4 + $0x20] sm:$0xff] %vm485_vm0, %v2435_v30  ;;  %v3171_v33 = vadd.f32 %v3139_v31, %v3012_v24  ;;  %v6781_v32 = vpop.f32.mrb[22].mxu0  ;;  %v6813_v36 = vpop.f32.mrb[18].mxu1  ;;  %v4387_v49 = vld [vmem:[#allocation3] sm:$0xff] }
 0x3e4   : > { %3205 = vst.msk [vmem:[#allocation4 + $0x10] sm:$0xff] %vm485_vm0, %v3173_v29  ;;  %2553 = vst.msk [vmem:[#allocation4 + $0x38] sm:$0xff] %vm485_vm0, %v6781_v32  ;;  %v3174_v39 = vadd.f32 %v6813_v36, %v3142_v38  ;;  %v2438_v43 = vpop.f32.mrb[23].mxu0  ;;  %v3015_v46 = vpop.f32.mrb[19].mxu1  ;;  %6882 = vmatprep.mubr.msk.bf16.mxu1 %vm2332_vm6, %v4387_v49 }
 0x3e5   : > { %3203 = vst.msk [vmem:[#allocation4] sm:$0xff] %vm485_vm0, %v3171_v33  ;;  %2551 = vst.msk [vmem:[#allocation4 + $0x28] sm:$0xff] %vm485_vm0, %v2438_v43  ;;  %v3172_v48 = vadd.f32 %v3140_v47, %v3015_v46 }
 0x3e6   : > { %3206 = vst.msk [vmem:[#allocation4 + $0x18] sm:$0xff] %vm485_vm0, %v3174_v39 }
 0x3e7   : > { %3204 = vst.msk [vmem:[#allocation4 + $0x8] sm:$0xff] %vm485_vm0, %v3172_v48 }
 0x3e9   : > { %v3145_v54 = vld [vmem:[#allocation4 + $0x30] sm:$0xff] }
 0x3ea   : > { %v3143_v50 = vld [vmem:[#allocation4 + $0x20] sm:$0xff] }
 0x3eb   : > { %v3146_v51 = vld [vmem:[#allocation4 + $0x38] sm:$0xff] }
 0x3ec   : > { %v3144_v45 = vld [vmem:[#allocation4 + $0x28] sm:$0xff] }
 0x3f9   : > { %v6784_v53 = vpop.f32.mrb[24].mxu0 }
 0x3fa   : > { %2556 = vst.msk [vmem:[#allocation4 + $0x50] sm:$0xff] %vm485_vm0, %v6784_v53  ;;  %v2451_v6 = vpop.f32.mrb[25].mxu0 }
 0x3fb   : > { %2554 = vst.msk [vmem:[#allocation4 + $0x40] sm:$0xff] %vm485_vm0, %v2451_v6  ;;  %v6816_v44 = vpop.f32.mrb[20].mxu1  ;;  %v6785_v35 = vpop.f32.mrb[26].mxu0 }
 0x3fc   : > { %v3177_v55 = vadd.f32 %v6816_v44, %v3145_v54  ;;  %2557 = vst.msk [vmem:[#allocation4 + $0x58] sm:$0xff] %vm485_vm0, %v6785_v35  ;;  %v3028_v56 = vpop.f32.mrb[21].mxu1  ;;  %v2454_v15 = vpop.f32.mrb[27].mxu0 }
 0x3fd   : > { %v3175_v60 = vadd.f32 %v3143_v50, %v3028_v56  ;;  %2555 = vst.msk [vmem:[#allocation4 + $0x48] sm:$0xff] %vm485_vm0, %v2454_v15  ;;  %v6817_v57 = vpop.f32.mrb[22].mxu1 }
 0x3fe   : > { %3209 = vst.msk [vmem:[#allocation4 + $0x30] sm:$0xff] %vm485_vm0, %v3177_v55  ;;  %v3178_v0 = vadd.f32 %v6817_v57, %v3146_v51  ;;  %v3031_v62 = vpop.f32.mrb[23].mxu1 }
 0x3ff   : > { %3207 = vst.msk [vmem:[#allocation4 + $0x20] sm:$0xff] %vm485_vm0, %v3175_v60  ;;  %v3176_v22 = vadd.f32 %v3144_v45, %v3031_v62  ;;  %v3799_v60 = vld [vmem:[#allocation4 + $0x10] sm:$0xff] }
 0x400   : > { %3210 = vst.msk [vmem:[#allocation4 + $0x38] sm:$0xff] %vm485_vm0, %v3178_v0  ;;  %v3797_v0 = vld [vmem:[#allocation4] sm:$0xff] }
 0x401   : > { %3208 = vst.msk [vmem:[#allocation4 + $0x28] sm:$0xff] %vm485_vm0, %v3176_v22  ;;  %v3149_v58 = vld [vmem:[#allocation4 + $0x50] sm:$0xff]  ;;  %v3800_v22 = vld [vmem:[#allocation4 + $0x18] sm:$0xff] }
 0x402   : > { %v3147_v5 = vld [vmem:[#allocation4 + $0x40] sm:$0xff] }
 0x403   : > { %v3150_v9 = vld [vmem:[#allocation4 + $0x58] sm:$0xff] }
 0x404   : > { %v3148_v18 = vld [vmem:[#allocation4 + $0x48] sm:$0xff] }
 0x411   : > { %v6788_v59 = vpop.f32.mrb[28].mxu0 }
 0x412   : > { %2560 = vst.msk [vmem:[#allocation4 + $0x70] sm:$0xff] %vm485_vm0, %v6788_v59  ;;  %v2467_v63 = vpop.f32.mrb[29].mxu0  ;;  %v6820_v1 = vpop.f32.mrb[24].mxu1 }
 0x413   : > { %2558 = vst.msk [vmem:[#allocation4 + $0x60] sm:$0xff] %vm485_vm0, %v2467_v63  ;;  %v3181_v40 = vadd.f32 %v6820_v1, %v3149_v58  ;;  %v6789_v4 = vpop.f32.mrb[30].mxu0  ;;  %v3044_v25 = vpop.f32.mrb[25].mxu1  ;;  %v3798_v1 = vld [vmem:[#allocation4 + $0x8] sm:$0xff] }
 0x414   : > { %2561 = vst.msk [vmem:[#allocation4 + $0x78] sm:$0xff] %vm485_vm0, %v6789_v4  ;;  %v3179_v2 = vadd.f32 %v3147_v5, %v3044_v25  ;;  %v2470_v3 = vpop.f32.mrb[31].mxu0  ;;  %v6821_v7 = vpop.f32.mrb[26].mxu1 }
 0x415   : > { %3213 = vst.msk [vmem:[#allocation4 + $0x50] sm:$0xff] %vm485_vm0, %v3181_v40  ;;  %2559 = vst.msk [vmem:[#allocation4 + $0x68] sm:$0xff] %vm485_vm0, %v2470_v3  ;;  %v3182_v12 = vadd.f32 %v6821_v7, %v3150_v9  ;;  %v3047_v13 = vpop.f32.mrb[27].mxu1  ;;  %v8700_v40 = vld [vmem:[#allocation13] ss:$0 sm:$0xff] }
 0x416   : > { %3211 = vst.msk [vmem:[#allocation4 + $0x40] sm:$0xff] %vm485_vm0, %v3179_v2  ;;  %v3180_v11 = vadd.f32 %v3148_v18, %v3047_v13  ;;  %v3803_v2 = vld [vmem:[#allocation4 + $0x30] sm:$0xff] }
 0x417   : > { %3214 = vst.msk [vmem:[#allocation4 + $0x58] sm:$0xff] %vm485_vm0, %v3182_v12  ;;  %v8702_v3 = vld [vmem:[#allocation14] ss:$0 sm:$0xff] }
 0x418   : > { %3212 = vst.msk [vmem:[#allocation4 + $0x48] sm:$0xff] %vm485_vm0, %v3180_v11  ;;  %v3801_v11 = vld [vmem:[#allocation4 + $0x20] sm:$0xff] }
 0x419   : > { %v3153_v61 = vld [vmem:[#allocation4 + $0x70] sm:$0xff] }
 0x41a   : > { %v3151_v20 = vld [vmem:[#allocation4 + $0x60] sm:$0xff] }
 0x41b   : > { %v3154_v52 = vld [vmem:[#allocation4 + $0x78] sm:$0xff] }
 0x41c   : > { %v3152_v30 = vld [vmem:[#allocation4 + $0x68] sm:$0xff] }
 0x429   : > { %v6792_v8 = vpop.f32.mrb[32].mxu0 }
 0x42a   : > { %2564 = vst.msk [vmem:[#allocation4 + $0x90] sm:$0xff] %vm485_vm0, %v6792_v8  ;;  %v2483_v10 = vpop.f32.mrb[33].mxu0  ;;  %v6824_v16 = vpop.f32.mrb[28].mxu1 }
 0x42b   : > { %2562 = vst.msk [vmem:[#allocation4 + $0x80] sm:$0xff] %vm485_vm0, %v2483_v10  ;;  %v3185_v17 = vadd.f32 %v6824_v16, %v3153_v61  ;;  %v6793_v19 = vpop.f32.mrb[34].mxu0  ;;  %v3060_v14 = vpop.f32.mrb[29].mxu1 }
 0x42c   : > { %2565 = vst.msk [vmem:[#allocation4 + $0x98] sm:$0xff] %vm485_vm0, %v6793_v19  ;;  %v3183_v21 = vadd.f32 %v3151_v20, %v3060_v14  ;;  %v2486_v23 = vpop.f32.mrb[35].mxu0  ;;  %v6825_v27 = vpop.f32.mrb[30].mxu1  ;;  %v3804_v14 = vld [vmem:[#allocation4 + $0x38] sm:$0xff] }
 0x42d   : > { %3217 = vst.msk [vmem:[#allocation4 + $0x70] sm:$0xff] %vm485_vm0, %v3185_v17  ;;  %2563 = vst.msk [vmem:[#allocation4 + $0x88] sm:$0xff] %vm485_vm0, %v2486_v23  ;;  %v3186_v28 = vadd.f32 %v6825_v27, %v3154_v52  ;;  %v3063_v29 = vpop.f32.mrb[31].mxu1 }
 0x42e   : > { %3215 = vst.msk [vmem:[#allocation4 + $0x60] sm:$0xff] %vm485_vm0, %v3183_v21  ;;  %v3184_v24 = vadd.f32 %v3152_v30, %v3063_v29  ;;  %v3802_v30 = vld [vmem:[#allocation4 + $0x28] sm:$0xff] }
 0x42f   : > { %3218 = vst.msk [vmem:[#allocation4 + $0x78] sm:$0xff] %vm485_vm0, %v3186_v28 }
 0x430   : > { %3216 = vst.msk [vmem:[#allocation4 + $0x68] sm:$0xff] %vm485_vm0, %v3184_v24 }
 0x431   : > { %v3157_v46 = vld [vmem:[#allocation4 + $0x90] sm:$0xff] }
 0x432   : > { %v3155_v41 = vld [vmem:[#allocation4 + $0x80] sm:$0xff] }
 0x433   : > { %v3158_v49 = vld [vmem:[#allocation4 + $0x98] sm:$0xff] }
 0x434   : > { %v3156_v44 = vld [vmem:[#allocation4 + $0x88] sm:$0xff] }
 0x435   : > { %v6796_v31 = vpop.f32.mrb[36].mxu0 }
 0x436   : > { %2568 = vst.msk [vmem:[#allocation4 + $0xb0] sm:$0xff] %vm485_vm0, %v6796_v31  ;;  %v2499_v33 = vpop.f32.mrb[37].mxu0 }
 0x437   : > { %2566 = vst.msk [vmem:[#allocation4 + $0xa0] sm:$0xff] %vm485_vm0, %v2499_v33  ;;  %v6797_v32 = vpop.f32.mrb[38].mxu0 }
 0x438   : > { %2569 = vst.msk [vmem:[#allocation4 + $0xb8] sm:$0xff] %vm485_vm0, %v6797_v32  ;;  %v2502_v36 = vpop.f32.mrb[39].mxu0 }
 0x439   : > { %2567 = vst.msk [vmem:[#allocation4 + $0xa8] sm:$0xff] %vm485_vm0, %v2502_v36 }
 0x43d   : > { %v3161_v25 = vld [vmem:[#allocation4 + $0xb0] sm:$0xff] }
 0x43e   : > { %v3159_v13 = vld [vmem:[#allocation4 + $0xa0] sm:$0xff] }
 0x43f   : > { %v3162_v17 = vld [vmem:[#allocation4 + $0xb8] sm:$0xff] }
 0x440   : > { %v3160_v28 = vld [vmem:[#allocation4 + $0xa8] sm:$0xff] }
 0x441   : > { %v6800_v38 = vpop.f32.mrb[40].mxu0 }
 0x442   : > { %2572 = vst.msk [vmem:[#allocation4 + $0xd0] sm:$0xff] %vm485_vm0, %v6800_v38  ;;  %v2515_v39 = vpop.f32.mrb[41].mxu0  ;;  %v6828_v43 = vpop.f32.mrb[32].mxu1 }
 0x443   : > { %2570 = vst.msk [vmem:[#allocation4 + $0xc0] sm:$0xff] %vm485_vm0, %v2515_v39  ;;  %v3189_v47 = vadd.f32 %v6828_v43, %v3157_v46  ;;  %v6801_v48 = vpop.f32.mrb[42].mxu0  ;;  %v3076_v37 = vpop.f32.mrb[33].mxu1 }
 0x444   : > { %2573 = vst.msk [vmem:[#allocation4 + $0xd8] sm:$0xff] %vm485_vm0, %v6801_v48  ;;  %v3187_v34 = vadd.f32 %v3155_v41, %v3076_v37  ;;  %v2518_v42 = vpop.f32.mrb[43].mxu0  ;;  %v6829_v26 = vpop.f32.mrb[34].mxu1 }
 0x445   : > { %3221 = vst.msk [vmem:[#allocation4 + $0x90] sm:$0xff] %vm485_vm0, %v3189_v47  ;;  %2571 = vst.msk [vmem:[#allocation4 + $0xc8] sm:$0xff] %vm485_vm0, %v2518_v42  ;;  %v3190_v53 = vadd.f32 %v6829_v26, %v3158_v49  ;;  %v3079_v6 = vpop.f32.mrb[35].mxu1  ;;  %v3807_v42 = vld [vmem:[#allocation4 + $0x50] sm:$0xff] }
 0x446   : > { %3219 = vst.msk [vmem:[#allocation4 + $0x80] sm:$0xff] %vm485_vm0, %v3187_v34  ;;  %v3188_v54 = vadd.f32 %v3156_v44, %v3079_v6  ;;  %v3805_v6 = vld [vmem:[#allocation4 + $0x40] sm:$0xff] }
 0x447   : > { %3222 = vst.msk [vmem:[#allocation4 + $0x98] sm:$0xff] %vm485_vm0, %v3190_v53 }
 0x448   : > { %3220 = vst.msk [vmem:[#allocation4 + $0x88] sm:$0xff] %vm485_vm0, %v3188_v54 }
 0x44d   : > { %v6804_v35 = vpop.f32.mrb[44].mxu0 }
 0x44e   : > { %2576 = vst.msk [vmem:[#allocation4 + $0xf0] sm:$0xff] %vm485_vm0, %v6804_v35  ;;  %v2531_v55 = vpop.f32.mrb[45].mxu0 }
 0x44f   : > { %2574 = vst.msk [vmem:[#allocation4 + $0xe0] sm:$0xff] %vm485_vm0, %v2531_v55  ;;  %v6805_v56 = vpop.f32.mrb[46].mxu0 }
 0x450   : > { %2577 = vst.msk [vmem:[#allocation4 + $0xf8] sm:$0xff] %vm485_vm0, %v6805_v56  ;;  %v2534_v50 = vpop.f32.mrb[47].mxu0  ;;  %v3808_v56 = vld [vmem:[#allocation4 + $0x58] sm:$0xff] }
 0x451   : > { %2575 = vst.msk [vmem:[#allocation4 + $0xe8] sm:$0xff] %vm485_vm0, %v2534_v50 }
 0x455   : > { %v6848_v15 = vpop.f32.mrb[48].mxu0 }
 0x456   : > { %v3831_v57 = vadd.f32 %v6848_v15, %v3799_v60  ;;  %v3670_v51 = vpop.f32.mrb[49].mxu0 }
 0x457   : > { %v3829_v62 = vadd.f32 %v3797_v0, %v3670_v51  ;;  %v6849_v45 = vpop.f32.mrb[50].mxu0  ;;  %v3806_v51 = vld [vmem:[#allocation4 + $0x48] sm:$0xff] }
 0x458   : > { %3863 = vst.msk [vmem:[#allocation4 + $0x10] sm:$0xff] %vm485_vm0, %v3831_v57  ;;  %v3832_v59 = vadd.f32 %v6849_v45, %v3800_v22  ;;  %v3673_v63 = vpop.f32.mrb[51].mxu0 }
 0x459   : > { %3861 = vst.msk [vmem:[#allocation4] sm:$0xff] %vm485_vm0, %v3829_v62  ;;  %v3830_v58 = vadd.f32 %v3798_v1, %v3673_v63 }
 0x45a   : > { %3864 = vst.msk [vmem:[#allocation4 + $0x18] sm:$0xff] %vm485_vm0, %v3832_v59 }
 0x45b   : > { %3862 = vst.msk [vmem:[#allocation4 + $0x8] sm:$0xff] %vm485_vm0, %v3830_v58 }
 0x45d   : > { %v6832_v4 = vpop.f32.mrb[36].mxu1  ;;  %v6852_v5 = vpop.f32.mrb[52].mxu0 }
 0x45e   : > { %v3193_v7 = vadd.f32 %v6832_v4, %v3161_v25  ;;  %v3835_v9 = vadd.f32 %v6852_v5, %v3803_v2  ;;  %v3092_v12 = vpop.f32.mrb[37].mxu1  ;;  %v3686_v18 = vpop.f32.mrb[53].mxu0  ;;  %v3811_v5 = vld [vmem:[#allocation4 + $0x70] sm:$0xff]  ;;  %v3809_v2 = vld [vmem:[#allocation4 + $0x60] sm:$0xff] }
 0x45f   : > { %v3895_v8 = vld [vmem:[#allocation4 + $0x10] sm:$0xff]  ;;  %v3191_v10 = vadd.f32 %v3159_v13, %v3092_v12  ;;  %v3833_v16 = vadd.f32 %v3801_v11, %v3686_v18  ;;  %v6833_v61 = vpop.f32.mrb[38].mxu1  ;;  %v6853_v19 = vpop.f32.mrb[54].mxu0  ;;  %v3812_v11 = vld [vmem:[#allocation4 + $0x78] sm:$0xff] }
 0x460   : > { %v3934_v20 = vmul.f32 %v8700_v40, %v3895_v8  ;;  %v3893_v21 = vld [vmem:[#allocation4] sm:$0xff]  ;;  %3225 = vst.msk [vmem:[#allocation4 + $0xb0] sm:$0xff] %vm485_vm0, %v3193_v7  ;;  %3867 = vst.msk [vmem:[#allocation4 + $0x30] sm:$0xff] %vm485_vm0, %v3835_v9  ;;  %v3194_v23 = vadd.f32 %v6833_v61, %v3162_v17  ;;  %v3836_v27 = vadd.f32 %v6853_v19, %v3804_v14  ;;  %v3095_v52 = vpop.f32.mrb[39].mxu1  ;;  %v3689_v29 = vpop.f32.mrb[55].mxu0  ;;  %v3165_v13 = vld [vmem:[#allocation4 + $0xd0] sm:$0xff] }
 0x461   : > { %v3932_v24 = vmul.f32 %v8700_v40, %v3893_v21  ;;  %v3896_v31 = vld [vmem:[#allocation4 + $0x18] sm:$0xff]  ;;  %3223 = vst.msk [vmem:[#allocation4 + $0xa0] sm:$0xff] %vm485_vm0, %v3191_v10  ;;  %3865 = vst.msk [vmem:[#allocation4 + $0x20] sm:$0xff] %vm485_vm0, %v3833_v16  ;;  %v3192_v33 = vadd.f32 %v3160_v28, %v3095_v52  ;;  %v3834_v32 = vadd.f32 %v3802_v30, %v3689_v29  ;;  %v3163_v19 = vld [vmem:[#allocation4 + $0xc0] sm:$0xff] }
 0x462   : > { %v3973_v36 = vadd.f32 %v8702_v3, %v3934_v20  ;;  %v3935_v38 = vmul.f32 %v8700_v40, %v3896_v31  ;;  %v3894_v39 = vld [vmem:[#allocation4 + $0x8] sm:$0xff]  ;;  %3226 = vst.msk [vmem:[#allocation4 + $0xb8] sm:$0xff] %vm485_vm0, %v3194_v23  ;;  %3868 = vst.msk [vmem:[#allocation4 + $0x38] sm:$0xff] %vm485_vm0, %v3836_v27  ;;  %v7128_v8 = vld [vmem:[#allocation16] sm:$0xff]  }
 0x463   : > { %v3971_v43 = vadd.f32 %v8702_v3, %v3932_v24  ;;  %v3933_v46 = vmul.f32 %v8700_v40, %v3894_v39  ;;  %3224 = vst.msk [vmem:[#allocation4 + $0xa8] sm:$0xff] %vm485_vm0, %v3192_v33  ;;  %3866 = vst.msk [vmem:[#allocation4 + $0x28] sm:$0xff] %vm485_vm0, %v3834_v32  ;;  %v3166_v20 = vld [vmem:[#allocation4 + $0xd8] sm:$0xff]  ;;  %v3164_v21 = vld [vmem:[#allocation4 + $0xc8] sm:$0xff]  ;;  %6878 = vmatprep.subr.bf16.mxu1 %v7128_v8 }
 0x464   : > { %v4005_v47 = vmax.f32 %v3973_v36, 0.0  ;;  %v3974_v48 = vadd.f32 %v8702_v3, %v3935_v38  ;;  %v3810_v23 = vld [vmem:[#allocation4 + $0x68] sm:$0xff]  ;;  %6879 = vmatpush3.bf16.msra.mxu1 %v7128_v8 }
 0x465   : > { %v4003_v37 = vmax.f32 %v3971_v43, 0.0  ;;  %v3972_v41 = vadd.f32 %v8702_v3, %v3933_v46  ;;  %v6856_v34 = vpop.f32.mrb[56].mxu0 }
 0x466   : > { %4037 = vst.msk [vmem:[#allocation2 + $0x31] sm:$0xff] %vm485_vm0, %v4005_v47  ;;  %v4006_v26 = vmax.f32 %v3974_v48, 0.0  ;;  %v3839_v49 = vadd.f32 %v6856_v34, %v3807_v42  ;;  %v3702_v53 = vpop.f32.mrb[57].mxu0 }
 0x467   : > { %4035 = vst.msk [vmem:[#allocation2 + $0x19] sm:$0xff] %vm485_vm0, %v4003_v37  ;;  %v4004_v44 = vmax.f32 %v3972_v41, 0.0  ;;  %v3899_v54 = vld [vmem:[#allocation4 + $0x30] sm:$0xff]  ;;  %v3837_v35 = vadd.f32 %v3805_v6, %v3702_v53  ;;  %v6857_v55 = vpop.f32.mrb[58].mxu0 }
 0x468   : > { %4038 = vst.msk [vmem:[#allocation2 + $0x39] sm:$0xff] %vm485_vm0, %v4006_v26  ;;  %v3938_v50 = vmul.f32 %v8700_v40, %v3899_v54  ;;  %v3897_v15 = vld [vmem:[#allocation4 + $0x20] sm:$0xff]  ;;  %3871 = vst.msk [vmem:[#allocation4 + $0x50] sm:$0xff] %vm485_vm0, %v3839_v49  ;;  %v3840_v60 = vadd.f32 %v6857_v55, %v3808_v56  ;;  %v3705_v57 = vpop.f32.mrb[59].mxu0 }
 0x469   : > { %4036 = vst.msk [vmem:[#allocation2 + $0x21] sm:$0xff] %vm485_vm0, %v4004_v44  ;;  %v3936_v0 = vmul.f32 %v8700_v40, %v3897_v15  ;;  %v3900_v62 = vld [vmem:[#allocation4 + $0x38] sm:$0xff]  ;;  %3869 = vst.msk [vmem:[#allocation4 + $0x40] sm:$0xff] %vm485_vm0, %v3837_v35  ;;  %v3838_v45 = vadd.f32 %v3806_v51, %v3705_v57 }
 0x46a   : > { %v3977_v22 = vadd.f32 %v8702_v3, %v3938_v50  ;;  %v3939_v59 = vmul.f32 %v8700_v40, %v3900_v62  ;;  %v3898_v63 = vld [vmem:[#allocation4 + $0x28] sm:$0xff]  ;;  %3872 = vst.msk [vmem:[#allocation4 + $0x58] sm:$0xff] %vm485_vm0, %v3840_v60 }
 0x46b   : > { %v3975_v1 = vadd.f32 %v8702_v3, %v3936_v0  ;;  %v3937_v58 = vmul.f32 %v8700_v40, %v3898_v63  ;;  %3870 = vst.msk [vmem:[#allocation4 + $0x48] sm:$0xff] %vm485_vm0, %v3838_v45  ;;  %v7129_v0 = vld [vmem:[#allocation16 + $0x8] ss:$0 sps:$4 sm:$0xff]  }
 0x46c   : > { %v4009_v4 = vmax.f32 %v3977_v22, 0.0  ;;  %v3978_v25 = vadd.f32 %v8702_v3, %v3939_v59  ;;  %6989 = vmatprep.subr.msk.bf16.mxu1 %vm2381_vm8, %v7129_v0 }
 0x46d   : > { %v4007_v7 = vmax.f32 %v3975_v1, 0.0  ;;  %v3976_v9 = vadd.f32 %v8702_v3, %v3937_v58  ;;  %v6836_v12 = vpop.f32.mrb[40].mxu1  ;;  %v6860_v18 = vpop.f32.mrb[60].mxu0  ;;  %v4725_v31 = vld [vmem:[#allocation2 + $0x31] sm:$0xff] }
 0x46e   : > { %4041 = vst.msk [vmem:[#allocation2 + $0x61] sm:$0xff] %vm485_vm0, %v4009_v4  ;;  %v4010_v10 = vmax.f32 %v3978_v25, 0.0  ;;  %v3197_v16 = vadd.f32 %v6836_v12, %v3165_v13  ;;  %v3843_v61 = vadd.f32 %v6860_v18, %v3811_v5  ;;  %v3108_v17 = vpop.f32.mrb[41].mxu1  ;;  %v3718_v14 = vpop.f32.mrb[61].mxu0  ;;  %v4071_v53 = vld [vmem:[#allocation2 + $0x30] sm:$0xff]  ;;  %v4133_v60 = vld [vmem:[#allocation2 + $0x19] sm:$0xff] }
 0x46f   : > { %4039 = vst.msk [vmem:[#allocation2 + $0x49] sm:$0xff] %vm485_vm0, %v4007_v7  ;;  %v4008_v27 = vmax.f32 %v3976_v9, 0.0  ;;  %v3903_v52 = vld [vmem:[#allocation4 + $0x50] sm:$0xff]  ;;  %v3195_v28 = vadd.f32 %v3163_v19, %v3108_v17  ;;  %v3841_v29 = vadd.f32 %v3809_v2, %v3718_v14  ;;  %v6837_v30 = vpop.f32.mrb[42].mxu1  ;;  %v6861_v24 = vpop.f32.mrb[62].mxu0  ;;  %v4263_v48 = vld [vmem:[#allocation2 + $0x32] sm:$0xff] }
 0x470   : > { %v4726_v33 = vld [vmem:[#allocation2 + $0x39] sm:$0xff]  ;;  %4042 = vst.msk [vmem:[#allocation2 + $0x69] sm:$0xff] %vm485_vm0, %v4010_v10  ;;  %v3942_v32 = vmul.f32 %v8700_v40, %v3903_v52  ;;  %v3901_v36 = vld [vmem:[#allocation4 + $0x40] sm:$0xff]  ;;  %3229 = vst.msk [vmem:[#allocation4 + $0xd0] sm:$0xff] %vm485_vm0, %v3197_v16  ;;  %v3198_v38 = vadd.f32 %v6837_v30, %v3166_v20  ;;  %v3844_v39 = vadd.f32 %v6861_v24, %v3812_v11  ;;  %v3111_v43 = vpop.f32.mrb[43].mxu1  ;;  %v3721_v46 = vpop.f32.mrb[63].mxu0 }
 0x471   : > { %3875 = vst.msk [vmem:[#allocation4 + $0x70] sm:$0xff] %vm485_vm0, %v3843_v61  ;;  %v8742_v47 = vpack.c.bf16 %v4726_v33, %v4725_v31  ;;  %v4264_v37 = vld [vmem:[#allocation2 + $0x3a] sm:$0xff]  ;;  %4040 = vst.msk [vmem:[#allocation2 + $0x51] sm:$0xff] %vm485_vm0, %v4008_v27  ;;  %v3940_v41 = vmul.f32 %v8700_v40, %v3901_v36  ;;  %v3904_v34 = vld [vmem:[#allocation4 + $0x58] sm:$0xff]  ;;  %v3196_v42 = vadd.f32 %v3164_v21, %v3111_v43  ;;  %v4464_v2 = vsel %vm2381_vm8, %v7129_v0, 0 }
 0x472   : > { %3227 = vst.msk [vmem:[#allocation4 + $0xc0] sm:$0xff] %vm485_vm0, %v3195_v28  ;;  %3873 = vst.msk [vmem:[#allocation4 + $0x60] sm:$0xff] %vm485_vm0, %v3841_v29  ;;  %v3842_v26 = vadd.f32 %v3810_v23, %v3721_v46  ;;  %v4134_v49 = vld [vmem:[#allocation2 + $0x21] sm:$0xff]  ;;  %v3981_v6 = vadd.f32 %v8702_v3, %v3942_v32  ;;  %v3943_v44 = vmul.f32 %v8700_v40, %v3904_v34  ;;  %v3902_v54 = vld [vmem:[#allocation4 + $0x48] sm:$0xff]  ;;  %6881 = vmatpush3.bf16.msra.mxu1 %v4464_v2 }
 0x473   : > { %3230 = vst.msk [vmem:[#allocation4 + $0xd8] sm:$0xff] %vm485_vm0, %v3198_v38  ;;  %3876 = vst.msk [vmem:[#allocation4 + $0x78] sm:$0xff] %vm485_vm0, %v3844_v39  ;;  %4789 = vrot.lane.b32.xlu1 %v8742_v47, %s7492_s13  ;;  %4199 = vrot.lane.b32.xlu0 %v8742_v47, %s7492_s13  ;;  %v4072_v35 = vld [vmem:[#allocation2 + $0x38] sm:$0xff]  ;;  %v4070_v55 = vld [vmem:[#allocation2 + $0x20] sm:$0xff]  ;;  %v3979_v56 = vadd.f32 %v8702_v3, %v3940_v41  ;;  %v3941_v50 = vmul.f32 %v8700_v40, %v3902_v54 }
 0x474   : > { %3228 = vst.msk [vmem:[#allocation4 + $0xc8] sm:$0xff] %vm485_vm0, %v3196_v42  ;;  %3874 = vst.msk [vmem:[#allocation4 + $0x68] sm:$0xff] %vm485_vm0, %v3842_v26  ;;  %v8760_v15 = vpack.c.bf16 %v4264_v37, %v4263_v48  ;;  %v8762_v57 = vpack.c.bf16 %v4072_v35, %v4071_v53  ;;  %v4069_v51 = vld [vmem:[#allocation2 + $0x18] sm:$0xff]  ;;  %v4013_v62 = vmax.f32 %v3981_v6, 0.0  ;;  %v3982_v45 = vadd.f32 %v8702_v3, %v3943_v44  ;;  %v3815_v4 = vld [vmem:[#allocation4 + $0x90] sm:$0xff] }
 0x475   : > { %v8765_v22 = vpack.c.bf16 %v4134_v49, %v4133_v60  ;;  %v4100_v59 = vpack.c.bf16 %v4070_v55, %v4069_v51  ;;  %v4011_v63 = vmax.f32 %v3979_v56, 0.0  ;;  %v3980_v1 = vadd.f32 %v8702_v3, %v3941_v50  ;;  %v6864_v58 = vpop.f32.mrb[64].mxu0  ;;  %v4261_v25 = vld [vmem:[#allocation2 + $0x1a] sm:$0xff]  ;;  %v4262_v5 = vld [vmem:[#allocation2 + $0x22] sm:$0xff]  ;;  %v3813_v13 = vld [vmem:[#allocation4 + $0x80] sm:$0xff] }
 0x476   : > { %4117 = vst.msk [vmem:[#allocation3 + $0x10] sm:$0xff] %vm485_vm0, %v8762_v57  ;;  %4045 = vst.msk [vmem:[#allocation2 + $0x91] sm:$0xff] %vm485_vm0, %v4013_v62  ;;  %v4014_v7 = vmax.f32 %v3982_v45, 0.0  ;;  %v3847_v9 = vadd.f32 %v6864_v58, %v3815_v4  ;;  %v3734_v12 = vpop.f32.mrb[65].mxu0  ;;  %v3816_v16 = vld [vmem:[#allocation4 + $0x98] sm:$0xff]  ;;  %v3814_v20 = vld [vmem:[#allocation4 + $0x88] sm:$0xff]  ;;  %v8783_v21 = vpack.c.bf16 %v4262_v5, %v4261_v25 }
 0x477   : > { %4327 = vrot.lane.b32.xlu0 %v8760_v15, %s7493_s2  ;;  %4197 = vrot.lane.b32.xlu1 %v8765_v22, %s7492_s13  ;;  %4116 = vst.msk [vmem:[#allocation3 + $0x8] sm:$0xff] %vm485_vm0, %v4100_v59  ;;  %4707 = vst.msk [vmem:[#allocation3] sm:$0xff] %vm485_vm0, %v4100_v59  ;;  %v4012_v18 = vmax.f32 %v3980_v1, 0.0  ;;  %v3845_v8 = vadd.f32 %v3813_v13, %v3734_v12  ;;  %v6865_v10 = vpop.f32.mrb[66].mxu0  ;;  %v4730_v28 = vld [vmem:[#allocation2 + $0x69] sm:$0xff]  ;;  %v3169_v32 = vld [vmem:[#allocation4 + $0xf0] sm:$0xff] }
 0x478   : > { %4043 = vst.msk [vmem:[#allocation2 + $0x79] sm:$0xff] %vm485_vm0, %v4011_v63  ;;  %v3907_v11 = vld [vmem:[#allocation4 + $0x70] sm:$0xff]  ;;  %4046 = vst.msk [vmem:[#allocation2 + $0x99] sm:$0xff] %vm485_vm0, %v4014_v7  ;;  %v3848_v19 = vadd.f32 %v6865_v10, %v3816_v16  ;;  %v3737_v14 = vpop.f32.mrb[67].mxu0  ;;  %v4073_v38 = vld [vmem:[#allocation2 + $0x48] sm:$0xff] }
 0x479   : > { %v3946_v61 = vmul.f32 %v8700_v40, %v3907_v11  ;;  %v3905_v17 = vld [vmem:[#allocation4 + $0x60] sm:$0xff]  ;;  %3879 = vst.msk [vmem:[#allocation4 + $0x90] sm:$0xff] %vm485_vm0, %v3847_v9  ;;  %4044 = vst.msk [vmem:[#allocation2 + $0x81] sm:$0xff] %vm485_vm0, %v4012_v18  ;;  %v3846_v52 = vadd.f32 %v3814_v20, %v3737_v14  ;;  %v4729_v36 = vld [vmem:[#allocation2 + $0x61] sm:$0xff] }
 0x47a   : > { %v3944_v23 = vmul.f32 %v8700_v40, %v3905_v17  ;;  %v3908_v27 = vld [vmem:[#allocation4 + $0x78] sm:$0xff]  ;;  %3877 = vst.msk [vmem:[#allocation4 + $0x80] sm:$0xff] %vm485_vm0, %v3845_v8  ;;  %3880 = vst.msk [vmem:[#allocation4 + $0x98] sm:$0xff] %vm485_vm0, %v3848_v19  ;;  %v4074_v39 = vld [vmem:[#allocation2 + $0x50] sm:$0xff]  ;;  %v8799_v37 = vpack.c.bf16 %v4730_v28, %v4729_v36 }
 0x47b   : > { %v3985_v29 = vadd.f32 %v8702_v3, %v3946_v61  ;;  %v3947_v30 = vmul.f32 %v8700_v40, %v3908_v27  ;;  %v3906_v24 = vld [vmem:[#allocation4 + $0x68] sm:$0xff]  ;;  %4917 = vrot.lane.b32.xlu0 %v8760_v15, %s7493_s2  ;;  %4325 = vrot.lane.b32.xlu1 %v8783_v21, %s7493_s2  ;;  %3878 = vst.msk [vmem:[#allocation4 + $0x88] sm:$0xff] %vm485_vm0, %v3846_v52  ;;  %v3819_v48 = vld [vmem:[#allocation4 + $0xb0] sm:$0xff]  ;;  %v4076_v42 = vld [vmem:[#allocation2 + $0x68] sm:$0xff] }
 0x47c   : > { %v3983_v31 = vadd.f32 %v8702_v3, %v3944_v23  ;;  %v3945_v33 = vmul.f32 %v8700_v40, %v3906_v24  ;;  %v8801_v41 = vpack.c.bf16 %v4074_v39, %v4073_v38  ;;  %v4075_v34 = vld [vmem:[#allocation2 + $0x60] sm:$0xff]  ;;  %v4858_v54 = vld [vmem:[#allocation2 + $0x6a] sm:$0xff]  ;;  %v7130_v35 = vld [vmem:[#allocation16 + $0xc] sm:$0xff]  }
 0x47d   : > { %v4017_v43 = vmax.f32 %v3985_v29, 0.0  ;;  %v3986_v46 = vadd.f32 %v8702_v3, %v3947_v30  ;;  %v6840_v53 = vpop.f32.mrb[44].mxu1  ;;  %v6868_v6 = vpop.f32.mrb[68].mxu0  ;;  %v4857_v44 = vld [vmem:[#allocation2 + $0x62] sm:$0xff]  ;;  %v8804_v55 = vpack.c.bf16 %v4076_v42, %v4075_v34  ;;  %v3167_v0 = vld [vmem:[#allocation4 + $0xe0] sm:$0xff]  ;;  %v3168_v7 = vld [vmem:[#allocation4 + $0xe8] sm:$0xff]  ;;  %6914 = vmatprep.subr.bf16.mxu0 %v7130_v35 }
 0x47e   : > { %v4015_v26 = vmax.f32 %v3983_v31, 0.0  ;;  %v3984_v49 = vadd.f32 %v8702_v3, %v3945_v33  ;;  %v3201_v50 = vadd.f32 %v6840_v53, %v3169_v32  ;;  %v3851_v60 = vadd.f32 %v6868_v6, %v3819_v48  ;;  %v3124_v51 = vpop.f32.mrb[45].mxu1  ;;  %v3750_v62 = vpop.f32.mrb[69].mxu0  ;;  %v3817_v45 = vld [vmem:[#allocation4 + $0xa0] sm:$0xff]  ;;  %v3170_v59 = vld [vmem:[#allocation4 + $0xf8] sm:$0xff]  ;;  %4118 = vst.msk [vmem:[#allocation3 + $0x18] sm:$0xff] %vm485_vm0, %v8801_v41  ;;  %6915 = vmatpush3.bf16.msra.mxu0 %v7130_v35 }
 0x47f   : > { %4049 = vst.msk [vmem:[#allocation2 + $0xc1] sm:$0xff] %vm485_vm0, %v4017_v43  ;;  %v4018_v56 = vmax.f32 %v3986_v46, 0.0  ;;  %5444 = vrot.lane.b32.xlu0 %v8742_v47, %s7492_s13  ;;  %4793 = vrot.lane.b32.xlu1 %v8799_v37, %s7492_s13  ;;  %v3199_v58 = vadd.f32 %v3167_v0, %v3124_v51  ;;  %v3849_v4 = vadd.f32 %v3817_v45, %v3750_v62  ;;  %v6841_v25 = vpop.f32.mrb[46].mxu1  ;;  %v6869_v5 = vpop.f32.mrb[70].mxu0  ;;  %v3820_v2 = vld [vmem:[#allocation4 + $0xb8] sm:$0xff]  ;;  %4119 = vst.msk [vmem:[#allocation3 + $0x20] sm:$0xff] %vm485_vm0, %v8804_v55 }
 0x480   : > { %4047 = vst.msk [vmem:[#allocation2 + $0xa9] sm:$0xff] %vm485_vm0, %v4015_v26  ;;  %v4016_v63 = vmax.f32 %v3984_v49, 0.0  ;;  %v3911_v1 = vld [vmem:[#allocation4 + $0x90] sm:$0xff]  ;;  %3233 = vst.msk [vmem:[#allocation4 + $0xf0] sm:$0xff] %vm485_vm0, %v3201_v50  ;;  %v3202_v12 = vadd.f32 %v6841_v25, %v3170_v59  ;;  %v3852_v13 = vadd.f32 %v6869_v5, %v3820_v2  ;;  %v3127_v18 = vpop.f32.mrb[47].mxu1  ;;  %v3753_v11 = vpop.f32.mrb[71].mxu0  ;;  %v8820_v10 = vpack.c.bf16 %v4858_v54, %v4857_v44 }
 0x481   : > { %4050 = vst.msk [vmem:[#allocation2 + $0xc9] sm:$0xff] %vm485_vm0, %v4018_v56  ;;  %v3950_v47 = vmul.f32 %v8700_v40, %v3911_v1  ;;  %v3909_v9 = vld [vmem:[#allocation4 + $0x80] sm:$0xff]  ;;  %3883 = vst.msk [vmem:[#allocation4 + $0xb0] sm:$0xff] %vm485_vm0, %v3851_v60  ;;  %v3818_v8 = vld [vmem:[#allocation4 + $0xa8] sm:$0xff]  ;;  %v3200_v19 = vadd.f32 %v3168_v7, %v3127_v18 }
 0x482   : > { %v4138_v16 = vld [vmem:[#allocation2 + $0x51] sm:$0xff]  ;;  %4048 = vst.msk [vmem:[#allocation2 + $0xb1] sm:$0xff] %vm485_vm0, %v4016_v63  ;;  %v3948_v61 = vmul.f32 %v8700_v40, %v3909_v9  ;;  %v3912_v17 = vld [vmem:[#allocation4 + $0x98] sm:$0xff]  ;;  %3231 = vst.msk [vmem:[#allocation4 + $0xe0] sm:$0xff] %vm485_vm0, %v3199_v58  ;;  %v3850_v14 = vadd.f32 %v3818_v8, %v3753_v11 }
 0x483   : > { %3881 = vst.msk [vmem:[#allocation4 + $0xa0] sm:$0xff] %vm485_vm0, %v3849_v4  ;;  %v4137_v20 = vld [vmem:[#allocation2 + $0x49] sm:$0xff]  ;;  %v4077_v23 = vld [vmem:[#allocation2 + $0x78] sm:$0xff]  ;;  %v3989_v27 = vadd.f32 %v8702_v3, %v3950_v47  ;;  %v3951_v52 = vmul.f32 %v8700_v40, %v3912_v17  ;;  %3234 = vst.msk [vmem:[#allocation4 + $0xf8] sm:$0xff] %vm485_vm0, %v3202_v12  ;;  %5572 = vrot.lane.b32.xlu0 %v8760_v15, %s7493_s2  ;;  %4921 = vrot.lane.b32.xlu1 %v8820_v10, %s7493_s2 }
 0x484   : > { %v3910_v28 = vld [vmem:[#allocation4 + $0x88] sm:$0xff]  ;;  %3884 = vst.msk [vmem:[#allocation4 + $0xb8] sm:$0xff] %vm485_vm0, %v3852_v13  ;;  %v4078_v30 = vld [vmem:[#allocation2 + $0x80] sm:$0xff]  ;;  %v3987_v24 = vadd.f32 %v8702_v3, %v3948_v61  ;;  %3232 = vst.msk [vmem:[#allocation4 + $0xe8] sm:$0xff] %vm485_vm0, %v3200_v19  ;;  %v8838_v33 = vpack.c.bf16 %v4138_v16, %v4137_v20 }
 0x485   : > { %v7131_v29 = vld [vmem:[#allocation16 + $0x14] ss:$0 sps:$4 sm:$0xff]   ;;  %v3949_v31 = vmul.f32 %v8700_v40, %v3910_v28  ;;  %3882 = vst.msk [vmem:[#allocation4 + $0xa8] sm:$0xff] %vm485_vm0, %v3850_v14  ;;  %v8840_v32 = vpack.c.bf16 %v4078_v30, %v4077_v23  ;;  %v4079_v36 = vld [vmem:[#allocation2 + $0x90] sm:$0xff]  ;;  %v4021_v15 = vmax.f32 %v3989_v27, 0.0  ;;  %v3990_v39 = vadd.f32 %v8702_v3, %v3951_v52  ;;  %v6872_v42 = vpop.f32.mrb[72].mxu0 }
 0x486   : > { %v4080_v38 = vld [vmem:[#allocation2 + $0x98] sm:$0xff]  ;;  %6990 = vmatprep.subr.msk.bf16.mxu0 %vm2381_vm8, %v7131_v29  ;;  %v5057_v43 = vsel %vm2381_vm8, %v7131_v29, 0  ;;  %v4019_v48 = vmax.f32 %v3987_v24, 0.0  ;;  %v3823_v26 = vld [vmem:[#allocation4 + $0xd0] sm:$0xff]  ;;  %v4265_v49 = vld [vmem:[#allocation2 + $0x4a] sm:$0xff]  ;;  %v3766_v54 = vpop.f32.mrb[73].mxu0 }
 0x487   : > { %v8845_v46 = vpack.c.bf16 %v4080_v38, %v4079_v36  ;;  %v3988_v34 = vadd.f32 %v8702_v3, %v3949_v31  ;;  %v4266_v53 = vld [vmem:[#allocation2 + $0x52] sm:$0xff]  ;;  %6917 = vmatpush3.bf16.msra.mxu0 %v5057_v43  ;;  %4120 = vst.msk [vmem:[#allocation3 + $0x28] sm:$0xff] %vm485_vm0, %v8840_v32  ;;  %4053 = vst.msk [vmem:[#allocation2 + $0xf1] sm:$0xff] %vm485_vm0, %v4021_v15  ;;  %v4022_v6 = vmax.f32 %v3990_v39, 0.0  ;;  %4787 = vrot.lane.b32.xlu0 %v8765_v22, %s7492_s13  ;;  %v6873_v51 = vpop.f32.mrb[74].mxu0  ;;  %v3824_v0 = vld [vmem:[#allocation4 + $0xd8] sm:$0xff] }
 0x488   : > { %v3855_v44 = vadd.f32 %v6872_v42, %v3823_v26  ;;  %4201 = vrot.lane.b32.xlu1 %v8838_v33, %s7492_s13  ;;  %v3821_v35 = vld [vmem:[#allocation4 + $0xc0] sm:$0xff]  ;;  %4051 = vst.msk [vmem:[#allocation2 + $0xd9] sm:$0xff] %vm485_vm0, %v4019_v48  ;;  %v3915_v50 = vld [vmem:[#allocation4 + $0xb0] sm:$0xff]  ;;  %v3856_v45 = vadd.f32 %v6873_v51, %v3824_v0  ;;  %v3769_v59 = vpop.f32.mrb[75].mxu0  ;;  %v3822_v63 = vld [vmem:[#allocation4 + $0xc8] sm:$0xff]  ;;  %v8861_v1 = vpack.c.bf16 %v4266_v53, %v4265_v49 }
 0x489   : > { %4121 = vst.msk [vmem:[#allocation3 + $0x30] sm:$0xff] %vm485_vm0, %v8845_v46  ;;  %v4020_v56 = vmax.f32 %v3988_v34, 0.0  ;;  %v3853_v60 = vadd.f32 %v3821_v35, %v3766_v54  ;;  %4054 = vst.msk [vmem:[#allocation2 + $0xf9] sm:$0xff] %vm485_vm0, %v4022_v6  ;;  %v3954_v62 = vmul.f32 %v8700_v40, %v3915_v50  ;;  %v3854_v25 = vadd.f32 %v3822_v63, %v3769_v59  ;;  %v4081_v12 = vld [vmem:[#allocation2 + $0xa8] sm:$0xff]  ;;  %v4082_v13 = vld [vmem:[#allocation2 + $0xb0] sm:$0xff] }
 0x48a   : > { %v3913_v22 = vld [vmem:[#allocation4 + $0xa0] sm:$0xff]  ;;  %3887 = vst.msk [vmem:[#allocation4 + $0xd0] sm:$0xff] %vm485_vm0, %v3855_v44  ;;  %3888 = vst.msk [vmem:[#allocation4 + $0xd8] sm:$0xff] %vm485_vm0, %v3856_v45  ;;  %v8877_v8 = vpack.c.bf16 %v4082_v13, %v4081_v12  ;;  %v4083_v16 = vld [vmem:[#allocation2 + $0xc0] sm:$0xff] }
 0x48b   : > { %4052 = vst.msk [vmem:[#allocation2 + $0xe1] sm:$0xff] %vm485_vm0, %v4020_v56  ;;  %v3952_v58 = vmul.f32 %v8700_v40, %v3913_v22  ;;  %v3916_v4 = vld [vmem:[#allocation4 + $0xb8] sm:$0xff]  ;;  %3885 = vst.msk [vmem:[#allocation4 + $0xc0] sm:$0xff] %vm485_vm0, %v3853_v60  ;;  %v3993_v5 = vadd.f32 %v8702_v3, %v3954_v62  ;;  %4915 = vrot.lane.b32.xlu0 %v8783_v21, %s7493_s2  ;;  %v3827_v14 = vld [vmem:[#allocation4 + $0xf0] sm:$0xff] }
 0x48c   : > { %v3955_v2 = vmul.f32 %v8700_v40, %v3916_v4  ;;  %v3914_v7 = vld [vmem:[#allocation4 + $0xa8] sm:$0xff]  ;;  %4329 = vrot.lane.b32.xlu1 %v8861_v1, %s7493_s2  ;;  %3886 = vst.msk [vmem:[#allocation4 + $0xc8] sm:$0xff] %vm485_vm0, %v3854_v25  ;;  %v4084_v61 = vld [vmem:[#allocation2 + $0xc8] sm:$0xff]  ;;  %v3825_v28 = vld [vmem:[#allocation4 + $0xe0] sm:$0xff] }
 0x48d   : > { %v3991_v47 = vadd.f32 %v8702_v3, %v3952_v58  ;;  %v3953_v9 = vmul.f32 %v8700_v40, %v3914_v7  ;;  %v4025_v18 = vmax.f32 %v3993_v5, 0.0  ;;  %v6876_v19 = vpop.f32.mrb[76].mxu0  ;;  %v8880_v20 = vpack.c.bf16 %v4084_v61, %v4083_v16  ;;  %4122 = vst.msk [vmem:[#allocation3 + $0x38] sm:$0xff] %vm485_vm0, %v8877_v8  ;;  %v3828_v36 = vld [vmem:[#allocation4 + $0xf8] sm:$0xff]  ;;  %v3826_v48 = vld [vmem:[#allocation4 + $0xe8] sm:$0xff] }
 0x48e   : > { %v3994_v11 = vadd.f32 %v8702_v3, %v3955_v2  ;;  %v3859_v27 = vadd.f32 %v6876_v19, %v3827_v14  ;;  %v3782_v52 = vpop.f32.mrb[77].mxu0  ;;  %v4734_v49 = vld [vmem:[#allocation2 + $0x99] sm:$0xff]  ;;  %v4733_v51 = vld [vmem:[#allocation2 + $0x91] sm:$0xff] }
 0x48f   : > { %v4023_v17 = vmax.f32 %v3991_v47, 0.0  ;;  %v3992_v21 = vadd.f32 %v8702_v3, %v3953_v9  ;;  %4057 = vst.msk [vmem:[#allocation2 + $0x121] sm:$0xff] %vm485_vm0, %v4025_v18  ;;  %4203 = vrot.lane.b32.xlu0 %v8799_v37, %s7492_s13  ;;  %v3857_v24 = vadd.f32 %v3825_v28, %v3782_v52  ;;  %v6877_v31 = vpop.f32.mrb[78].mxu0  ;;  %4123 = vst.msk [vmem:[#allocation3 + $0x40] sm:$0xff] %vm485_vm0, %v8880_v20  ;;  %v4085_v53 = vld [vmem:[#allocation2 + $0xd8] sm:$0xff]  ;;  %v4087_v62 = vld [vmem:[#allocation2 + $0xf0] sm:$0xff] }
 0x490   : > { %v4026_v23 = vmax.f32 %v3994_v11, 0.0  ;;  %5446 = vrot.lane.b32.xlu1 %v8838_v33, %s7492_s13  ;;  %3891 = vst.msk [vmem:[#allocation4 + $0xf0] sm:$0xff] %vm485_vm0, %v3859_v27  ;;  %v3860_v39 = vadd.f32 %v6877_v31, %v3828_v36  ;;  %v3785_v43 = vpop.f32.mrb[79].mxu0  ;;  %v4088_v56 = vld [vmem:[#allocation2 + $0xf8] sm:$0xff]  ;;  %v8911_v59 = vpack.c.bf16 %v4734_v49, %v4733_v51  ;;  %v4142_v11 = vld [vmem:[#allocation2 + $0x81] sm:$0xff] }
 0x491   : > { %4055 = vst.msk [vmem:[#allocation2 + $0x109] sm:$0xff] %vm485_vm0, %v4023_v17  ;;  %v4024_v29 = vmax.f32 %v3992_v21, 0.0  ;;  %v3919_v30 = vld [vmem:[#allocation4 + $0xd0] sm:$0xff]  ;;  %v3920_v42 = vld [vmem:[#allocation4 + $0xd8] sm:$0xff]  ;;  %3889 = vst.msk [vmem:[#allocation4 + $0xe0] sm:$0xff] %vm485_vm0, %v3857_v24  ;;  %v3858_v26 = vadd.f32 %v3826_v48, %v3785_v43  ;;  %v8913_v63 = vpack.c.bf16 %v4088_v56, %v4087_v62 }
 0x492   : > { %4058 = vst.msk [vmem:[#allocation2 + $0x129] sm:$0xff] %vm485_vm0, %v4026_v23  ;;  %v3958_v38 = vmul.f32 %v8700_v40, %v3919_v30  ;;  %v3917_v15 = vld [vmem:[#allocation4 + $0xc0] sm:$0xff]  ;;  %v3959_v44 = vmul.f32 %v8700_v40, %v3920_v42  ;;  %3892 = vst.msk [vmem:[#allocation4 + $0xf8] sm:$0xff] %vm485_vm0, %v3860_v39  ;;  %v4086_v35 = vld [vmem:[#allocation2 + $0xe0] sm:$0xff] }
 0x493   : > { %4056 = vst.msk [vmem:[#allocation2 + $0x111] sm:$0xff] %vm485_vm0, %v4024_v29  ;;  %v3956_v34 = vmul.f32 %v8700_v40, %v3917_v15  ;;  %v3918_v54 = vld [vmem:[#allocation4 + $0xc8] sm:$0xff]  ;;  %4331 = vrot.lane.b32.xlu0 %v8820_v10, %s7493_s2  ;;  %3890 = vst.msk [vmem:[#allocation4 + $0xe8] sm:$0xff] %vm485_vm0, %v3858_v26  ;;  %v8908_v0 = vpack.c.bf16 %v4086_v35, %v4085_v53  ;;  %v4270_v39 = vld [vmem:[#allocation2 + $0x82] sm:$0xff] }
 0x494   : > { %v3997_v6 = vadd.f32 %v8702_v3, %v3958_v38  ;;  %5574 = vrot.lane.b32.xlu1 %v8861_v1, %s7493_s2  ;;  %v3957_v60 = vmul.f32 %v8700_v40, %v3918_v54  ;;  %v3998_v45 = vadd.f32 %v8702_v3, %v3959_v44  ;;  %v4861_v25 = vld [vmem:[#allocation2 + $0x92] sm:$0xff]  ;;  %v4862_v5 = vld [vmem:[#allocation2 + $0x9a] sm:$0xff]  ;;  %4125 = vst.msk [vmem:[#allocation3 + $0x50] sm:$0xff] %vm485_vm0, %v8913_v63  ;;  %v4738_v53 = vld [vmem:[#allocation2 + $0xc9] sm:$0xff] }
 0x495   : > { %v3995_v50 = vadd.f32 %v8702_v3, %v3956_v34  ;;  %4124 = vst.msk [vmem:[#allocation3 + $0x48] sm:$0xff] %vm485_vm0, %v8908_v0  ;;  %v8928_v13 = vpack.c.bf16 %v4862_v5, %v4861_v25  ;;  %v4141_v52 = vld [vmem:[#allocation2 + $0x79] sm:$0xff]  ;;  %v4737_v54 = vld [vmem:[#allocation2 + $0xc1] sm:$0xff]  ;;  %v4146_v62 = vld [vmem:[#allocation2 + $0xb1] sm:$0xff] }
 0x496   : > { %v4029_v22 = vmax.f32 %v3997_v6, 0.0  ;;  %v3996_v4 = vadd.f32 %v8702_v3, %v3957_v60  ;;  %v4030_v2 = vmax.f32 %v3998_v45, 0.0  ;;  %v4091_v29 = vld [vmem:[#allocation2 + $0x120] sm:$0xff]  ;;  %v4168_v31 = vpack.c.bf16 %v4142_v11, %v4141_v52  ;;  %v4741_v5 = vld [vmem:[#allocation2 + $0xf1] sm:$0xff] }
 0x497   : > { %v4027_v58 = vmax.f32 %v3995_v50, 0.0  ;;  %5448 = vrot.lane.b32.xlu0 %v8799_v37, %s7492_s13  ;;  %v3923_v47 = vld [vmem:[#allocation4 + $0xf0] sm:$0xff]  ;;  %v8976_v35 = vpack.c.bf16 %v4738_v53, %v4737_v54  ;;  %v4866_v50 = vld [vmem:[#allocation2 + $0xca] sm:$0xff] }
 0x498   : > { %4061 = vst.msk [vmem:[#allocation2 + $0x151] sm:$0xff] %vm485_vm0, %v4029_v22  ;;  %4797 = vrot.lane.b32.xlu1 %v8911_v59, %s7492_s13  ;;  %v4028_v7 = vmax.f32 %v3996_v4, 0.0  ;;  %4062 = vst.msk [vmem:[#allocation2 + $0x159] sm:$0xff] %vm485_vm0, %v4030_v2  ;;  %v3962_v9 = vmul.f32 %v8700_v40, %v3923_v47  ;;  %v3921_v12 = vld [vmem:[#allocation4 + $0xe0] sm:$0xff]  ;;  %v4089_v16 = vld [vmem:[#allocation2 + $0x108] sm:$0xff] }
 0x499   : > { %4059 = vst.msk [vmem:[#allocation2 + $0x139] sm:$0xff] %vm485_vm0, %v4027_v58  ;;  %v3960_v37 = vmul.f32 %v8700_v40, %v3921_v12  ;;  %v3924_v18 = vld [vmem:[#allocation4 + $0xf8] sm:$0xff]  ;;  %v4269_v15 = vld [vmem:[#allocation2 + $0x7a] sm:$0xff] }
 0x49a   : > { %4060 = vst.msk [vmem:[#allocation2 + $0x141] sm:$0xff] %vm485_vm0, %v4028_v7  ;;  %v4001_v61 = vadd.f32 %v8702_v3, %v3962_v9  ;;  %v3963_v17 = vmul.f32 %v8700_v40, %v3924_v18  ;;  %v3922_v21 = vld [vmem:[#allocation4 + $0xe8] sm:$0xff]  ;;  %v4090_v19 = vld [vmem:[#allocation2 + $0x110] sm:$0xff]  ;;  %v4092_v14 = vld [vmem:[#allocation2 + $0x128] sm:$0xff] }
 0x49b   : > { %5576 = vrot.lane.b32.xlu0 %v8820_v10, %s7493_s2  ;;  %v3999_v23 = vadd.f32 %v8702_v3, %v3960_v37  ;;  %v3961_v27 = vmul.f32 %v8700_v40, %v3922_v21  ;;  %v8940_v28 = vpack.c.bf16 %v4090_v19, %v4089_v16  ;;  %v8943_v36 = vpack.c.bf16 %v4092_v14, %v4091_v29  ;;  %v4865_v56 = vld [vmem:[#allocation2 + $0xc2] sm:$0xff]  ;;  %v4273_v58 = vld [vmem:[#allocation2 + $0xaa] sm:$0xff]  ;;  %v4742_v25 = vld [vmem:[#allocation2 + $0xf9] sm:$0xff] }
 0x49c   : > { %4925 = vrot.lane.b32.xlu1 %v8928_v13, %s7493_s2  ;;  %v4033_v30 = vmax.f32 %v4001_v61, 0.0  ;;  %v4002_v24 = vadd.f32 %v8702_v3, %v3963_v17  ;;  %v8984_v60 = vld [vmem:[#allocation16 + $0x18] sm:$0xff]   ;;  %v8986_v51 = vpack.c.bf16 %v4866_v50, %v4865_v56  ;;  %v4145_v22 = vld [vmem:[#allocation2 + $0xa9] sm:$0xff]  ;;  %v9003_v2 = vpack.c.bf16 %v4742_v25, %v4741_v5  ;;  %v4279_v18 = vld [vmem:[#allocation2 + $0xf2] sm:$0xff] }
 0x49d   : > { %v4031_v10 = vmax.f32 %v3999_v23, 0.0  ;;  %v4000_v38 = vadd.f32 %v8702_v3, %v3961_v27  ;;  %4126 = vst.msk [vmem:[#allocation3 + $0x58] sm:$0xff] %vm485_vm0, %v8940_v28  ;;  %4127 = vst.msk [vmem:[#allocation3 + $0x60] sm:$0xff] %vm485_vm0, %v8943_v36  ;;  %v4296_v3 = vpack.c.bf16 %v4270_v39, %v4269_v15  ;;  %6950 = vmatprep.subr.bf16.mxu1 %v8984_v60  ;;  %v4150_v7 = vld [vmem:[#allocation2 + $0xe1] sm:$0xff]  ;;  %v4149_v47 = vld [vmem:[#allocation2 + $0xd9] sm:$0xff] }
 0x49e   : > { %4065 = vst.msk [vmem:[#allocation2 + $0x181] sm:$0xff] %vm485_vm0, %v4033_v30  ;;  %v4034_v40 = vmax.f32 %v4002_v24, 0.0  ;;  %v4170_v45 = vpack.c.bf16 %v4146_v62, %v4145_v22  ;;  %v9008_v9 = vpack.c.bf16 %v4150_v7, %v4149_v47  ;;  %v4277_v12 = vld [vmem:[#allocation2 + $0xda] sm:$0xff]  ;;  %v4154_v61 = vld [vmem:[#allocation2 + $0x111] sm:$0xff]  ;;  %v4153_v17 = vld [vmem:[#allocation2 + $0x109] sm:$0xff] }
 0x49f   : > { %4791 = vrot.lane.b32.xlu0 %v8838_v33, %s7492_s13  ;;  %4063 = vst.msk [vmem:[#allocation2 + $0x169] sm:$0xff] %vm485_vm0, %v4031_v10  ;;  %v4032_v43 = vmax.f32 %v4000_v38, 0.0  ;;  %v4095_v48 = vld [vmem:[#allocation2 + $0x150] sm:$0xff]  ;;  %v4096_v34 = vld [vmem:[#allocation2 + $0x158] sm:$0xff]  ;;  %v9025_v21 = vpack.c.bf16 %v4154_v61, %v4153_v17  ;;  %v4155_v27 = vld [vmem:[#allocation2 + $0x121] sm:$0xff] }
 0x4a0   : > { %4205 = vrot.lane.b32.xlu1 %v4168_v31, %s7492_s13  ;;  %4066 = vst.msk [vmem:[#allocation2 + $0x189] sm:$0xff] %vm485_vm0, %v4034_v40  ;;  %v4093_v42 = vld [vmem:[#allocation2 + $0x138] sm:$0xff]  ;;  %v8960_v33 = vpack.c.bf16 %v4096_v34, %v4095_v48  ;;  %v4156_v19 = vld [vmem:[#allocation2 + $0x129] sm:$0xff] }
 0x4a1   : > { %4064 = vst.msk [vmem:[#allocation2 + $0x171] sm:$0xff] %vm485_vm0, %v4032_v43  ;;  %v4094_v26 = vld [vmem:[#allocation2 + $0x140] sm:$0xff]  ;;  %v4281_v14 = vld [vmem:[#allocation2 + $0x10a] sm:$0xff]  ;;  %v4282_v23 = vld [vmem:[#allocation2 + $0x112] sm:$0xff]  ;;  %v9031_v52 = vpack.c.bf16 %v4156_v19, %v4155_v27 }
 0x4a2   : > { %v8962_v49 = vpack.c.bf16 %v4094_v26, %v4093_v42  ;;  %4129 = vst.msk [vmem:[#allocation3 + $0x70] sm:$0xff] %vm485_vm0, %v8960_v33  ;;  %v4280_v11 = vld [vmem:[#allocation2 + $0xfa] sm:$0xff]  ;;  %v9033_v29 = vpack.c.bf16 %v4282_v23, %v4281_v14  ;;  %v4283_v30 = vld [vmem:[#allocation2 + $0x122] sm:$0xff]  ;;  %v4284_v24 = vld [vmem:[#allocation2 + $0x12a] sm:$0xff] }
 0x4a3   : > { %4919 = vrot.lane.b32.xlu0 %v8861_v1, %s7493_s2  ;;  %v9019_v16 = vpack.c.bf16 %v4280_v11, %v4279_v18  ;;  %v4159_v10 = vld [vmem:[#allocation2 + $0x151] sm:$0xff]  ;;  %v9039_v38 = vpack.c.bf16 %v4284_v24, %v4283_v30  ;;  %v4158_v39 = vld [vmem:[#allocation2 + $0x141] sm:$0xff]  ;;  %v4157_v40 = vld [vmem:[#allocation2 + $0x139] sm:$0xff] }
 0x4a4   : > { %4333 = vrot.lane.b32.xlu1 %v4296_v3, %s7493_s2  ;;  %4128 = vst.msk [vmem:[#allocation3 + $0x68] sm:$0xff] %vm485_vm0, %v8962_v49  ;;  %v9047_v43 = vpack.c.bf16 %v4158_v39, %v4157_v40  ;;  %v4288_v48 = vld [vmem:[#allocation2 + $0x15a] sm:$0xff]  ;;  %v4286_v42 = vld [vmem:[#allocation2 + $0x142] sm:$0xff] }
 0x4a5   : > { %v4285_v34 = vld [vmem:[#allocation2 + $0x13a] sm:$0xff]  ;;  %v7133_v18 = vld [vmem:[#allocation16 + $0x20] ss:$0 sps:$4 sm:$0xff]  }
 0x4a6   : > { %v4097_v6 = vld [vmem:[#allocation2 + $0x168] sm:$0xff]  ;;  %v5714_v11 = vsel %vm2381_vm8, %v7133_v18, 0 }
 0x4a7   : > { %4207 = vrot.lane.b32.xlu0 %v8911_v59, %s7492_s13  ;;  %v4161_v56 = vld [vmem:[#allocation2 + $0x169] sm:$0xff]  ;;  %v4753_v40 = vld [vmem:[#allocation2 + $0x181] sm:$0xff] }
 0x4a8   : > { %5450 = vrot.lane.b32.xlu1 %v4168_v31, %s7492_s13  ;;  %v4098_v1 = vld [vmem:[#allocation2 + $0x170] sm:$0xff] }
 0x4a9   : > { %v8974_v44 = vpack.c.bf16 %v4098_v1, %v4097_v6  ;;  %v9055_v1 = vpack.c.bf16 %v4286_v42, %v4285_v34  ;;  %v4162_v54 = vld [vmem:[#allocation2 + $0x171] sm:$0xff] }
 0x4aa   : > { %v9062_v22 = vpack.c.bf16 %v4162_v54, %v4161_v56 }
 0x4ab   : > { %4335 = vrot.lane.b32.xlu0 %v8928_v13, %s7493_s2  ;;  %4130 = vst.msk [vmem:[#allocation3 + $0x78] sm:$0xff] %vm485_vm0, %v8974_v44 }
 0x4ac   : > { %5578 = vrot.lane.b32.xlu1 %v4296_v3, %s7493_s2 }
 0x4af   : > { %5452 = vrot.lane.b32.xlu0 %v8911_v59, %s7492_s13  ;;  %v4274_v59 = vld [vmem:[#allocation2 + $0xb2] sm:$0xff] }
 0x4b0   : > { %4801 = vrot.lane.b32.xlu1 %v8976_v35, %s7492_s13  ;;  %v4298_v4 = vpack.c.bf16 %v4274_v59, %v4273_v58  ;;  %v4290_v58 = vld [vmem:[#allocation2 + $0x172] sm:$0xff] }
 0x4b3   : > { %5580 = vrot.lane.b32.xlu0 %v8928_v13, %s7493_s2  ;;  %v4278_v13 = vld [vmem:[#allocation2 + $0xe2] sm:$0xff] }
 0x4b4   : > { %4929 = vrot.lane.b32.xlu1 %v8986_v51, %s7493_s2  ;;  %v9013_v37 = vpack.c.bf16 %v4278_v13, %v4277_v12 }
 0x4b7   : > { %4795 = vrot.lane.b32.xlu0 %v4168_v31, %s7492_s13  ;;  %v4160_v31 = vld [vmem:[#allocation2 + $0x159] sm:$0xff] }
 0x4b8   : > { %4209 = vrot.lane.b32.xlu1 %v4170_v45, %s7492_s13  ;;  %v9041_v15 = vpack.c.bf16 %v4160_v31, %v4159_v10 }
 0x4bb   : > { %4923 = vrot.lane.b32.xlu0 %v4296_v3, %s7493_s2  ;;  %v4287_v3 = vld [vmem:[#allocation2 + $0x152] sm:$0xff] }
 0x4bc   : > { %4337 = vrot.lane.b32.xlu1 %v4298_v4, %s7493_s2  ;;  %v9053_v6 = vpack.c.bf16 %v4288_v48, %v4287_v3  ;;  %v4882_v3 = vld [vmem:[#allocation2 + $0x18a] sm:$0xff] }
 0x4bf   : > { %4211 = vrot.lane.b32.xlu0 %v8976_v35, %s7492_s13 }
 0x4c0   : > { %5454 = vrot.lane.b32.xlu1 %v4170_v45, %s7492_s13 }
 0x4c3   : > { %4339 = vrot.lane.b32.xlu0 %v8986_v51, %s7493_s2 }
 0x4c4   : > { %5582 = vrot.lane.b32.xlu1 %v4298_v4, %s7493_s2 }
 0x4c7   : > { %4799 = vrot.lane.b32.xlu0 %v4170_v45, %s7492_s13  ;;  %v4289_v45 = vld [vmem:[#allocation2 + $0x16a] sm:$0xff] }
 0x4c8   : > { %4805 = vrot.lane.b32.xlu1 %v9003_v2, %s7492_s13  ;;  %v9070_v25 = vpack.c.bf16 %v4290_v58, %v4289_v45  ;;  %v5411_v45 = vld [vmem:[#allocation2 + $0x1a1] sm:$0xff] }
 0x4cb   : > { %4927 = vrot.lane.b32.xlu0 %v4298_v4, %s7493_s2 }
 0x4cc   : > { %4213 = vrot.lane.b32.xlu1 %v9008_v9, %s7492_s13 }
 0x4cf   : > { %4215 = vrot.lane.b32.xlu0 %v9003_v2, %s7492_s13 }
 0x4d0   : > { %4341 = vrot.lane.b32.xlu1 %v9013_v37, %s7493_s2 }
 0x4d3   : > { %4343 = vrot.lane.b32.xlu0 %v9019_v16, %s7493_s2 }
 0x4d4   : > { %4933 = vrot.lane.b32.xlu1 %v9019_v16, %s7493_s2 }
 0x4d7   : > { %4803 = vrot.lane.b32.xlu0 %v9008_v9, %s7492_s13 }
 0x4d8   : > { %4217 = vrot.lane.b32.xlu1 %v9025_v21, %s7492_s13 }
 0x4db   : > { %4219 = vrot.lane.b32.xlu0 %v9031_v52, %s7492_s13 }
 0x4dc   : > { %4345 = vrot.lane.b32.xlu1 %v9033_v29, %s7493_s2 }
 0x4df   : > { %4347 = vrot.lane.b32.xlu0 %v9039_v38, %s7493_s2 }
 0x4e0   : > { %4223 = vrot.lane.b32.xlu1 %v9041_v15, %s7492_s13 }
 0x4e3   : > { %4931 = vrot.lane.b32.xlu0 %v9013_v37, %s7493_s2 }
 0x4e4   : > { %4221 = vrot.lane.b32.xlu1 %v9047_v43, %s7492_s13 }
 0x4e5   : > { %v4790_v26 = vpop.permute.xlu1 %4789  ;;  %v4200_v53 = vpop.permute.xlu0 %4199 }
 0x4e6   : > { %4245 = vst.msk [vmem:[#allocation3 + $0x10] sm:$0xff] %vm2158_vm4, %v4200_v53 }
 0x4e7   : > { %4351 = vrot.lane.b32.xlu0 %v9053_v6, %s7493_s2 }
 0x4e8   : > { %4349 = vrot.lane.b32.xlu1 %v9055_v1, %s7493_s2 }
 0x4e9   : > { %v4328_v50 = vpop.permute.xlu0 %4327  ;;  %v4198_v62 = vpop.permute.xlu1 %4197 }
 0x4ea   : > { %4373 = vst.msk [vmem:[#allocation3 + $0x10] sm:$0xff] %vm2287_vm5, %v4328_v50 }
 0x4eb   : > { %4244 = vst.msk [vmem:[#allocation3 + $0x8] sm:$0xff] %vm2158_vm4, %v4198_v62  ;;  %5456 = vrot.lane.b32.xlu0 %v8976_v35, %s7492_s13  ;;  %v5410_v62 = vld [vmem:[#allocation2 + $0x199] sm:$0xff] }
 0x4ec   : > { %4225 = vrot.lane.b32.xlu1 %v9062_v22, %s7492_s13  ;;  %v5427_v58 = vpack.c.bf16 %v5411_v45, %v5410_v62 }
 0x4ed   : > { %v4918_v59 = vpop.permute.xlu0 %4917  ;;  %v4326_v4 = vpop.permute.xlu1 %4325 }
 0x4ee   : > { %4372 = vst.msk [vmem:[#allocation3 + $0x8] sm:$0xff] %vm2287_vm5, %v4326_v4  ;;  %v5538_v4 = vld [vmem:[#allocation2 + $0x19a] sm:$0xff] }
 0x4ef   : > { %5584 = vrot.lane.b32.xlu0 %v8986_v51, %s7493_s2 }
 0x4f0   : > { %4353 = vrot.lane.b32.xlu1 %v9070_v25, %s7493_s2 }
 0x4f1   : > { %v5445_v5 = vpop.permute.xlu0 %5444  ;;  %v4794_v7 = vpop.permute.xlu1 %4793  ;;  %v4389_v47 = vld [vmem:[#allocation3 + $0x10] sm:$0xff] }
 0x4f2   : > { %4709 = vst.msk [vmem:[#allocation3 + $0x10] sm:$0xff] %vm485_vm0, %v8801_v41 }
 0x4f3   : > { %4807 = vrot.lane.b32.xlu0 %v9025_v21, %s7492_s13 }
 0x4f4   : > { %5458 = vrot.lane.b32.xlu1 %v9008_v9, %s7492_s13 }
 0x4f5   : > { %v5573_v35 = vpop.permute.xlu0 %5572  ;;  %v4922_v12 = vpop.permute.xlu1 %4921  ;;  %v4388_v13 = vld [vmem:[#allocation3 + $0x8] sm:$0xff] }
 0x4f6   : > { %6883 = vmatmul.mubr.msk.bf16.vlgmr.msra.gmra.mrb[48].mxu1 %vm2332_vm6, %v4388_v13  ;;  %4708 = vst.msk [vmem:[#allocation3 + $0x8] sm:$0xff] %vm485_vm0, %v8762_v57 }
 0x4f7   : > { %4836 = vst.msk [vmem:[#allocation3 + $0x8] sm:$0xff] %vm2158_vm4, %v4790_v26  ;;  %6886 = vmatprep.mubr.msk.bf16.mxu1 %vm2332_vm6, %v4389_v47  ;;  %4935 = vrot.lane.b32.xlu0 %v9033_v29, %s7493_s2 }
 0x4f8   : > { %4964 = vst.msk [vmem:[#allocation3 + $0x8] sm:$0xff] %vm2287_vm5, %v4918_v59  ;;  %5586 = vrot.lane.b32.xlu1 %v9013_v37, %s7493_s2  ;;  %6951 = vmatpush3.bf16.msra.mxu1 %v8984_v60 }
 0x4f9   : > { %v4788_v51 = vpop.permute.xlu0 %4787  ;;  %6991 = vmatprep.subr.msk.bf16.mxu1 %vm2381_vm8, %v7133_v18 }
 0x4fa   : > { %v4202_v9 = vpop.permute.xlu1 %4201  ;;  %4835 = vst.msk [vmem:[#allocation3] sm:$0xff] %vm2158_vm4, %v4788_v51 }
 0x4fb   : > { %4246 = vst.msk [vmem:[#allocation3 + $0x18] sm:$0xff] %vm2158_vm4, %v4202_v9  ;;  %5460 = vrot.lane.b32.xlu0 %v9003_v2, %s7492_s13 }
 0x4fc   : > { %4809 = vrot.lane.b32.xlu1 %v9031_v52, %s7492_s13  ;;  %6953 = vmatpush3.bf16.msra.mxu1 %v5714_v11 }
 0x4fd   : > { %v4916_v37 = vpop.permute.xlu0 %4915 }
 0x4fe   : > { %v4330_v61 = vpop.permute.xlu1 %4329  ;;  %4963 = vst.msk [vmem:[#allocation3] sm:$0xff] %vm2287_vm5, %v4916_v37 }
 0x4ff   : > { %4374 = vst.msk [vmem:[#allocation3 + $0x18] sm:$0xff] %vm2287_vm5, %v4330_v61  ;;  %5588 = vrot.lane.b32.xlu0 %v9019_v16, %s7493_s2  ;;  %v4980_v60 = vld [vmem:[#allocation3 + $0x8] sm:$0xff] }
 0x500   : > { %4937 = vrot.lane.b32.xlu1 %v9039_v38, %s7493_s2  ;;  %5365 = vst.msk [vmem:[#allocation3 + $0x8] sm:$0xff] %vm485_vm0, %v8801_v41 }
 0x501   : > { %v4204_v2 = vpop.permute.xlu0 %4203 }
 0x502   : > { %v5447_v17 = vpop.permute.xlu1 %5446  ;;  %4247 = vst.msk [vmem:[#allocation3 + $0x20] sm:$0xff] %vm2158_vm4, %v4204_v2 }
 0x503   : > { %5493 = vst.msk [vmem:[#allocation3 + $0x8] sm:$0xff] %vm2158_vm4, %v5447_v17  ;;  %4811 = vrot.lane.b32.xlu0 %v9047_v43, %s7492_s13 }
 0x504   : > { %5462 = vrot.lane.b32.xlu1 %v9025_v21, %s7492_s13 }
 0x505   : > { %v4332_v16 = vpop.permute.xlu0 %4331  ;;  %v4979_v23 = vld [vmem:[#allocation3] sm:$0xff] }
 0x506   : > { %v5575_v19 = vpop.permute.xlu1 %5574  ;;  %v4390_v14 = vld [vmem:[#allocation3 + $0x18] sm:$0xff]  ;;  %4375 = vst.msk [vmem:[#allocation3 + $0x20] sm:$0xff] %vm2287_vm5, %v4332_v16  ;;  %6918 = vmatprep.mubr.msk.bf16.mxu0 %vm2332_vm6, %v4979_v23 }
 0x507   : > { %5621 = vst.msk [vmem:[#allocation3 + $0x8] sm:$0xff] %vm2287_vm5, %v5575_v19  ;;  %6887 = vmatmul.mubr.msk.bf16.gmra.mrb[52].mxu1 %vm2332_vm6, %v4390_v14  ;;  %6919 = vmatmul.mubr.msk.bf16.vlgmr.msra.gmra.mrb[80].mxu0 %vm2332_vm6, %v4980_v60 }
 0x508   : > { %4710 = vst.msk [vmem:[#allocation3 + $0x18] sm:$0xff] %vm485_vm0, %v8804_v55  ;;  %5364 = vst.msk [vmem:[#allocation3] sm:$0xff] %vm485_vm0, %v8762_v57  ;;  %4939 = vrot.lane.b32.xlu0 %v9055_v1, %s7493_s2  ;;  %5590 = vrot.lane.b32.xlu1 %v9033_v29, %s7493_s2 }
 0x509   : > { %4838 = vst.msk [vmem:[#allocation3 + $0x18] sm:$0xff] %vm2158_vm4, %v4794_v7  ;;  %5492 = vst.msk [vmem:[#allocation3] sm:$0xff] %vm2158_vm4, %v5445_v5  ;;  %v5449_v41 = vpop.permute.xlu0 %5448  ;;  %v5539_v5 = vld [vmem:[#allocation2 + $0x1a2] sm:$0xff] }
 0x50a   : > { %4966 = vst.msk [vmem:[#allocation3 + $0x18] sm:$0xff] %vm2287_vm5, %v4922_v12  ;;  %5620 = vst.msk [vmem:[#allocation3] sm:$0xff] %vm2287_vm5, %v5573_v35  ;;  %v4798_v21 = vpop.permute.xlu1 %4797  ;;  %v5555_v7 = vpack.c.bf16 %v5539_v5, %v5538_v4 }
 0x50c   : > { %5464 = vrot.lane.b32.xlu0 %v9031_v52, %s7492_s13  ;;  %4813 = vrot.lane.b32.xlu1 %v9041_v15, %s7492_s13 }
 0x50d   : > { %v5577_v57 = vpop.permute.xlu0 %5576  ;;  %v4391_v30 = vld [vmem:[#allocation3 + $0x20] sm:$0xff] }
 0x50e   : > { %v4926_v27 = vpop.permute.xlu1 %4925  ;;  %6890 = vmatprep.mubr.msk.bf16.mxu1 %vm2332_vm6, %v4391_v30  ;;  %4711 = vst.msk [vmem:[#allocation3 + $0x20] sm:$0xff] %vm485_vm0, %v8840_v32 }
 0x510   : > { %5592 = vrot.lane.b32.xlu0 %v9039_v38, %s7493_s2  ;;  %4941 = vrot.lane.b32.xlu1 %v9053_v6, %s7493_s2 }
 0x511   : > { %v4982_v29 = vld [vmem:[#allocation3 + $0x18] sm:$0xff]  ;;  %v4792_v52 = vpop.permute.xlu0 %4791 }
 0x512   : > { %5367 = vst.msk [vmem:[#allocation3 + $0x18] sm:$0xff] %vm485_vm0, %v8840_v32  ;;  %v4206_v24 = vpop.permute.xlu1 %4205  ;;  %v4754_v32 = vld [vmem:[#allocation2 + $0x189] sm:$0xff] }
 0x513   : > { %4837 = vst.msk [vmem:[#allocation3 + $0x10] sm:$0xff] %vm2158_vm4, %v4792_v52  ;;  %4248 = vst.msk [vmem:[#allocation3 + $0x28] sm:$0xff] %vm2158_vm4, %v4206_v24 }
 0x514   : > { %5468 = vrot.lane.b32.xlu0 %v9041_v15, %s7492_s13  ;;  %5466 = vrot.lane.b32.xlu1 %v9047_v43, %s7492_s13  ;;  %v4770_v15 = vpack.c.bf16 %v4754_v32, %v4753_v40  ;;  %v4881_v43 = vld [vmem:[#allocation2 + $0x182] sm:$0xff] }
 0x515   : > { %v4920_v31 = vpop.permute.xlu0 %4919  ;;  %v4898_v53 = vpack.c.bf16 %v4882_v3, %v4881_v43 }
 0x516   : > { %v4334_v10 = vpop.permute.xlu1 %4333  ;;  %4965 = vst.msk [vmem:[#allocation3 + $0x10] sm:$0xff] %vm2287_vm5, %v4920_v31 }
 0x517   : > { %4376 = vst.msk [vmem:[#allocation3 + $0x28] sm:$0xff] %vm2287_vm5, %v4334_v10 }
 0x518   : > { %4815 = vrot.lane.b32.xlu0 %v9062_v22, %s7492_s13  ;;  %5594 = vrot.lane.b32.xlu1 %v9055_v1, %s7493_s2 }
 0x519   : > { %v4208_v38 = vpop.permute.xlu0 %4207 }
 0x51a   : > { %v5451_v39 = vpop.permute.xlu1 %5450  ;;  %4249 = vst.msk [vmem:[#allocation3 + $0x30] sm:$0xff] %vm2158_vm4, %v4208_v38 }
 0x51b   : > { %5495 = vst.msk [vmem:[#allocation3 + $0x18] sm:$0xff] %vm2158_vm4, %v5451_v39 }
 0x51c   : > { %4943 = vrot.lane.b32.xlu0 %v9070_v25, %s7493_s2  ;;  %4817 = vrot.lane.b32.xlu1 %v4770_v15, %s7492_s13 }
 0x51d   : > { %v4336_v48 = vpop.permute.xlu0 %4335  ;;  %v4981_v26 = vld [vmem:[#allocation3 + $0x10] sm:$0xff] }
 0x51e   : > { %v5579_v34 = vpop.permute.xlu1 %5578  ;;  %v4392_v42 = vld [vmem:[#allocation3 + $0x28] sm:$0xff]  ;;  %4377 = vst.msk [vmem:[#allocation3 + $0x30] sm:$0xff] %vm2287_vm5, %v4336_v48  ;;  %6922 = vmatprep.mubr.msk.bf16.mxu0 %vm2332_vm6, %v4981_v26  ;;  %v4689_v26 = vld [vmem:[#allocation2 + $0x180] sm:$0xff] }
 0x51f   : > { %5623 = vst.msk [vmem:[#allocation3 + $0x18] sm:$0xff] %vm2287_vm5, %v5579_v34  ;;  %6891 = vmatmul.mubr.msk.bf16.gmra.mrb[56].mxu1 %vm2332_vm6, %v4392_v42  ;;  %6923 = vmatmul.mubr.msk.bf16.gmra.mrb[84].mxu0 %vm2332_vm6, %v4982_v29  ;;  %v4690_v42 = vld [vmem:[#allocation2 + $0x188] sm:$0xff] }
 0x520   : > { %4712 = vst.msk [vmem:[#allocation3 + $0x28] sm:$0xff] %vm485_vm0, %v8845_v46  ;;  %5366 = vst.msk [vmem:[#allocation3 + $0x10] sm:$0xff] %vm485_vm0, %v8804_v55  ;;  %5596 = vrot.lane.b32.xlu0 %v9053_v6, %s7493_s2  ;;  %4945 = vrot.lane.b32.xlu1 %v4898_v53, %s7493_s2 }
 0x521   : > { %4840 = vst.msk [vmem:[#allocation3 + $0x28] sm:$0xff] %vm2158_vm4, %v4798_v21  ;;  %5494 = vst.msk [vmem:[#allocation3 + $0x10] sm:$0xff] %vm2158_vm4, %v5449_v41  ;;  %v5453_v1 = vpop.permute.xlu0 %5452 }
 0x522   : > { %4968 = vst.msk [vmem:[#allocation3 + $0x28] sm:$0xff] %vm2287_vm5, %v4926_v27  ;;  %5622 = vst.msk [vmem:[#allocation3 + $0x10] sm:$0xff] %vm2287_vm5, %v5577_v57  ;;  %v4802_v54 = vpop.permute.xlu1 %4801 }
 0x524   : > { %5472 = vrot.lane.b32.xlu0 %v4770_v15, %s7492_s13  ;;  %5470 = vrot.lane.b32.xlu1 %v9062_v22, %s7492_s13 }
 0x525   : > { %v5581_v55 = vpop.permute.xlu0 %5580  ;;  %v4393_v50 = vld [vmem:[#allocation3 + $0x30] sm:$0xff] }
 0x526   : > { %v4930_v56 = vpop.permute.xlu1 %4929  ;;  %6894 = vmatprep.mubr.msk.bf16.mxu1 %vm2332_vm6, %v4393_v50  ;;  %4713 = vst.msk [vmem:[#allocation3 + $0x30] sm:$0xff] %vm485_vm0, %v8877_v8 }
 0x528   : > { %5600 = vrot.lane.b32.xlu0 %v4898_v53, %s7493_s2  ;;  %5598 = vrot.lane.b32.xlu1 %v9070_v25, %s7493_s2  ;;  %v9268_v53 = vpack.c.bf16 %v4690_v42, %v4689_v26 }
 0x529   : > { %v4984_v6 = vld [vmem:[#allocation3 + $0x28] sm:$0xff]  ;;  %v4796_v22 = vpop.permute.xlu0 %4795 }
 0x52a   : > { %5369 = vst.msk [vmem:[#allocation3 + $0x28] sm:$0xff] %vm485_vm0, %v8877_v8  ;;  %v4210_v59 = vpop.permute.xlu1 %4209 }
 0x52b   : > { %4839 = vst.msk [vmem:[#allocation3 + $0x20] sm:$0xff] %vm2158_vm4, %v4796_v22  ;;  %4250 = vst.msk [vmem:[#allocation3 + $0x38] sm:$0xff] %vm2158_vm4, %v4210_v59  ;;  %v5638_v59 = vld [vmem:[#allocation3 + $0x10] sm:$0xff] }
 0x52c   : > { %5474 = vrot.lane.b32.xlu1 %v5427_v58, %s7492_s13  ;;  %v5637_v58 = vld [vmem:[#allocation3 + $0x8] sm:$0xff] }
 0x52d   : > { %v4924_v47 = vpop.permute.xlu0 %4923 }
 0x52e   : > { %v4338_v35 = vpop.permute.xlu1 %4337  ;;  %4967 = vst.msk [vmem:[#allocation3 + $0x20] sm:$0xff] %vm2287_vm5, %v4924_v47  ;;  %v5639_v47 = vld [vmem:[#allocation3 + $0x18] sm:$0xff] }
 0x52f   : > { %4378 = vst.msk [vmem:[#allocation3 + $0x38] sm:$0xff] %vm2287_vm5, %v4338_v35 }
 0x530   : > { %5602 = vrot.lane.b32.xlu1 %v5555_v7, %s7493_s2 }
 0x531   : > { %v4212_v8 = vpop.permute.xlu0 %4211 }
 0x532   : > { %v5455_v25 = vpop.permute.xlu1 %5454  ;;  %4251 = vst.msk [vmem:[#allocation3 + $0x40] sm:$0xff] %vm2158_vm4, %v4212_v8 }
 0x533   : > { %5497 = vst.msk [vmem:[#allocation3 + $0x28] sm:$0xff] %vm2158_vm4, %v5455_v25 }
 0x535   : > { %v4340_v12 = vpop.permute.xlu0 %4339  ;;  %v4983_v51 = vld [vmem:[#allocation3 + $0x20] sm:$0xff] }
 0x536   : > { %v5583_v13 = vpop.permute.xlu1 %5582  ;;  %v4394_v18 = vld [vmem:[#allocation3 + $0x38] sm:$0xff]  ;;  %4379 = vst.msk [vmem:[#allocation3 + $0x40] sm:$0xff] %vm2287_vm5, %v4340_v12  ;;  %6926 = vmatprep.mubr.msk.bf16.mxu0 %vm2332_vm6, %v4983_v51 }
 0x537   : > { %5625 = vst.msk [vmem:[#allocation3 + $0x28] sm:$0xff] %vm2287_vm5, %v5583_v13  ;;  %6895 = vmatmul.mubr.msk.bf16.gmra.mrb[60].mxu1 %vm2332_vm6, %v4394_v18  ;;  %6927 = vmatmul.mubr.msk.bf16.gmra.mrb[88].mxu0 %vm2332_vm6, %v4984_v6 }
 0x538   : > { %4714 = vst.msk [vmem:[#allocation3 + $0x38] sm:$0xff] %vm485_vm0, %v8880_v20  ;;  %5368 = vst.msk [vmem:[#allocation3 + $0x20] sm:$0xff] %vm485_vm0, %v8845_v46 }
 0x539   : > { %4842 = vst.msk [vmem:[#allocation3 + $0x38] sm:$0xff] %vm2158_vm4, %v4802_v54  ;;  %5496 = vst.msk [vmem:[#allocation3 + $0x20] sm:$0xff] %vm2158_vm4, %v5453_v1  ;;  %v4800_v9 = vpop.permute.xlu0 %4799 }
 0x53a   : > { %4970 = vst.msk [vmem:[#allocation3 + $0x38] sm:$0xff] %vm2287_vm5, %v4930_v56  ;;  %5624 = vst.msk [vmem:[#allocation3 + $0x20] sm:$0xff] %vm2287_vm5, %v5581_v55  ;;  %v4806_v11 = vpop.permute.xlu1 %4805  ;;  %v5636_v56 = vld [vmem:[#allocation3] sm:$0xff] }
 0x53b   : > { %4841 = vst.msk [vmem:[#allocation3 + $0x30] sm:$0xff] %vm2158_vm4, %v4800_v9 }
 0x53d   : > { %v4928_v37 = vpop.permute.xlu0 %4927  ;;  %v4395_v60 = vld [vmem:[#allocation3 + $0x40] sm:$0xff] }
 0x53e   : > { %v4214_v61 = vpop.permute.xlu1 %4213  ;;  %4969 = vst.msk [vmem:[#allocation3 + $0x30] sm:$0xff] %vm2287_vm5, %v4928_v37  ;;  %6898 = vmatprep.mubr.msk.bf16.mxu1 %vm2332_vm6, %v4395_v60  ;;  %v5641_v51 = vld [vmem:[#allocation3 + $0x28] sm:$0xff] }
 0x53f   : > { %4252 = vst.msk [vmem:[#allocation3 + $0x48] sm:$0xff] %vm2158_vm4, %v4214_v61 }
 0x540   : > { %4715 = vst.msk [vmem:[#allocation3 + $0x40] sm:$0xff] %vm485_vm0, %v8908_v0 }
 0x541   : > { %v4986_v46 = vld [vmem:[#allocation3 + $0x38] sm:$0xff]  ;;  %v4216_v2 = vpop.permute.xlu0 %4215  ;;  %v5640_v25 = vld [vmem:[#allocation3 + $0x20] sm:$0xff] }
 0x542   : > { %5371 = vst.msk [vmem:[#allocation3 + $0x38] sm:$0xff] %vm485_vm0, %v8908_v0  ;;  %v4342_v17 = vpop.permute.xlu1 %4341 }
 0x543   : > { %4253 = vst.msk [vmem:[#allocation3 + $0x50] sm:$0xff] %vm2158_vm4, %v4216_v2 }
 0x544   : > { %4380 = vst.msk [vmem:[#allocation3 + $0x48] sm:$0xff] %vm2287_vm5, %v4342_v17 }
 0x545   : > { %v4344_v16 = vpop.permute.xlu0 %4343  ;;  %v4985_v14 = vld [vmem:[#allocation3 + $0x30] sm:$0xff] }
 0x546   : > { %v4934_v19 = vpop.permute.xlu1 %4933  ;;  %4381 = vst.msk [vmem:[#allocation3 + $0x50] sm:$0xff] %vm2287_vm5, %v4344_v16  ;;  %6930 = vmatprep.mubr.msk.bf16.mxu0 %vm2332_vm6, %v4985_v14 }
 0x547   : > { %5370 = vst.msk [vmem:[#allocation3 + $0x30] sm:$0xff] %vm485_vm0, %v8880_v20  ;;  %6931 = vmatmul.mubr.msk.bf16.gmra.mrb[92].mxu0 %vm2332_vm6, %v4986_v46 }
 0x549   : > { %v4804_v0 = vpop.permute.xlu0 %4803 }
 0x54a   : > { %v4218_v41 = vpop.permute.xlu1 %4217  ;;  %4843 = vst.msk [vmem:[#allocation3 + $0x40] sm:$0xff] %vm2158_vm4, %v4804_v0 }
 0x54b   : > { %v4396_v23 = vld [vmem:[#allocation3 + $0x48] sm:$0xff]  ;;  %4254 = vst.msk [vmem:[#allocation3 + $0x58] sm:$0xff] %vm2158_vm4, %v4218_v41 }
 0x54c   : > { %4716 = vst.msk [vmem:[#allocation3 + $0x48] sm:$0xff] %vm485_vm0, %v8913_v63  ;;  %6899 = vmatmul.mubr.msk.bf16.gmra.mrb[64].mxu1 %vm2332_vm6, %v4396_v23  ;;  %v5346_v41 = vld [vmem:[#allocation2 + $0x198] sm:$0xff] }
 0x54d   : > { %4844 = vst.msk [vmem:[#allocation3 + $0x48] sm:$0xff] %vm2158_vm4, %v4806_v11  ;;  %v4220_v21 = vpop.permute.xlu0 %4219  ;;  %v4397_v57 = vld [vmem:[#allocation3 + $0x50] sm:$0xff] }
 0x54e   : > { %4972 = vst.msk [vmem:[#allocation3 + $0x48] sm:$0xff] %vm2287_vm5, %v4934_v19  ;;  %v4346_v20 = vpop.permute.xlu1 %4345  ;;  %6902 = vmatprep.mubr.msk.bf16.mxu1 %vm2332_vm6, %v4397_v57 }
 0x54f   : > { %4255 = vst.msk [vmem:[#allocation3 + $0x60] sm:$0xff] %vm2158_vm4, %v4220_v21 }
 0x550   : > { %4382 = vst.msk [vmem:[#allocation3 + $0x58] sm:$0xff] %vm2287_vm5, %v4346_v20 }
 0x551   : > { %4717 = vst.msk [vmem:[#allocation3 + $0x50] sm:$0xff] %vm485_vm0, %v8940_v28  ;;  %v4348_v27 = vpop.permute.xlu0 %4347 }
 0x552   : > { %v4224_v30 = vpop.permute.xlu1 %4223  ;;  %4383 = vst.msk [vmem:[#allocation3 + $0x60] sm:$0xff] %vm2287_vm5, %v4348_v27 }
 0x553   : > { %4257 = vst.msk [vmem:[#allocation3 + $0x70] sm:$0xff] %vm2158_vm4, %v4224_v30 }
 0x555   : > { %v4988_v29 = vld [vmem:[#allocation3 + $0x48] sm:$0xff]  ;;  %v4932_v52 = vpop.permute.xlu0 %4931 }
 0x556   : > { %5373 = vst.msk [vmem:[#allocation3 + $0x48] sm:$0xff] %vm485_vm0, %v8940_v28  ;;  %v4222_v24 = vpop.permute.xlu1 %4221 }
 0x557   : > { %v4398_v31 = vld [vmem:[#allocation3 + $0x58] sm:$0xff]  ;;  %4971 = vst.msk [vmem:[#allocation3 + $0x40] sm:$0xff] %vm2287_vm5, %v4932_v52 }
 0x558   : > { %4256 = vst.msk [vmem:[#allocation3 + $0x68] sm:$0xff] %vm2158_vm4, %v4222_v24  ;;  %6903 = vmatmul.mubr.msk.bf16.gmra.mrb[68].mxu1 %vm2332_vm6, %v4398_v31 }
 0x559   : > { %4718 = vst.msk [vmem:[#allocation3 + $0x58] sm:$0xff] %vm485_vm0, %v8943_v36  ;;  %v4352_v10 = vpop.permute.xlu0 %4351  ;;  %v4399_v38 = vld [vmem:[#allocation3 + $0x60] sm:$0xff] }
 0x55a   : > { %v4350_v32 = vpop.permute.xlu1 %4349  ;;  %4385 = vst.msk [vmem:[#allocation3 + $0x70] sm:$0xff] %vm2287_vm5, %v4352_v10  ;;  %6906 = vmatprep.mubr.msk.bf16.mxu1 %vm2332_vm6, %v4399_v38 }
 0x55b   : > { %4384 = vst.msk [vmem:[#allocation3 + $0x68] sm:$0xff] %vm2287_vm5, %v4350_v32 }
 0x55c   : > { %4719 = vst.msk [vmem:[#allocation3 + $0x60] sm:$0xff] %vm485_vm0, %v8962_v49 }
 0x55d   : > { %v5457_v28 = vpop.permute.xlu0 %5456 }
 0x55e   : > { %v4226_v39 = vpop.permute.xlu1 %4225  ;;  %v4987_v40 = vld [vmem:[#allocation3 + $0x40] sm:$0xff]  ;;  %5498 = vst.msk [vmem:[#allocation3 + $0x30] sm:$0xff] %vm2158_vm4, %v5457_v28 }
 0x55f   : > { %4258 = vst.msk [vmem:[#allocation3 + $0x78] sm:$0xff] %vm2158_vm4, %v4226_v39  ;;  %6934 = vmatprep.mubr.msk.bf16.mxu0 %vm2332_vm6, %v4987_v40 }
 0x560   : > { %5372 = vst.msk [vmem:[#allocation3 + $0x40] sm:$0xff] %vm485_vm0, %v8913_v63  ;;  %6935 = vmatmul.mubr.msk.bf16.gmra.mrb[96].mxu0 %vm2332_vm6, %v4988_v29 }
 0x561   : > { %v5585_v15 = vpop.permute.xlu0 %5584  ;;  %v4401_v48 = vld [vmem:[#allocation3 + $0x70] sm:$0xff] }
 0x562   : > { %v4354_v43 = vpop.permute.xlu1 %4353  ;;  %v4400_v3 = vld [vmem:[#allocation3 + $0x68] sm:$0xff]  ;;  %5626 = vst.msk [vmem:[#allocation3 + $0x30] sm:$0xff] %vm2287_vm5, %v5585_v15 }
 0x563   : > { %4386 = vst.msk [vmem:[#allocation3 + $0x78] sm:$0xff] %vm2287_vm5, %v4354_v43  ;;  %6907 = vmatmul.mubr.msk.bf16.gmra.mrb[72].mxu1 %vm2332_vm6, %v4400_v3 }
 0x564   : > { %4720 = vst.msk [vmem:[#allocation3 + $0x68] sm:$0xff] %vm485_vm0, %v8960_v33  ;;  %4721 = vst.msk [vmem:[#allocation3 + $0x70] sm:$0xff] %vm485_vm0, %v8974_v44  ;;  %6910 = vmatprep.mubr.msk.bf16.mxu1 %vm2332_vm6, %v4401_v48 }
 0x565   : > { %v4808_v63 = vpop.permute.xlu0 %4807 }
 0x566   : > { %v5459_v34 = vpop.permute.xlu1 %5458  ;;  %4845 = vst.msk [vmem:[#allocation3 + $0x50] sm:$0xff] %vm2158_vm4, %v4808_v63 }
 0x567   : > { %5499 = vst.msk [vmem:[#allocation3 + $0x38] sm:$0xff] %vm2158_vm4, %v5459_v34 }
 0x569   : > { %v4936_v1 = vpop.permute.xlu0 %4935  ;;  %v5642_v11 = vld [vmem:[#allocation3 + $0x30] sm:$0xff] }
 0x56a   : > { %v4402_v54 = vld [vmem:[#allocation3 + $0x78] sm:$0xff]  ;;  %4973 = vst.msk [vmem:[#allocation3 + $0x50] sm:$0xff] %vm2287_vm5, %v4936_v1  ;;  %v5587_v55 = vpop.permute.xlu1 %5586 }
 0x56b   : > { %6911 = vmatmul.mubr.msk.bf16.gmra.mrb[76].mxu1 %vm2332_vm6, %v4402_v54  ;;  %4722 = vst.msk [vmem:[#allocation3 + $0x78] sm:$0xff] %vm485_vm0, %v9268_v53 }
 0x56c   : > { %5627 = vst.msk [vmem:[#allocation3 + $0x38] sm:$0xff] %vm2287_vm5, %v5587_v55  ;;  %6954 = vmatprep.mubr.msk.bf16.mxu1 %vm2332_vm6, %v5636_v56 }
 0x56d   : > { %v5461_v50 = vpop.permute.xlu0 %5460 }
 0x56e   : > { %5500 = vst.msk [vmem:[#allocation3 + $0x40] sm:$0xff] %vm2158_vm4, %v5461_v50  ;;  %v4810_v62 = vpop.permute.xlu1 %4809 }
 0x56f   : > { %4846 = vst.msk [vmem:[#allocation3 + $0x58] sm:$0xff] %vm2158_vm4, %v4810_v62 }
 0x571   : > { %v5589_v45 = vpop.permute.xlu0 %5588  ;;  %v4989_v6 = vld [vmem:[#allocation3 + $0x50] sm:$0xff] }
 0x572   : > { %5628 = vst.msk [vmem:[#allocation3 + $0x40] sm:$0xff] %vm2287_vm5, %v5589_v45  ;;  %v4938_v22 = vpop.permute.xlu1 %4937  ;;  %6938 = vmatprep.mubr.msk.bf16.mxu0 %vm2332_vm6, %v4989_v6 }
 0x573   : > { %6955 = vmatmul.mubr.msk.bf16.vlgmr.msra.gmra.mrb[80].mxu1 %vm2332_vm6, %v5637_v58  ;;  %5374 = vst.msk [vmem:[#allocation3 + $0x50] sm:$0xff] %vm485_vm0, %v8943_v36  ;;  %v5643_v60 = vld [vmem:[#allocation3 + $0x38] sm:$0xff] }
 0x574   : > { %4974 = vst.msk [vmem:[#allocation3 + $0x58] sm:$0xff] %vm2287_vm5, %v4938_v22  ;;  %6958 = vmatprep.mubr.msk.bf16.mxu1 %vm2332_vm6, %v5638_v59 }
 0x575   : > { %v4812_v4 = vpop.permute.xlu0 %4811 }
 0x576   : > { %4847 = vst.msk [vmem:[#allocation3 + $0x60] sm:$0xff] %vm2158_vm4, %v4812_v4  ;;  %v5463_v5 = vpop.permute.xlu1 %5462 }
 0x577   : > { %5501 = vst.msk [vmem:[#allocation3 + $0x48] sm:$0xff] %vm2158_vm4, %v5463_v5 }
 0x579   : > { %v5644_v17 = vld [vmem:[#allocation3 + $0x40] sm:$0xff] }
 0x57a   : > { %v4940_v7 = vpop.permute.xlu0 %4939  ;;  %v5591_v35 = vpop.permute.xlu1 %5590 }
 0x57b   : > { %4975 = vst.msk [vmem:[#allocation3 + $0x60] sm:$0xff] %vm2287_vm5, %v4940_v7  ;;  %v4990_v8 = vld [vmem:[#allocation3 + $0x58] sm:$0xff]  ;;  %6959 = vmatmul.mubr.msk.bf16.gmra.mrb[84].mxu1 %vm2332_vm6, %v5639_v47  ;;  %5629 = vst.msk [vmem:[#allocation3 + $0x48] sm:$0xff] %vm2287_vm5, %v5591_v35 }
 0x57c   : > { %6939 = vmatmul.mubr.msk.bf16.gmra.mrb[100].mxu0 %vm2332_vm6, %v4990_v8  ;;  %6962 = vmatprep.mubr.msk.bf16.mxu1 %vm2332_vm6, %v5640_v25  ;;  %5375 = vst.msk [vmem:[#allocation3 + $0x58] sm:$0xff] %vm485_vm0, %v8962_v49 }
 0x57e   : > { %v5465_v36 = vpop.permute.xlu0 %5464  ;;  %v4814_v12 = vpop.permute.xlu1 %4813 }
 0x57f   : > { %5502 = vst.msk [vmem:[#allocation3 + $0x50] sm:$0xff] %vm2158_vm4, %v5465_v36  ;;  %4848 = vst.msk [vmem:[#allocation3 + $0x68] sm:$0xff] %vm2158_vm4, %v4814_v12 }
 0x582   : > { %v5593_v13 = vpop.permute.xlu0 %5592  ;;  %v4991_v18 = vld [vmem:[#allocation3 + $0x60] sm:$0xff]  ;;  %v4942_v9 = vpop.permute.xlu1 %4941  ;;  %v5645_v14 = vld [vmem:[#allocation3 + $0x48] sm:$0xff] }
 0x583   : > { %5630 = vst.msk [vmem:[#allocation3 + $0x50] sm:$0xff] %vm2287_vm5, %v5593_v13  ;;  %6942 = vmatprep.mubr.msk.bf16.mxu0 %vm2332_vm6, %v4991_v18  ;;  %6963 = vmatmul.mubr.msk.bf16.gmra.mrb[88].mxu1 %vm2332_vm6, %v5641_v51  ;;  %4976 = vst.msk [vmem:[#allocation3 + $0x68] sm:$0xff] %vm2287_vm5, %v4942_v9 }
 0x584   : > { %5376 = vst.msk [vmem:[#allocation3 + $0x60] sm:$0xff] %vm485_vm0, %v8960_v33  ;;  %6966 = vmatprep.mubr.msk.bf16.mxu1 %vm2332_vm6, %v5642_v11 }
 0x586   : > { %v5469_v49 = vpop.permute.xlu0 %5468  ;;  %v5467_v37 = vpop.permute.xlu1 %5466 }
 0x587   : > { %5504 = vst.msk [vmem:[#allocation3 + $0x60] sm:$0xff] %vm2158_vm4, %v5469_v49  ;;  %5503 = vst.msk [vmem:[#allocation3 + $0x58] sm:$0xff] %vm2158_vm4, %v5467_v37 }
 0x58a   : > { %v4816_v61 = vpop.permute.xlu0 %4815  ;;  %v5595_v46 = vpop.permute.xlu1 %5594  ;;  %v4992_v2 = vld [vmem:[#allocation3 + $0x68] sm:$0xff]  ;;  %v5646_v0 = vld [vmem:[#allocation3 + $0x50] sm:$0xff] }
 0x58b   : > { %4849 = vst.msk [vmem:[#allocation3 + $0x70] sm:$0xff] %vm2158_vm4, %v4816_v61  ;;  %6967 = vmatmul.mubr.msk.bf16.gmra.mrb[92].mxu1 %vm2332_vm6, %v5643_v60  ;;  %6943 = vmatmul.mubr.msk.bf16.gmra.mrb[104].mxu0 %vm2332_vm6, %v4992_v2 }
 0x58c   : > { %5631 = vst.msk [vmem:[#allocation3 + $0x58] sm:$0xff] %vm2287_vm5, %v5595_v46  ;;  %6970 = vmatprep.mubr.msk.bf16.mxu1 %vm2332_vm6, %v5644_v17 }
 0x58d   : > { %5377 = vst.msk [vmem:[#allocation3 + $0x68] sm:$0xff] %vm485_vm0, %v8974_v44  ;;  %v5347_v44 = vld [vmem:[#allocation2 + $0x1a0] sm:$0xff] }
 0x58e   : > { %v4944_v33 = vpop.permute.xlu0 %4943  ;;  %v4818_v16 = vpop.permute.xlu1 %4817  ;;  %v5363_v27 = vpack.c.bf16 %v5347_v44, %v5346_v41 }
 0x58f   : > { %4977 = vst.msk [vmem:[#allocation3 + $0x70] sm:$0xff] %vm2287_vm5, %v4944_v33 }
 0x590   : > { %4850 = vst.msk [vmem:[#allocation3 + $0x78] sm:$0xff] %vm2158_vm4, %v4818_v16 }
 0x592   : > { %v5597_v19 = vpop.permute.xlu0 %5596  ;;  %v4946_v23 = vpop.permute.xlu1 %4945 }
 0x593   : > { %5632 = vst.msk [vmem:[#allocation3 + $0x60] sm:$0xff] %vm2287_vm5, %v5597_v19  ;;  %6971 = vmatmul.mubr.msk.bf16.gmra.mrb[96].mxu1 %vm2332_vm6, %v5645_v14  ;;  %4978 = vst.msk [vmem:[#allocation3 + $0x78] sm:$0xff] %vm2287_vm5, %v4946_v23  ;;  %v5647_v29 = vld [vmem:[#allocation3 + $0x58] sm:$0xff] }
 0x594   : > { %6974 = vmatprep.mubr.msk.bf16.mxu1 %vm2332_vm6, %v5646_v0 }
 0x596   : > { %v5473_v21 = vpop.permute.xlu0 %5472  ;;  %v4993_v20 = vld [vmem:[#allocation3 + $0x70] sm:$0xff]  ;;  %v5471_v57 = vpop.permute.xlu1 %5470 }
 0x597   : > { %5378 = vst.msk [vmem:[#allocation3 + $0x70] sm:$0xff] %vm485_vm0, %v9268_v53  ;;  %6946 = vmatprep.mubr.msk.bf16.mxu0 %vm2332_vm6, %v4993_v20 }
 0x598   : > { %5506 = vst.msk [vmem:[#allocation3 + $0x70] sm:$0xff] %vm2158_vm4, %v5473_v21  ;;  %5505 = vst.msk [vmem:[#allocation3 + $0x68] sm:$0xff] %vm2158_vm4, %v5471_v57 }
 0x59a   : > { %v5601_v30 = vpop.permute.xlu0 %5600  ;;  %v5648_v52 = vld [vmem:[#allocation3 + $0x60] sm:$0xff]  ;;  %v5599_v24 = vpop.permute.xlu1 %5598  ;;  %v4994_v31 = vld [vmem:[#allocation3 + $0x78] sm:$0xff] }
 0x59b   : > { %5634 = vst.msk [vmem:[#allocation3 + $0x70] sm:$0xff] %vm2287_vm5, %v5601_v30  ;;  %6975 = vmatmul.mubr.msk.bf16.gmra.mrb[100].mxu1 %vm2332_vm6, %v5647_v29  ;;  %5633 = vst.msk [vmem:[#allocation3 + $0x68] sm:$0xff] %vm2287_vm5, %v5599_v24  ;;  %6947 = vmatmul.mubr.msk.bf16.gmra.mrb[108].mxu0 %vm2332_vm6, %v4994_v31 }
 0x59c   : > { %6978 = vmatprep.mubr.msk.bf16.mxu1 %vm2332_vm6, %v5648_v52  ;;  %5379 = vst.msk [vmem:[#allocation3 + $0x78] sm:$0xff] %vm485_vm0, %v5363_v27 }
 0x59e   : > { %v5475_v10 = vpop.permute.xlu1 %5474 }
 0x59f   : > { %5507 = vst.msk [vmem:[#allocation3 + $0x78] sm:$0xff] %vm2158_vm4, %v5475_v10 }
 0x5a2   : > { %v5650_v32 = vld [vmem:[#allocation3 + $0x70] sm:$0xff]  ;;  %v5603_v38 = vpop.permute.xlu1 %5602  ;;  %v5649_v28 = vld [vmem:[#allocation3 + $0x68] sm:$0xff] }
 0x5a3   : > { %5635 = vst.msk [vmem:[#allocation3 + $0x78] sm:$0xff] %vm2287_vm5, %v5603_v38  ;;  %6979 = vmatmul.mubr.msk.bf16.gmra.mrb[104].mxu1 %vm2332_vm6, %v5649_v28 }
 0x5a4   : > { %6982 = vmatprep.mubr.msk.bf16.mxu1 %vm2332_vm6, %v5650_v32 }
 0x5aa   : > { %v5651_v39 = vld [vmem:[#allocation3 + $0x78] sm:$0xff] }
 0x5ab   : > { %6983 = vmatmul.mubr.msk.bf16.gmra.mrb[108].mxu1 %vm2332_vm6, %v5651_v39 }
 0x5c9   : > { %v6884_v40 = vpop.f32.mrb[48].mxu1 }
 0x5ca   : > { %4629 = vst.msk [vmem:[#allocation4 + $0x10] sm:$0xff] %vm485_vm0, %v6884_v40  ;;  %v4500_v15 = vpop.f32.mrb[49].mxu1 }
 0x5cb   : > { %4627 = vst.msk [vmem:[#allocation4] sm:$0xff] %vm485_vm0, %v4500_v15  ;;  %v6885_v43 = vpop.f32.mrb[50].mxu1 }
 0x5cc   : > { %4630 = vst.msk [vmem:[#allocation4 + $0x18] sm:$0xff] %vm485_vm0, %v6885_v43  ;;  %v4503_v3 = vpop.f32.mrb[51].mxu1 }
 0x5cd   : > { %4628 = vst.msk [vmem:[#allocation4 + $0x8] sm:$0xff] %vm485_vm0, %v4503_v3 }
 0x5d1   : > { %v5222_v42 = vld [vmem:[#allocation4 + $0x10] sm:$0xff] }
 0x5d2   : > { %v5220_v54 = vld [vmem:[#allocation4] sm:$0xff] }
 0x5d3   : > { %v5223_v62 = vld [vmem:[#allocation4 + $0x18] sm:$0xff] }
 0x5d4   : > { %v5221_v58 = vld [vmem:[#allocation4 + $0x8] sm:$0xff] }
 0x5da   : > { %v6888_v48 = vpop.f32.mrb[52].mxu1  ;;  %v6920_v34 = vpop.f32.mrb[80].mxu0 }
 0x5db   : > { %4633 = vst.msk [vmem:[#allocation4 + $0x30] sm:$0xff] %vm485_vm0, %v6888_v48  ;;  %v4516_v63 = vpop.f32.mrb[53].mxu1  ;;  %v5254_v26 = vadd.f32 %v6920_v34, %v5222_v42  ;;  %v5093_v1 = vpop.f32.mrb[81].mxu0 }
 0x5dc   : > { %4631 = vst.msk [vmem:[#allocation4 + $0x20] sm:$0xff] %vm485_vm0, %v4516_v63  ;;  %v6889_v53 = vpop.f32.mrb[54].mxu1  ;;  %v5252_v55 = vadd.f32 %v5220_v54, %v5093_v1  ;;  %v6921_v50 = vpop.f32.mrb[82].mxu0 }
 0x5dd   : > { %4634 = vst.msk [vmem:[#allocation4 + $0x38] sm:$0xff] %vm485_vm0, %v6889_v53  ;;  %v4519_v56 = vpop.f32.mrb[55].mxu1  ;;  %5286 = vst.msk [vmem:[#allocation4 + $0x10] sm:$0xff] %vm485_vm0, %v5254_v26  ;;  %v5255_v45 = vadd.f32 %v6921_v50, %v5223_v62  ;;  %v5096_v6 = vpop.f32.mrb[83].mxu0 }
 0x5de   : > { %4632 = vst.msk [vmem:[#allocation4 + $0x28] sm:$0xff] %vm485_vm0, %v4519_v56  ;;  %5284 = vst.msk [vmem:[#allocation4] sm:$0xff] %vm485_vm0, %v5252_v55  ;;  %v5253_v22 = vadd.f32 %v5221_v58, %v5096_v6 }
 0x5df   : > { %5287 = vst.msk [vmem:[#allocation4 + $0x18] sm:$0xff] %vm485_vm0, %v5255_v45 }
 0x5e0   : > { %5285 = vst.msk [vmem:[#allocation4 + $0x8] sm:$0xff] %vm485_vm0, %v5253_v22 }
 0x5e2   : > { %v5226_v7 = vld [vmem:[#allocation4 + $0x30] sm:$0xff] }
 0x5e3   : > { %v5224_v25 = vld [vmem:[#allocation4 + $0x20] sm:$0xff] }
 0x5e4   : > { %v5227_v18 = vld [vmem:[#allocation4 + $0x38] sm:$0xff] }
 0x5e5   : > { %v5225_v11 = vld [vmem:[#allocation4 + $0x28] sm:$0xff] }
 0x5f2   : > { %v6892_v59 = vpop.f32.mrb[56].mxu1  ;;  %v6924_v5 = vpop.f32.mrb[84].mxu0 }
 0x5f3   : > { %4637 = vst.msk [vmem:[#allocation4 + $0x50] sm:$0xff] %vm485_vm0, %v6892_v59  ;;  %v4532_v4 = vpop.f32.mrb[57].mxu1  ;;  %v5258_v47 = vadd.f32 %v6924_v5, %v5226_v7  ;;  %v5109_v8 = vpop.f32.mrb[85].mxu0 }
 0x5f4   : > { %4635 = vst.msk [vmem:[#allocation4 + $0x40] sm:$0xff] %vm485_vm0, %v4532_v4  ;;  %v6893_v35 = vpop.f32.mrb[58].mxu1  ;;  %v5256_v36 = vadd.f32 %v5224_v25, %v5109_v8  ;;  %v6925_v13 = vpop.f32.mrb[86].mxu0 }
 0x5f5   : > { %4638 = vst.msk [vmem:[#allocation4 + $0x58] sm:$0xff] %vm485_vm0, %v6893_v35  ;;  %v4535_v12 = vpop.f32.mrb[59].mxu1  ;;  %5290 = vst.msk [vmem:[#allocation4 + $0x30] sm:$0xff] %vm485_vm0, %v5258_v47  ;;  %v5259_v51 = vadd.f32 %v6925_v13, %v5227_v18  ;;  %v5112_v9 = vpop.f32.mrb[87].mxu0 }
 0x5f6   : > { %4636 = vst.msk [vmem:[#allocation4 + $0x48] sm:$0xff] %vm485_vm0, %v4535_v12  ;;  %5288 = vst.msk [vmem:[#allocation4 + $0x20] sm:$0xff] %vm485_vm0, %v5256_v36  ;;  %v5257_v49 = vadd.f32 %v5225_v11, %v5112_v9  ;;  %v5879_v12 = vld [vmem:[#allocation4 + $0x10] sm:$0xff] }
 0x5f7   : > { %5291 = vst.msk [vmem:[#allocation4 + $0x38] sm:$0xff] %vm485_vm0, %v5259_v51  ;;  %v5877_v51 = vld [vmem:[#allocation4] sm:$0xff] }
 0x5f8   : > { %5289 = vst.msk [vmem:[#allocation4 + $0x28] sm:$0xff] %vm485_vm0, %v5257_v49  ;;  %v5880_v49 = vld [vmem:[#allocation4 + $0x18] sm:$0xff] }
 0x5fa   : > { %v5230_v46 = vld [vmem:[#allocation4 + $0x50] sm:$0xff] }
 0x5fb   : > { %v5228_v16 = vld [vmem:[#allocation4 + $0x40] sm:$0xff] }
 0x5fc   : > { %v5231_v0 = vld [vmem:[#allocation4 + $0x58] sm:$0xff] }
 0x5fd   : > { %v5229_v21 = vld [vmem:[#allocation4 + $0x48] sm:$0xff] }
 0x60a   : > { %v6896_v37 = vpop.f32.mrb[60].mxu1  ;;  %v6928_v60 = vpop.f32.mrb[88].mxu0 }
 0x60b   : > { %4641 = vst.msk [vmem:[#allocation4 + $0x70] sm:$0xff] %vm485_vm0, %v6896_v37  ;;  %v4548_v61 = vpop.f32.mrb[61].mxu1  ;;  %v5262_v2 = vadd.f32 %v6928_v60, %v5230_v46  ;;  %v5125_v33 = vpop.f32.mrb[89].mxu0  ;;  %v5878_v60 = vld [vmem:[#allocation4 + $0x8] sm:$0xff] }
 0x60c   : > { %4639 = vst.msk [vmem:[#allocation4 + $0x60] sm:$0xff] %vm485_vm0, %v4548_v61  ;;  %v6897_v17 = vpop.f32.mrb[62].mxu1  ;;  %v5260_v19 = vadd.f32 %v5228_v16, %v5125_v33  ;;  %v6929_v23 = vpop.f32.mrb[90].mxu0 }
 0x60d   : > { %4642 = vst.msk [vmem:[#allocation4 + $0x78] sm:$0xff] %vm485_vm0, %v6897_v17  ;;  %v4551_v14 = vpop.f32.mrb[63].mxu1  ;;  %5294 = vst.msk [vmem:[#allocation4 + $0x50] sm:$0xff] %vm485_vm0, %v5262_v2  ;;  %v5263_v41 = vadd.f32 %v6929_v23, %v5231_v0  ;;  %v5128_v44 = vpop.f32.mrb[91].mxu0  ;;  %v5883_v17 = vld [vmem:[#allocation4 + $0x30] sm:$0xff]  ;;  %v5881_v23 = vld [vmem:[#allocation4 + $0x20] sm:$0xff] }
 0x60e   : > { %4640 = vst.msk [vmem:[#allocation4 + $0x68] sm:$0xff] %vm485_vm0, %v4551_v14  ;;  %5292 = vst.msk [vmem:[#allocation4 + $0x40] sm:$0xff] %vm485_vm0, %v5260_v19  ;;  %v5261_v20 = vadd.f32 %v5229_v21, %v5128_v44  ;;  %v9390_v0 = vld [vmem:[#allocation17] ss:$0 sm:$0xff] }
 0x60f   : > { %5295 = vst.msk [vmem:[#allocation4 + $0x58] sm:$0xff] %vm485_vm0, %v5263_v41 }
 0x610   : > { %5293 = vst.msk [vmem:[#allocation4 + $0x48] sm:$0xff] %vm485_vm0, %v5261_v20 }
 0x612   : > { %v5234_v27 = vld [vmem:[#allocation4 + $0x70] sm:$0xff] }
 0x613   : > { %v5232_v52 = vld [vmem:[#allocation4 + $0x60] sm:$0xff] }
 0x614   : > { %v5235_v10 = vld [vmem:[#allocation4 + $0x78] sm:$0xff] }
 0x615   : > { %v5233_v39 = vld [vmem:[#allocation4 + $0x68] sm:$0xff] }
 0x61a   : > { %v6932_v57 = vpop.f32.mrb[92].mxu0 }
 0x61b   : > { %v5266_v30 = vadd.f32 %v6932_v57, %v5234_v27  ;;  %v5141_v29 = vpop.f32.mrb[93].mxu0  ;;  %v5884_v27 = vld [vmem:[#allocation4 + $0x38] sm:$0xff] }
 0x61c   : > { %v5264_v24 = vadd.f32 %v5232_v52, %v5141_v29  ;;  %v6933_v31 = vpop.f32.mrb[94].mxu0 }
 0x61d   : > { %5298 = vst.msk [vmem:[#allocation4 + $0x70] sm:$0xff] %vm485_vm0, %v5266_v30  ;;  %v5267_v32 = vadd.f32 %v6933_v31, %v5235_v10  ;;  %v5144_v28 = vpop.f32.mrb[95].mxu0  ;;  %v9392_v30 = vld [vmem:[#allocation19] ss:$0 sm:$0xff] }
 0x61e   : > { %5296 = vst.msk [vmem:[#allocation4 + $0x60] sm:$0xff] %vm485_vm0, %v5264_v24  ;;  %v5265_v40 = vadd.f32 %v5233_v39, %v5144_v28 }
 0x61f   : > { %v6900_v38 = vpop.f32.mrb[64].mxu1  ;;  %5299 = vst.msk [vmem:[#allocation4 + $0x78] sm:$0xff] %vm485_vm0, %v5267_v32  ;;  %v5882_v32 = vld [vmem:[#allocation4 + $0x28] sm:$0xff] }
 0x620   : > { %4645 = vst.msk [vmem:[#allocation4 + $0x90] sm:$0xff] %vm485_vm0, %v6900_v38  ;;  %v4564_v15 = vpop.f32.mrb[65].mxu1  ;;  %5297 = vst.msk [vmem:[#allocation4 + $0x68] sm:$0xff] %vm485_vm0, %v5265_v40 }
 0x621   : > { %4643 = vst.msk [vmem:[#allocation4 + $0x80] sm:$0xff] %vm485_vm0, %v4564_v15  ;;  %v6901_v43 = vpop.f32.mrb[66].mxu1 }
 0x622   : > { %4646 = vst.msk [vmem:[#allocation4 + $0x98] sm:$0xff] %vm485_vm0, %v6901_v43  ;;  %v4567_v3 = vpop.f32.mrb[67].mxu1 }
 0x623   : > { %4644 = vst.msk [vmem:[#allocation4 + $0x88] sm:$0xff] %vm485_vm0, %v4567_v3 }
 0x627   : > { %v5238_v53 = vld [vmem:[#allocation4 + $0x90] sm:$0xff] }
 0x628   : > { %v5236_v55 = vld [vmem:[#allocation4 + $0x80] sm:$0xff] }
 0x629   : > { %v5239_v62 = vld [vmem:[#allocation4 + $0x98] sm:$0xff] }
 0x62a   : > { %v5237_v22 = vld [vmem:[#allocation4 + $0x88] sm:$0xff] }
 0x62b   : > { %v6904_v48 = vpop.f32.mrb[68].mxu1 }
 0x62c   : > { %4649 = vst.msk [vmem:[#allocation4 + $0xb0] sm:$0xff] %vm485_vm0, %v6904_v48  ;;  %v4580_v63 = vpop.f32.mrb[69].mxu1 }
 0x62d   : > { %4647 = vst.msk [vmem:[#allocation4 + $0xa0] sm:$0xff] %vm485_vm0, %v4580_v63  ;;  %v6905_v34 = vpop.f32.mrb[70].mxu1 }
 0x62e   : > { %4650 = vst.msk [vmem:[#allocation4 + $0xb8] sm:$0xff] %vm485_vm0, %v6905_v34  ;;  %v4583_v42 = vpop.f32.mrb[71].mxu1 }
 0x62f   : > { %4648 = vst.msk [vmem:[#allocation4 + $0xa8] sm:$0xff] %vm485_vm0, %v4583_v42 }
 0x633   : > { %v6936_v26 = vpop.f32.mrb[96].mxu0  ;;  %v5242_v16 = vld [vmem:[#allocation4 + $0xb0] sm:$0xff] }
 0x634   : > { %v5270_v1 = vadd.f32 %v6936_v26, %v5238_v53  ;;  %v5157_v54 = vpop.f32.mrb[97].mxu0  ;;  %v5240_v21 = vld [vmem:[#allocation4 + $0xa0] sm:$0xff]  ;;  %v5887_v53 = vld [vmem:[#allocation4 + $0x50] sm:$0xff] }
 0x635   : > { %v5268_v56 = vadd.f32 %v5236_v55, %v5157_v54  ;;  %v6937_v50 = vpop.f32.mrb[98].mxu0  ;;  %v5243_v24 = vld [vmem:[#allocation4 + $0xb8] sm:$0xff] }
 0x636   : > { %5302 = vst.msk [vmem:[#allocation4 + $0x90] sm:$0xff] %vm485_vm0, %v5270_v1  ;;  %v5271_v45 = vadd.f32 %v6937_v50, %v5239_v62  ;;  %v6908_v6 = vpop.f32.mrb[72].mxu1  ;;  %v5160_v58 = vpop.f32.mrb[99].mxu0  ;;  %v5241_v40 = vld [vmem:[#allocation4 + $0xa8] sm:$0xff] }
 0x637   : > { %5300 = vst.msk [vmem:[#allocation4 + $0x80] sm:$0xff] %vm485_vm0, %v5268_v56  ;;  %4653 = vst.msk [vmem:[#allocation4 + $0xd0] sm:$0xff] %vm485_vm0, %v6908_v6  ;;  %v5269_v59 = vadd.f32 %v5237_v22, %v5160_v58  ;;  %v4596_v4 = vpop.f32.mrb[73].mxu1  ;;  %v5888_v22 = vld [vmem:[#allocation4 + $0x58] sm:$0xff] }
 0x638   : > { %5303 = vst.msk [vmem:[#allocation4 + $0x98] sm:$0xff] %vm485_vm0, %v5271_v45  ;;  %4651 = vst.msk [vmem:[#allocation4 + $0xc0] sm:$0xff] %vm485_vm0, %v4596_v4  ;;  %v6909_v5 = vpop.f32.mrb[74].mxu1  ;;  %v5885_v45 = vld [vmem:[#allocation4 + $0x40] sm:$0xff] }
 0x639   : > { %5301 = vst.msk [vmem:[#allocation4 + $0x88] sm:$0xff] %vm485_vm0, %v5269_v59  ;;  %4654 = vst.msk [vmem:[#allocation4 + $0xd8] sm:$0xff] %vm485_vm0, %v6909_v5  ;;  %v4599_v7 = vpop.f32.mrb[75].mxu1  ;;  %v5886_v5 = vld [vmem:[#allocation4 + $0x48] sm:$0xff] }
 0x63a   : > { %4652 = vst.msk [vmem:[#allocation4 + $0xc8] sm:$0xff] %vm485_vm0, %v4599_v7 }
 0x63e   : > { %v6912_v47 = vpop.f32.mrb[76].mxu1 }
 0x63f   : > { %4657 = vst.msk [vmem:[#allocation4 + $0xf0] sm:$0xff] %vm485_vm0, %v6912_v47  ;;  %v4612_v35 = vpop.f32.mrb[77].mxu1 }
 0x640   : > { %4655 = vst.msk [vmem:[#allocation4 + $0xe0] sm:$0xff] %vm485_vm0, %v4612_v35  ;;  %v6913_v8 = vpop.f32.mrb[78].mxu1 }
 0x641   : > { %4658 = vst.msk [vmem:[#allocation4 + $0xf8] sm:$0xff] %vm485_vm0, %v6913_v8  ;;  %v4615_v25 = vpop.f32.mrb[79].mxu1 }
 0x642   : > { %4656 = vst.msk [vmem:[#allocation4 + $0xe8] sm:$0xff] %vm485_vm0, %v4615_v25 }
 0x646   : > { %v6956_v36 = vpop.f32.mrb[80].mxu1 }
 0x647   : > { %v5911_v13 = vadd.f32 %v6956_v36, %v5879_v12  ;;  %v5750_v18 = vpop.f32.mrb[81].mxu1 }
 0x648   : > { %v5909_v9 = vadd.f32 %v5877_v51, %v5750_v18  ;;  %v6957_v11 = vpop.f32.mrb[82].mxu1 }
 0x649   : > { %5943 = vst.msk [vmem:[#allocation4 + $0x10] sm:$0xff] %vm485_vm0, %v5911_v13  ;;  %v5912_v37 = vadd.f32 %v6957_v11, %v5880_v49  ;;  %v5753_v61 = vpop.f32.mrb[83].mxu1  ;;  %v5891_v13 = vld [vmem:[#allocation4 + $0x70] sm:$0xff] }
 0x64a   : > { %5941 = vst.msk [vmem:[#allocation4] sm:$0xff] %vm485_vm0, %v5909_v9  ;;  %v5910_v46 = vadd.f32 %v5878_v60, %v5753_v61  ;;  %v5246_v11 = vld [vmem:[#allocation4 + $0xd0] sm:$0xff]  ;;  %v5889_v61 = vld [vmem:[#allocation4 + $0x60] sm:$0xff] }
 0x64b   : > { %5944 = vst.msk [vmem:[#allocation4 + $0x18] sm:$0xff] %vm485_vm0, %v5912_v37 }
 0x64c   : > { %5942 = vst.msk [vmem:[#allocation4 + $0x8] sm:$0xff] %vm485_vm0, %v5910_v46 }
 0x64e   : > { %v6960_v2 = vpop.f32.mrb[84].mxu1 }
 0x64f   : > { %v6940_v33 = vpop.f32.mrb[100].mxu0  ;;  %v5915_v19 = vadd.f32 %v6960_v2, %v5883_v17  ;;  %v5766_v14 = vpop.f32.mrb[85].mxu1  ;;  %v5244_v17 = vld [vmem:[#allocation4 + $0xc0] sm:$0xff] }
 0x650   : > { %v5274_v41 = vadd.f32 %v6940_v33, %v5242_v16  ;;  %v5173_v44 = vpop.f32.mrb[101].mxu0  ;;  %v5913_v20 = vadd.f32 %v5881_v23, %v5766_v14  ;;  %v6961_v57 = vpop.f32.mrb[86].mxu1  ;;  %v5975_v63 = vld [vmem:[#allocation4 + $0x10] sm:$0xff] }
 0x651   : > { %5947 = vst.msk [vmem:[#allocation4 + $0x30] sm:$0xff] %vm485_vm0, %v5915_v19  ;;  %v5272_v29 = vadd.f32 %v5240_v21, %v5173_v44  ;;  %v6941_v52 = vpop.f32.mrb[102].mxu0  ;;  %v5916_v31 = vadd.f32 %v6961_v57, %v5884_v27  ;;  %v5769_v10 = vpop.f32.mrb[87].mxu1  ;;  %v5973_v38 = vld [vmem:[#allocation4] sm:$0xff]  ;;  %v6014_v55 = vmul.f32 %v9390_v0, %v5975_v63  ;;  %v5892_v19 = vld [vmem:[#allocation4 + $0x78] sm:$0xff] }
 0x652   : > { %5306 = vst.msk [vmem:[#allocation4 + $0xb0] sm:$0xff] %vm485_vm0, %v5274_v41  ;;  %5945 = vst.msk [vmem:[#allocation4 + $0x20] sm:$0xff] %vm485_vm0, %v5913_v20  ;;  %v5275_v28 = vadd.f32 %v6941_v52, %v5243_v24  ;;  %v5176_v39 = vpop.f32.mrb[103].mxu0  ;;  %v5914_v15 = vadd.f32 %v5882_v32, %v5769_v10  ;;  %v6012_v43 = vmul.f32 %v9390_v0, %v5973_v38  ;;  %v5976_v56 = vld [vmem:[#allocation4 + $0x18] sm:$0xff]  ;;  %v5890_v20 = vld [vmem:[#allocation4 + $0x68] sm:$0xff] }
 0x653   : > { %5304 = vst.msk [vmem:[#allocation4 + $0xa0] sm:$0xff] %vm485_vm0, %v5272_v29  ;;  %5948 = vst.msk [vmem:[#allocation4 + $0x38] sm:$0xff] %vm485_vm0, %v5916_v31  ;;  %v5273_v3 = vadd.f32 %v5241_v40, %v5176_v39  ;;  %v5974_v48 = vld [vmem:[#allocation4 + $0x8] sm:$0xff]  ;;  %v6015_v7 = vmul.f32 %v9390_v0, %v5976_v56  ;;  %v6053_v8 = vadd.f32 %v9392_v30, %v6014_v55  ;;  %v5247_v41 = vld [vmem:[#allocation4 + $0xd8] sm:$0xff] }
 0x654   : > { %5307 = vst.msk [vmem:[#allocation4 + $0xb8] sm:$0xff] %vm485_vm0, %v5275_v28  ;;  %5946 = vst.msk [vmem:[#allocation4 + $0x28] sm:$0xff] %vm485_vm0, %v5914_v15  ;;  %v6051_v34 = vadd.f32 %v9392_v30, %v6012_v43  ;;  %v6013_v42 = vmul.f32 %v9390_v0, %v5974_v48  ;;  %v5245_v52 = vld [vmem:[#allocation4 + $0xc8] sm:$0xff]  ;;  %v5895_v39 = vld [vmem:[#allocation4 + $0x90] sm:$0xff] }
 0x655   : > { %5305 = vst.msk [vmem:[#allocation4 + $0xa8] sm:$0xff] %vm485_vm0, %v5273_v3  ;;  %v6054_v36 = vadd.f32 %v9392_v30, %v6015_v7  ;;  %v6085_v18 = vmax.f32 %v6053_v8, 0.0  ;;  %v5894_v55 = vld [vmem:[#allocation4 + $0x88] sm:$0xff] }
 0x656   : > { %v6964_v26 = vpop.f32.mrb[88].mxu1  ;;  %v6083_v1 = vmax.f32 %v6051_v34, 0.0  ;;  %v6052_v54 = vadd.f32 %v9392_v30, %v6013_v42  ;;  %v5893_v34 = vld [vmem:[#allocation4 + $0x80] sm:$0xff] }
 0x657   : > { %v5919_v50 = vadd.f32 %v6964_v26, %v5887_v53  ;;  %v5782_v62 = vpop.f32.mrb[89].mxu1  ;;  %v6086_v57 = vmax.f32 %v6054_v36, 0.0  ;;  %v5896_v53 = vld [vmem:[#allocation4 + $0x98] sm:$0xff] }
 0x658   : > { %v5917_v6 = vadd.f32 %v5885_v45, %v5782_v62  ;;  %6115 = vxpose.xlu0.b32.start [1/16] (narrow) %v6083_v1, 8  ;;  %v6965_v58 = vpop.f32.mrb[90].mxu1  ;;  %v6084_v35 = vmax.f32 %v6052_v54, 0.0  ;;  %v5979_v38 = vld [vmem:[#allocation4 + $0x30] sm:$0xff] }
 0x659   : > { %5951 = vst.msk [vmem:[#allocation4 + $0x50] sm:$0xff] %vm485_vm0, %v5919_v50  ;;  %v5920_v59 = vadd.f32 %v6965_v58, %v5888_v22  ;;  %v5785_v4 = vpop.f32.mrb[91].mxu1  ;;  %v5977_v25 = vld [vmem:[#allocation4 + $0x20] sm:$0xff]  ;;  %v6018_v43 = vmul.f32 %v9390_v0, %v5979_v38 }
 0x65a   : > { %5949 = vst.msk [vmem:[#allocation4 + $0x40] sm:$0xff] %vm485_vm0, %v5917_v6  ;;  %v5918_v47 = vadd.f32 %v5886_v5, %v5785_v4  ;;  %v6016_v51 = vmul.f32 %v9390_v0, %v5977_v25  ;;  %v5980_v3 = vld [vmem:[#allocation4 + $0x38] sm:$0xff]  ;;  %v5899_v4 = vld [vmem:[#allocation4 + $0xb0] sm:$0xff]  ;;  %v5897_v25 = vld [vmem:[#allocation4 + $0xa0] sm:$0xff] }
 0x65b   : > { %5952 = vst.msk [vmem:[#allocation4 + $0x58] sm:$0xff] %vm485_vm0, %v5920_v59  ;;  %v5978_v60 = vld [vmem:[#allocation4 + $0x28] sm:$0xff]  ;;  %v6019_v56 = vmul.f32 %v9390_v0, %v5980_v3  ;;  %v6057_v45 = vadd.f32 %v9392_v30, %v6018_v43 }
 0x65c   : > { %5950 = vst.msk [vmem:[#allocation4 + $0x48] sm:$0xff] %vm485_vm0, %v5918_v47  ;;  %6116 = vxpose.xlu0.b32.cont [2/16] (narrow) %v6084_v35, 8  ;;  %v6055_v31 = vadd.f32 %v9392_v30, %v6016_v51  ;;  %v6017_v10 = vmul.f32 %v9390_v0, %v5978_v60  ;;  %v5250_v47 = vld [vmem:[#allocation4 + $0xf0] sm:$0xff] }
 0x65d   : > { %v6058_v58 = vadd.f32 %v9392_v30, %v6019_v56  ;;  %v6089_v5 = vmax.f32 %v6057_v45, 0.0 }
 0x65e   : > { %v6968_v12 = vpop.f32.mrb[92].mxu1  ;;  %v6944_v9 = vpop.f32.mrb[104].mxu0  ;;  %v6087_v40 = vmax.f32 %v6055_v31, 0.0  ;;  %v6056_v15 = vadd.f32 %v9392_v30, %v6017_v10 }
 0x65f   : > { %v5923_v49 = vadd.f32 %v6968_v12, %v5891_v13  ;;  %v5798_v37 = vpop.f32.mrb[93].mxu1  ;;  %v5278_v46 = vadd.f32 %v6944_v9, %v5246_v11  ;;  %v5189_v2 = vpop.f32.mrb[105].mxu0  ;;  %v5900_v11 = vld [vmem:[#allocation4 + $0xb8] sm:$0xff] }
 0x660   : > { %v5921_v33 = vadd.f32 %v5889_v61, %v5798_v37  ;;  %6117 = vxpose.xlu0.b32.cont [3/16] (narrow) %v6085_v18, 8  ;;  %v6969_v16 = vpop.f32.mrb[94].mxu1  ;;  %v5276_v14 = vadd.f32 %v5244_v17, %v5189_v2  ;;  %v6945_v23 = vpop.f32.mrb[106].mxu0  ;;  %v6088_v62 = vmax.f32 %v6056_v15, 0.0  ;;  %v5248_v18 = vld [vmem:[#allocation4 + $0xe0] sm:$0xff]  ;;  %v5251_v61 = vld [vmem:[#allocation4 + $0xf8] sm:$0xff] }
 0x661   : > { %5955 = vst.msk [vmem:[#allocation4 + $0x70] sm:$0xff] %vm485_vm0, %v5923_v49  ;;  %v5924_v44 = vadd.f32 %v6969_v16, %v5892_v19  ;;  %v5801_v21 = vpop.f32.mrb[95].mxu1  ;;  %5310 = vst.msk [vmem:[#allocation4 + $0xd0] sm:$0xff] %vm485_vm0, %v5278_v46  ;;  %v5279_v27 = vadd.f32 %v6945_v23, %v5247_v41  ;;  %v5192_v29 = vpop.f32.mrb[107].mxu0  ;;  %v5981_v6 = vld [vmem:[#allocation4 + $0x40] sm:$0xff]  ;;  %v5898_v2 = vld [vmem:[#allocation4 + $0xa8] sm:$0xff] }
 0x662   : > { %5953 = vst.msk [vmem:[#allocation4 + $0x60] sm:$0xff] %vm485_vm0, %v5921_v33  ;;  %v5922_v24 = vadd.f32 %v5890_v20, %v5801_v21  ;;  %5308 = vst.msk [vmem:[#allocation4 + $0xc0] sm:$0xff] %vm485_vm0, %v5276_v14  ;;  %v5277_v32 = vadd.f32 %v5245_v52, %v5192_v29  ;;  %v6020_v22 = vmul.f32 %v9390_v0, %v5981_v6  ;;  %v6090_v17 = vmax.f32 %v6058_v58, 0.0  ;;  %v5249_v23 = vld [vmem:[#allocation4 + $0xe8] sm:$0xff]  ;;  %v5983_v20 = vld [vmem:[#allocation4 + $0x50] sm:$0xff] }
 0x663   : > { %5956 = vst.msk [vmem:[#allocation4 + $0x78] sm:$0xff] %vm485_vm0, %v5924_v44  ;;  %5311 = vst.msk [vmem:[#allocation4 + $0xd8] sm:$0xff] %vm485_vm0, %v5279_v27  ;;  %v5982_v36 = vld [vmem:[#allocation4 + $0x48] sm:$0xff]  ;;  %v6022_v10 = vmul.f32 %v9390_v0, %v5983_v20 }
 0x664   : > { %5954 = vst.msk [vmem:[#allocation4 + $0x68] sm:$0xff] %vm485_vm0, %v5922_v24  ;;  %6118 = vxpose.xlu0.b32.cont [4/16] (narrow) %v6086_v57, 8  ;;  %5309 = vst.msk [vmem:[#allocation4 + $0xc8] sm:$0xff] %vm485_vm0, %v5277_v32  ;;  %v6059_v33 = vadd.f32 %v9392_v30, %v6020_v22  ;;  %v6021_v21 = vmul.f32 %v9390_v0, %v5982_v36  ;;  %v5984_v32 = vld [vmem:[#allocation4 + $0x58] sm:$0xff] }
 0x666   : > { %v6972_v28 = vpop.f32.mrb[96].mxu1  ;;  %v6091_v31 = vmax.f32 %v6059_v33, 0.0 }
 0x667   : > { %v5927_v48 = vadd.f32 %v6972_v28, %v5895_v39  ;;  %v5814_v63 = vpop.f32.mrb[97].mxu1  ;;  %v6060_v28 = vadd.f32 %v9392_v30, %v6021_v21 }
 0x668   : > { %v5925_v42 = vadd.f32 %v5893_v34, %v5814_v63  ;;  %6119 = vxpose.xlu0.b32.cont [5/16] (narrow) %v6087_v40, 8  ;;  %v6973_v26 = vpop.f32.mrb[98].mxu1  ;;  %v5903_v3 = vld [vmem:[#allocation4 + $0xd0] sm:$0xff] }
 0x669   : > { %5959 = vst.msk [vmem:[#allocation4 + $0x90] sm:$0xff] %vm485_vm0, %v5927_v48  ;;  %v5928_v1 = vadd.f32 %v6973_v26, %v5896_v53  ;;  %v5817_v54 = vpop.f32.mrb[99].mxu1  ;;  %v5901_v34 = vld [vmem:[#allocation4 + $0xc0] sm:$0xff]  ;;  %v6092_v45 = vmax.f32 %v6060_v28, 0.0  ;;  %v5987_v33 = vld [vmem:[#allocation4 + $0x70] sm:$0xff] }
 0x66a   : > { %5957 = vst.msk [vmem:[#allocation4 + $0x80] sm:$0xff] %vm485_vm0, %v5925_v42  ;;  %v5926_v50 = vadd.f32 %v5894_v55, %v5817_v54  ;;  %v6023_v42 = vmul.f32 %v9390_v0, %v5984_v32  ;;  %v6061_v54 = vadd.f32 %v9392_v30, %v6022_v10  ;;  %v5985_v22 = vld [vmem:[#allocation4 + $0x60] sm:$0xff] }
 0x66b   : > { %5960 = vst.msk [vmem:[#allocation4 + $0x98] sm:$0xff] %vm485_vm0, %v5928_v1  ;;  %v5904_v1 = vld [vmem:[#allocation4 + $0xd8] sm:$0xff]  ;;  %v5986_v36 = vld [vmem:[#allocation4 + $0x68] sm:$0xff] }
 0x66c   : > { %5958 = vst.msk [vmem:[#allocation4 + $0x88] sm:$0xff] %vm485_vm0, %v5926_v50  ;;  %6120 = vxpose.xlu0.b32.cont [6/16] (narrow) %v6088_v62, 8  ;;  %v5902_v62 = vld [vmem:[#allocation4 + $0xc8] sm:$0xff] }
 0x66e   : > { %v6976_v59 = vpop.f32.mrb[100].mxu1  ;;  %v6948_v7 = vpop.f32.mrb[108].mxu0 }
 0x66f   : > { %v5931_v35 = vadd.f32 %v6976_v59, %v5899_v4  ;;  %v5830_v8 = vpop.f32.mrb[101].mxu1  ;;  %v5282_v12 = vadd.f32 %v6948_v7, %v5250_v47  ;;  %v5205_v13 = vpop.f32.mrb[109].mxu0  ;;  %v6024_v47 = vmul.f32 %v9390_v0, %v5985_v22 }
 0x670   : > { %v5929_v51 = vadd.f32 %v5897_v25, %v5830_v8  ;;  %6121 = vxpose.xlu0.b32.cont [7/16] (narrow) %v6089_v5, 8  ;;  %v6977_v9 = vpop.f32.mrb[102].mxu1  ;;  %v5280_v49 = vadd.f32 %v5248_v18, %v5205_v13  ;;  %v6949_v37 = vpop.f32.mrb[110].mxu0  ;;  %v5991_v29 = vld [vmem:[#allocation4 + $0x90] sm:$0xff]  ;;  %v6062_v5 = vadd.f32 %v9392_v30, %v6023_v42 }
 0x671   : > { %5963 = vst.msk [vmem:[#allocation4 + $0xb0] sm:$0xff] %vm485_vm0, %v5931_v35  ;;  %v5932_v60 = vadd.f32 %v6977_v9, %v5900_v11  ;;  %v5833_v46 = vpop.f32.mrb[103].mxu1  ;;  %v5989_v16 = vld [vmem:[#allocation4 + $0x80] sm:$0xff]  ;;  %5314 = vst.msk [vmem:[#allocation4 + $0xf0] sm:$0xff] %vm485_vm0, %v5282_v12  ;;  %v5283_v19 = vadd.f32 %v6949_v37, %v5251_v61  ;;  %v5208_v14 = vpop.f32.mrb[111].mxu0  ;;  %v6030_v40 = vmul.f32 %v9390_v0, %v5991_v29  ;;  %v6093_v35 = vmax.f32 %v6061_v54, 0.0 }
 0x672   : > { %5961 = vst.msk [vmem:[#allocation4 + $0xa0] sm:$0xff] %vm485_vm0, %v5929_v51  ;;  %v5930_v41 = vadd.f32 %v5898_v2, %v5833_v46  ;;  %v6028_v44 = vmul.f32 %v9390_v0, %v5989_v16  ;;  %5312 = vst.msk [vmem:[#allocation4 + $0xe0] sm:$0xff] %vm485_vm0, %v5280_v49  ;;  %v5281_v57 = vadd.f32 %v5249_v23, %v5208_v14  ;;  %v5992_v15 = vld [vmem:[#allocation4 + $0x98] sm:$0xff]  ;;  %v6094_v49 = vmax.f32 %v6062_v5, 0.0 }
 0x673   : > { %5964 = vst.msk [vmem:[#allocation4 + $0xb8] sm:$0xff] %vm485_vm0, %v5932_v60  ;;  %v5990_v27 = vld [vmem:[#allocation4 + $0x88] sm:$0xff]  ;;  %5315 = vst.msk [vmem:[#allocation4 + $0xf8] sm:$0xff] %vm485_vm0, %v5283_v19  ;;  %v6031_v55 = vmul.f32 %v9390_v0, %v5992_v15  ;;  %v6069_v58 = vadd.f32 %v9392_v30, %v6030_v40  ;;  %v6063_v2 = vadd.f32 %v9392_v30, %v6024_v47 }
 0x674   : > { %5962 = vst.msk [vmem:[#allocation4 + $0xa8] sm:$0xff] %vm485_vm0, %v5930_v41  ;;  %6122 = vxpose.xlu0.b32.cont [8/16] (narrow) %v6090_v17, 8  ;;  %v6067_v52 = vadd.f32 %v9392_v30, %v6028_v44  ;;  %v6029_v24 = vmul.f32 %v9390_v0, %v5990_v27  ;;  %5313 = vst.msk [vmem:[#allocation4 + $0xe8] sm:$0xff] %vm485_vm0, %v5281_v57  ;;  %v6025_v17 = vmul.f32 %v9390_v0, %v5986_v36 }
 0x675   : > { %v6070_v7 = vadd.f32 %v9392_v30, %v6031_v55  ;;  %v6101_v8 = vmax.f32 %v6069_v58, 0.0 }
 0x676   : > { %v6099_v38 = vmax.f32 %v6067_v52, 0.0  ;;  %v6068_v39 = vadd.f32 %v9392_v30, %v6029_v24  ;;  %v6980_v43 = vpop.f32.mrb[104].mxu1  ;;  %v6026_v24 = vmul.f32 %v9390_v0, %v5987_v33  ;;  %v6064_v28 = vadd.f32 %v9392_v30, %v6025_v17 }
 0x677   : > { %v5935_v48 = vadd.f32 %v6980_v43, %v5903_v3  ;;  %v5846_v63 = vpop.f32.mrb[105].mxu1  ;;  %v6102_v46 = vmax.f32 %v6070_v7, 0.0 }
 0x678   : > { %6123 = vxpose.xlu0.b32.cont [9/16] (narrow) %v6091_v31, 8  ;;  %6147 = vxpose.xlu1.b32.start [1/16] (narrow) %v6099_v38, 8  ;;  %v5933_v26 = vadd.f32 %v5901_v34, %v5846_v63  ;;  %v6981_v53 = vpop.f32.mrb[106].mxu1  ;;  %v6100_v6 = vmax.f32 %v6068_v39, 0.0  ;;  %v5907_v13 = vld [vmem:[#allocation4 + $0xf0] sm:$0xff]  ;;  %v6095_v38 = vmax.f32 %v6063_v2, 0.0 }
 0x679   : > { %5967 = vst.msk [vmem:[#allocation4 + $0xd0] sm:$0xff] %vm485_vm0, %v5935_v48  ;;  %v5936_v56 = vadd.f32 %v6981_v53, %v5904_v1  ;;  %v5849_v50 = vpop.f32.mrb[107].mxu1  ;;  %v5993_v4 = vld [vmem:[#allocation4 + $0xa0] sm:$0xff]  ;;  %v5995_v27 = vld [vmem:[#allocation4 + $0xb0] sm:$0xff]  ;;  %v5988_v48 = vld [vmem:[#allocation4 + $0x78] sm:$0xff]  ;;  %v6065_v53 = vadd.f32 %v9392_v30, %v6026_v24 }
 0x67a   : > { %5965 = vst.msk [vmem:[#allocation4 + $0xc0] sm:$0xff] %vm485_vm0, %v5933_v26  ;;  %v5934_v59 = vadd.f32 %v5902_v62, %v5849_v50  ;;  %v6032_v25 = vmul.f32 %v9390_v0, %v5993_v4  ;;  %v5905_v11 = vld [vmem:[#allocation4 + $0xe0] sm:$0xff]  ;;  %v5908_v60 = vld [vmem:[#allocation4 + $0xf8] sm:$0xff]  ;;  %v6034_v3 = vmul.f32 %v9390_v0, %v5995_v27  ;;  %v6096_v26 = vmax.f32 %v6064_v28, 0.0 }
 0x67b   : > { %5968 = vst.msk [vmem:[#allocation4 + $0xd8] sm:$0xff] %vm485_vm0, %v5936_v56  ;;  %v5994_v18 = vld [vmem:[#allocation4 + $0xa8] sm:$0xff]  ;;  %v5996_v34 = vld [vmem:[#allocation4 + $0xb8] sm:$0xff]  ;;  %v6027_v1 = vmul.f32 %v9390_v0, %v5988_v48  ;;  %v6097_v5 = vmax.f32 %v6065_v53, 0.0 }
 0x67c   : > { %6124 = vxpose.xlu0.b32.cont [10/16] (narrow) %v6092_v45, 8  ;;  %6148 = vxpose.xlu1.b32.cont [2/16] (narrow) %v6100_v6, 8  ;;  %5966 = vst.msk [vmem:[#allocation4 + $0xc8] sm:$0xff] %vm485_vm0, %v5934_v59  ;;  %v5906_v23 = vld [vmem:[#allocation4 + $0xe8] sm:$0xff]  ;;  %v6071_v41 = vadd.f32 %v9392_v30, %v6032_v25  ;;  %v6033_v44 = vmul.f32 %v9390_v0, %v5994_v18 }
 0x67d   : > { %v6073_v56 = vadd.f32 %v9392_v30, %v6034_v3  ;;  %v6035_v50 = vmul.f32 %v9390_v0, %v5996_v34 }
 0x67e   : > { %v6984_v12 = vpop.f32.mrb[108].mxu1  ;;  %v6103_v15 = vmax.f32 %v6071_v41, 0.0  ;;  %v6072_v43 = vadd.f32 %v9392_v30, %v6033_v44 }
 0x67f   : > { %v5939_v51 = vadd.f32 %v6984_v12, %v5907_v13  ;;  %v5862_v9 = vpop.f32.mrb[109].mxu1  ;;  %v6074_v25 = vadd.f32 %v9392_v30, %v6035_v50 }
 0x680   : > { %6125 = vxpose.xlu0.b32.cont [11/16] (narrow) %v6093_v35, 8  ;;  %6149 = vxpose.xlu1.b32.cont [3/16] (narrow) %v6101_v8, 8  ;;  %v5937_v37 = vadd.f32 %v5905_v11, %v5862_v9  ;;  %v6985_v61 = vpop.f32.mrb[110].mxu1  ;;  %v5999_v16 = vld [vmem:[#allocation4 + $0xd0] sm:$0xff]  ;;  %v6104_v55 = vmax.f32 %v6072_v43, 0.0  ;;  %v6105_v35 = vmax.f32 %v6073_v56, 0.0  ;;  %v6066_v8 = vadd.f32 %v9392_v30, %v6027_v1 }
 0x681   : > { %5971 = vst.msk [vmem:[#allocation4 + $0xf0] sm:$0xff] %vm485_vm0, %v5939_v51  ;;  %v5940_v19 = vadd.f32 %v6985_v61, %v5908_v60  ;;  %v5865_v14 = vpop.f32.mrb[111].mxu1  ;;  %v5997_v21 = vld [vmem:[#allocation4 + $0xc0] sm:$0xff]  ;;  %v6038_v20 = vmul.f32 %v9390_v0, %v5999_v16  ;;  %v6106_v18 = vmax.f32 %v6074_v25, 0.0 }
 0x682   : > { %5969 = vst.msk [vmem:[#allocation4 + $0xe0] sm:$0xff] %vm485_vm0, %v5937_v37  ;;  %v5938_v57 = vadd.f32 %v5906_v23, %v5865_v14  ;;  %v6036_v29 = vmul.f32 %v9390_v0, %v5997_v21  ;;  %v6000_v52 = vld [vmem:[#allocation4 + $0xd8] sm:$0xff]  ;;  %v6098_v13 = vmax.f32 %v6066_v8, 0.0 }
 0x683   : > { %5972 = vst.msk [vmem:[#allocation4 + $0xf8] sm:$0xff] %vm485_vm0, %v5940_v19  ;;  %v5998_v31 = vld [vmem:[#allocation4 + $0xc8] sm:$0xff]  ;;  %v6077_v10 = vadd.f32 %v9392_v30, %v6038_v20  ;;  %v6039_v32 = vmul.f32 %v9390_v0, %v6000_v52 }
 0x684   : > { %6126 = vxpose.xlu0.b32.cont [12/16] (narrow) %v6094_v49, 8  ;;  %6150 = vxpose.xlu1.b32.cont [4/16] (narrow) %v6102_v46, 8  ;;  %5970 = vst.msk [vmem:[#allocation4 + $0xe8] sm:$0xff] %vm485_vm0, %v5938_v57  ;;  %v6075_v39 = vadd.f32 %v9392_v30, %v6036_v29  ;;  %v6037_v40 = vmul.f32 %v9390_v0, %v5998_v31 }
 0x685   : > { %v6078_v63 = vadd.f32 %v9392_v30, %v6039_v32 }
 0x686   : > { %v6076_v42 = vadd.f32 %v9392_v30, %v6037_v40  ;;  %v6107_v51 = vmax.f32 %v6075_v39, 0.0 }
 0x687   : > { %v6110_v11 = vmax.f32 %v6078_v63, 0.0 }
 0x688   : > { %6127 = vxpose.xlu0.b32.cont [13/16] (narrow) %v6095_v38, 8  ;;  %6151 = vxpose.xlu1.b32.cont [5/16] (narrow) %v6103_v15, 8  ;;  %v6003_v54 = vld [vmem:[#allocation4 + $0xf0] sm:$0xff]  ;;  %v6108_v9 = vmax.f32 %v6076_v42, 0.0 }
 0x689   : > { %v6001_v62 = vld [vmem:[#allocation4 + $0xe0] sm:$0xff]  ;;  %v6042_v45 = vmul.f32 %v9390_v0, %v6003_v54 }
 0x68a   : > { %v6040_v6 = vmul.f32 %v9390_v0, %v6001_v62  ;;  %v6004_v58 = vld [vmem:[#allocation4 + $0xf8] sm:$0xff] }
 0x68b   : > { %v6002_v22 = vld [vmem:[#allocation4 + $0xe8] sm:$0xff]  ;;  %v6081_v59 = vadd.f32 %v9392_v30, %v6042_v45  ;;  %v6043_v4 = vmul.f32 %v9390_v0, %v6004_v58 }
 0x68c   : > { %6128 = vxpose.xlu0.b32.cont [14/16] (narrow) %v6096_v26, 8  ;;  %6152 = vxpose.xlu1.b32.cont [6/16] (narrow) %v6104_v55, 8  ;;  %v6079_v7 = vadd.f32 %v9392_v30, %v6040_v6  ;;  %v6041_v47 = vmul.f32 %v9390_v0, %v6002_v22  ;;  %v6109_v0 = vmax.f32 %v6077_v10, 0.0 }
 0x68d   : > { %v6082_v36 = vadd.f32 %v9392_v30, %v6043_v4 }
 0x68e   : > { %v6080_v12 = vadd.f32 %v9392_v30, %v6041_v47  ;;  %v6111_v49 = vmax.f32 %v6079_v7, 0.0  ;;  %v6113_v30 = vmax.f32 %v6081_v59, 0.0 }
 0x68f   : > { %v6114_v61 = vmax.f32 %v6082_v36, 0.0 }
 0x690   : > { %6129 = vxpose.xlu0.b32.cont [15/16] (narrow) %v6097_v5, 8  ;;  %6153 = vxpose.xlu1.b32.cont [7/16] (narrow) %v6105_v35, 8  ;;  %v6112_v37 = vmax.f32 %v6080_v12, 0.0 }
 0x694   : > { %6130 = vxpose.xlu0.b32.end [16/16] (narrow) %v6098_v13, 8  ;;  %6154 = vxpose.xlu1.b32.cont [8/16] (narrow) %v6106_v18, 8 }
 0x698   : > { %6155 = vxpose.xlu1.b32.cont [9/16] (narrow) %v6107_v51, 8 }
 0x69c   : > { %6156 = vxpose.xlu1.b32.cont [10/16] (narrow) %v6108_v9, 8 }
 0x6a0   : > { %6157 = vxpose.xlu1.b32.cont [11/16] (narrow) %v6109_v0, 8 }
 0x6a4   : > { %6158 = vxpose.xlu1.b32.cont [12/16] (narrow) %v6110_v11, 8 }
 0x6a8   : > { %6159 = vxpose.xlu1.b32.cont [13/16] (narrow) %v6111_v49, 8 }
 0x6ac   : > { %6160 = vxpose.xlu1.b32.cont [14/16] (narrow) %v6112_v37, 8 }
 0x6b0   : > { %6161 = vxpose.xlu1.b32.cont [15/16] (narrow) %v6113_v30, 8 }
 0x6b4   : > { %6162 = vxpose.xlu1.b32.end [16/16] (narrow) %v6114_v61, 8 }
 0x6d8   : > { %v6131_v60 = vpop.trf.xlu0 }
 0x6d9   : > { %6179 = vst [vmem:[%s483_s17] sm:$0xff] %v6131_v60 }
 0x6f8   : > { %v6163_v46 = vpop.trf.xlu1 }
 0x6f9   : > { %6180 = vst [vmem:[%s483_s17 + $0x8] sm:$0xff] %v6163_v46 }
 0x6fa   : > { %7403 = shalt.err (!%p7400_p3)
}
 0x6fb   : > { %s7404_s6 = scalar_lea.hbm %s9505_s28, 256  ;;  %s7408_s27 = scalar_lea.hbm %s9600_s20, 512 }
 0x6fc   : > { %p7405_p10 = scmp.ne.s32.totalorder %s9505_s28, %s7404_s6  ;;  %p7409_p12 = scmp.lt.u32.totalorder %s9505_s28, %s9600_s20 }
 0x6fd   : > { %p7410_p2 = scmp.lt.u32.totalorder %s7408_s27, %s7404_s6  ;;  %p7412_p6 = scmp.lt.u32.totalorder %s7404_s6, %s9505_s28 }
 0x6fe   : > { %p7406_p1 = pnand %p7405_p10, %p9601_p9 }
 0x6ff   : > { %p7411_p13 = por %p7410_p2, %p7409_p12 }
 0x700   : > { %p7407_p11 = pneg %p7406_p1 }
 0x701   : > { %p7413_p0 = por %p7412_p6, %p7411_p13 }
 0x703   : > { %p7414_p5 = pnand %p7413_p0, %p7407_p11 }
 0x705   : > { %7417 = shalt.err (!%p7414_p5)
}
 0x706   : > { %7024 = dma.vmem_to_hbm [thread:$0]  (%p9601_p9), %s9500_s22, 256, %s9505_s28, %s6182_s26  }
 0x707 PF: > { %s6208_s25 = sand.u32 1, %s7464_s30   ;;  %p9602_p7 = scmp.ne.s32.totalorder %s9585_s24, 0 }
 0x708   : > { %p9603_p8 = scmp.ge.s32.totalorder %s7476_s12, 2  ;;  %s6209_s29 = scalar_lea.sflag [#allocation7], %s6208_s25 }
 0x70a   : > { %p7056_p4 = pnand %p9603_p8, %p9602_p7 }
 0x70c   : > { %7459 = dma.done.wait (!%p7056_p4), %s6209_s29, 256  }
 0x70d   : > { %7461 = vsyncadd (!%p7056_p4), %s6209_s29, 4294967040  ;;  %p28_p3 = scmp.ge.s32.totalorder %s7745_s19, 4   ;;  %s9604_s30 = smov %s7468_s10 }
 0x70e   : > { %s9605_s10 = smov %s7472_s11  ;;  %s9606_s11 = smov %s7757_s14 }
 0x70f   : > { %s9607_s12 = smov %s7745_s19  ;;  %30 = sbr.rel (!%p28_p3) target bundleno = 18 (0x12), region = 149 }
 0x716   :  { %6214 = vsyncpa [#allocation6], 1 }
 0x717   :  { %6216 = vsyncpa [#allocation6 + $0x1], 1 }
 0x718   :  { %6217 = vsyncpa [#allocation9], 1 }
 0x719   :  { %6219 = vsyncpa [#allocation9 + $0x1], 1 }
 0x71a   :  { %6220 = vsyncpa [#allocation12], 1 }
 0x71b   :  { %6221 = vsyncpa [#allocation15], 1 }
 0x71c   :  { %6222 = vsyncpa [#allocation18], 1 }
 0x71d   :  { %6223 = vsyncpa [#allocation7], 1 }
 0x71e   :  { %6225 = vsyncpa [#allocation7 + $0x1], 1 }

</bundles_post_ra>
